<compile_context>
chip_gen: v7x
topology: tpu7x:2x2x1
jax: 0.10.0
libtpu: 0.0.40
codegen_flags: <defaults>
</compile_context>

<pallas_src>
import functools

import jax
import jax.numpy as jnp
from jax.experimental import pallas as pl
from jax.experimental.pallas import tpu as pltpu


def _round_up(x, m):
    return (x + m - 1) // m * m


# ----------------------------------------------------------------------------
# Pallas kernel: per-temporal-tap matmul accumulation + fused bias/activation
# ----------------------------------------------------------------------------
def _conv_tap_kernel(act, x_ref, w_ref, b_ref, o_ref, acc_ref):
    dt = pl.program_id(2)

    @pl.when(dt == 0)
    def _():
        acc_ref[...] = jnp.zeros_like(acc_ref)

    # (Ms, Kp) bf16 @ (Kp, Cp) bf16 -> f32 accumulator.
    acc_ref[...] += jnp.dot(x_ref[0], w_ref[0],
                            preferred_element_type=jnp.float32)

    @pl.when(dt == pl.num_programs(2) - 1)
    def _():
        r = acc_ref[...] + b_ref[...]          # f32 epilogue math (v5e-safe)
        if act == "relu":
            r = jnp.maximum(r, 0.0)
        o_ref[0] = r.astype(o_ref.dtype)


# ----------------------------------------------------------------------------
# Conv3d (stride 1) with temporal taps handled inside the Pallas grid.
# ----------------------------------------------------------------------------
def conv3d(x, cp, padding, act="relu"):
    """x: (N, T, W, H, Cin) f32; cp: prepared (BN-folded, padded, bf16) params."""
    pt, pw, ph = padding
    kt, kw, kh = cp["kt"], cp["kw"], cp["kh"]
    N, T, W, H, C = x.shape
    Kp, Cp = cp["w"].shape[1], cp["w"].shape[2]

    xp = jnp.pad(x, ((0, 0), (pt, pt), (pw, pw), (ph, ph), (0, 0)))
    Tp = T + 2 * pt
    Wo = W + 2 * pw - kw + 1
    Ho = H + 2 * ph - kh + 1
    To = Tp - kt + 1
    Ms = Wo * Ho

    # Spatial-only tap gather, concatenated on the lane (channel) axis in the
    # same (dw, dh, cin) order the weight matrix was flattened with.
    cols = [xp[:, :, dw:dw + Wo, dh:dh + Ho, :]
            for dw in range(kw) for dh in range(kh)]
    xs = cols[0] if len(cols) == 1 else jnp.concatenate(cols, axis=-1)
    K = kw * kh * C
    xs = jnp.pad(xs, ((0, 0),) * 4 + ((0, Kp - K),)).astype(jnp.bfloat16)
    xs = xs.reshape(N * Tp, Ms, Kp)

    flops = 2 * N * To * kt * Ms * Kp * Cp
    bytes_accessed = (xs.size * 2 * kt + cp["w"].size * 2
                      + N * To * Ms * Cp * 4)

    out = pl.pallas_call(
        functools.partial(_conv_tap_kernel, act),
        out_shape=jax.ShapeDtypeStruct((N * To, Ms, Cp), jnp.float32),
        grid_spec=pltpu.PrefetchScalarGridSpec(
            num_scalar_prefetch=0,
            grid=(N, To, kt),
            in_specs=[
                # temporal tap dt reads output-frame slice (t + dt) of xs
                pl.BlockSpec((1, Ms, Kp), lambda n, t, d: (n * Tp + t + d, 0, 0)),
                pl.BlockSpec((1, Kp, Cp), lambda n, t, d: (d, 0, 0)),
                pl.BlockSpec((1, Cp), lambda n, t, d: (0, 0)),
            ],
            out_specs=pl.BlockSpec((1, Ms, Cp),
                                   lambda n, t, d: (n * To + t, 0, 0)),
            scratch_shapes=[pltpu.VMEM((Ms, Cp), jnp.float32)],
        ),
        compiler_params=pltpu.CompilerParams(
            dimension_semantics=("parallel", "parallel", "arbitrary")),
        cost_estimate=pl.CostEstimate(flops=flops, transcendentals=0,
                                      bytes_accessed=bytes_accessed),
    )(xs, cp["w"], cp["b"])

    return out.reshape(N, To, Wo, Ho, Cp)[..., :cp["cout"]]


# ----------------------------------------------------------------------------
# One-time parameter preparation (BN fold, weight reorder, pad, bf16 cast)
# ----------------------------------------------------------------------------
def _fold_bn(w, b, bn, eps=1e-5):
    gamma, beta, mean, var = bn
    scale = gamma / jnp.sqrt(var + eps)
    return w * scale[:, None, None, None, None], (b - mean) * scale + beta


def prep_conv(w, b, bn=None):
    """w: (Cout, Cin, kt, kw, kh) PyTorch layout -> per-tap padded bf16 mats."""
    if bn is not None:
        w, b = _fold_bn(w, b, bn)
    Cout, Cin, kt, kw, kh = w.shape
    K = kw * kh * Cin
    Kp, Cp = _round_up(K, 128), _round_up(Cout, 128)
    # rows flattened as (dw, dh, cin) -> matches the activation gather order
    wm = jnp.transpose(w, (2, 3, 4, 1, 0)).reshape(kt, K, Cout)
    wm = jnp.pad(wm, ((0, 0), (0, Kp - K), (0, Cp - Cout))).astype(jnp.bfloat16)
    bias = jnp.pad(b, (0, Cp - Cout)).reshape(1, Cp).astype(jnp.float32)
    return {"w": wm, "b": bias, "kt": kt, "kw": kw, "kh": kh, "cout": Cout}


def prep_upsample(wT, b, bn, eps=1e-5):
    """ConvTranspose3d(64,64,[4,1,1],s=[2,1,1],p=[1,0,0]) + BN, as polyphase."""
    gamma, beta, mean, var = bn
    scale = gamma / jnp.sqrt(var + eps)
    taps = [wT[:, :, k, 0, 0] * scale[None, :] for k in range(4)]   # (Cin, Cout)
    wstack = jnp.concatenate(taps, axis=1)                          # (64, 256)
    Cin, Co4 = wstack.shape
    Kp = _round_up(Cin, 128)
    wm = jnp.pad(wstack, ((0, Kp - Cin), (0, 0))).astype(jnp.bfloat16)[None]
    mm = {"w": wm, "b": jnp.zeros((1, Co4), jnp.float32),
          "kt": 1, "kw": 1, "kh": 1, "cout": Co4}
    b_eff = (b - mean) * scale + beta
    return {"mm": mm, "bias": b_eff}


def prep_tq(p):
    w, b = _fold_bn(p["comp_w"], p["comp_b"], p["comp_bn"])
    return {"comp_w": w[:, :, 0, 0, 0], "comp_b": b,
            "tem_w": p["tem_w"][0, :, :, 0, 0],    # (compressed_c, k)
            "tem_k": p["tem_k"]}


def prepare_params(p):
    pp = {}
    for name in ("cb1", "cb2", "cb3", "cb4", "cb5", "cb6", "cb7", "cb8", "cb9"):
        pp[name] = prep_conv(p[name]["w"], p[name]["b"], p[name]["bn"])
    pp["up1"] = prep_upsample(p["up1"]["wT"], p["up1"]["b"], p["up1"]["bn"])
    pp["up2"] = prep_upsample(p["up2"]["wT"], p["up2"]["b"], p["up2"]["bn"])
    pp["tq"] = prep_tq(p["tq"])
    pp["cb10"] = {"w": p["cb10"]["w"][:, :, 0, 0, 0], "b": p["cb10"]["b"]}
    return pp


# ----------------------------------------------------------------------------
# Small jnp pieces (pooling, polyphase combine, tiny 1x1x1 convs)
# ----------------------------------------------------------------------------
def maxpool(x, pool):
    pt, pw, ph = pool
    N, T, W, H, C = x.shape
    x = x.reshape(N, T // pt, pt, W // pw, pw, H // ph, ph, C)
    return jnp.max(x, axis=(2, 4, 6))


def conv_transpose_temporal(x, up):
    # Polyphase: y[2m] = x[m]@W1 + x[m-1]@W3 ; y[2m+1] = x[m+1]@W0 + x[m]@W2.
    N, T, W, H, C = x.shape
    P = conv3d(x, up["mm"], (0, 0, 0), act="none")          # (N,T,W,H,256)
    P0, P1, P2, P3 = jnp.split(P, 4, axis=-1)
    zero = jnp.zeros_like(P0[:, :1])
    even = P1 + jnp.concatenate([zero, P3[:, :-1]], axis=1)
    odd = P2 + jnp.concatenate([P0[:, 1:], zero], axis=1)
    y = jnp.stack([even, odd], axis=2).reshape(N, 2 * T, W, H, C)
    return jax.nn.elu(y + up["bias"])


def tq_forward(x, tq):
    # Temporal_Quality_Module.  Tiny-N convs -> plain jnp (MXU util would be <6%).
    N, T, W, H, C = x.shape
    comp = jax.nn.relu(
        jnp.einsum("ntwhc,oc->ntwho", x, tq["comp_w"]) + tq["comp_b"])
    k = tq["tem_k"]
    cpd = jnp.pad(comp, ((0, 0), (k // 2, k // 2), (0, 0), (0, 0), (0, 0)))
    q = sum(jnp.einsum("ntwhc,c->ntwh", cpd[:, dt:dt + T], tq["tem_w"][:, dt])
            for dt in range(k))
    qw = jax.nn.sigmoid(q)
    return x * qw[..., None], qw


# ----------------------------------------------------------------------------
# Full PhysNet forward
# ----------------------------------------------------------------------------
def physnet_forward(x_ncthw, pp, frames):
    x_visual = x_ncthw
    x = jnp.transpose(x_ncthw, (0, 2, 3, 4, 1)).astype(jnp.float32)  # NTWHC

    x = conv3d(x, pp["cb1"], (0, 2, 2), act="relu")
    x = maxpool(x, (1, 2, 2))
    x = conv3d(x, pp["cb2"], (1, 1, 1), act="relu")
    x_visual6464 = conv3d(x, pp["cb3"], (1, 1, 1), act="relu")
    x = maxpool(x_visual6464, (2, 2, 2))
    x = conv3d(x, pp["cb4"], (1, 1, 1), act="relu")
    x_visual3232 = conv3d(x, pp["cb5"], (1, 1, 1), act="relu")
    x = maxpool(x_visual3232, (2, 2, 2))
    x = conv3d(x, pp["cb6"], (1, 1, 1), act="relu")
    x_visual1616 = conv3d(x, pp["cb7"], (1, 1, 1), act="relu")
    x = maxpool(x_visual1616, (1, 2, 2))
    x = conv3d(x, pp["cb8"], (1, 1, 1), act="relu")
    x = conv3d(x, pp["cb9"], (1, 1, 1), act="relu")

    x, quality_w = tq_forward(x, pp["tq"])

    x = conv_transpose_temporal(x, pp["up1"])
    x = conv_transpose_temporal(x, pp["up2"])

    # AdaptiveAvgPool3d((frames,1,1)): temporal length already equals frames,
    # so it reduces to a spatial mean.
    assert x.shape[1] == frames
    x = jnp.mean(x, axis=(2, 3), keepdims=True)               # (N,frames,1,1,64)
    x = jnp.einsum("ntwhc,oc->ntwho", x, pp["cb10"]["w"]) + pp["cb10"]["b"]
    rPPG_peak = jnp.transpose(x[:, :, 0, 0, :], (0, 2, 1))    # (N, 2, frames)

    to_ncthw = lambda y: jnp.transpose(y, (0, 4, 1, 2, 3))
    return (rPPG_peak, x_visual, to_ncthw(x_visual3232),
            to_ncthw(x_visual1616), quality_w)


# ----------------------------------------------------------------------------
# Deterministic parameter initialization (shapes from the PyTorch __init__)
# ----------------------------------------------------------------------------
def init_params(key, temporal_k=5):
    def conv_p(k, cout, cin, ksz):
        k1, k2 = jax.random.split(k)
        w = jax.random.normal(k1, (cout, cin) + ksz, jnp.float32) * 0.05
        b = jax.random.normal(k2, (cout,), jnp.float32) * 0.05
        return w, b

    def bn_p(k, c):
        k1, k2, k3, k4 = jax.random.split(k, 4)
        gamma = 1.0 + 0.1 * jax.random.normal(k1, (c,), jnp.float32)
        beta = 0.05 * jax.random.normal(k2, (c,), jnp.float32)
        mean = 0.05 * jax.random.normal(k3, (c,), jnp.float32)
        var = 1.0 + 0.1 * jnp.abs(jax.random.normal(k4, (c,), jnp.float32))
        return gamma, beta, mean, var

    keys = iter(jax.random.split(key, 64))
    p = {}
    blocks = [
        ("cb1", 16, 3, (1, 5, 5)), ("cb2", 32, 16, (3, 3, 3)),
        ("cb3", 64, 32, (3, 3, 3)), ("cb4", 64, 64, (3, 3, 3)),
        ("cb5", 64, 64, (3, 3, 3)), ("cb6", 64, 64, (3, 3, 3)),
        ("cb7", 64, 64, (3, 3, 3)), ("cb8", 64, 64, (3, 3, 3)),
        ("cb9", 64, 64, (3, 3, 3)),
    ]
    for name, co, ci, ks in blocks:
        w, b = conv_p(next(keys), co, ci, ks)
        p[name] = {"w": w, "b": b, "bn": bn_p(next(keys), co)}
    for name in ("up1", "up2"):
        k1, k2 = jax.random.split(next(keys))
        wT = jax.random.normal(k1, (64, 64, 4, 1, 1), jnp.float32) * 0.05
        b = jax.random.normal(k2, (64,), jnp.float32) * 0.05
        p[name] = {"wT": wT, "b": b, "bn": bn_p(next(keys), 64)}
    w, b = conv_p(next(keys), 2, 64, (1, 1, 1))
    p["cb10"] = {"w": w, "b": b}
    w, b = conv_p(next(keys), 8, 64, (1, 1, 1))
    p["tq"] = {
        "comp_w": w, "comp_b": b, "comp_bn": bn_p(next(keys), 8),
        "tem_w": jax.random.normal(next(keys), (1, 8, temporal_k, 1, 1),
                                   jnp.float32) * 0.05,
        "tem_k": temporal_k,
    }
    return p


if __name__ == "__main__":
    key = jax.random.PRNGKey(0)
    kp, kx = jax.random.split(key)
    B, C, T, W, H = 2, 3, 8, 16, 16      # small shapes; frames == T
    raw_params = init_params(kp, temporal_k=5)
    prep = prepare_params(raw_params)    # BN fold / pad / bf16 cast done ONCE
    x = jax.random.normal(kx, (B, C, T, W, H), jnp.float32)

    fwd = jax.jit(lambda inp: physnet_forward(inp, prep, frames=T))
    outs = fwd(x)
    jax.block_until_ready(outs)

    rppg, xv, xv32, xv16, qw = outs
    assert rppg.shape == (B, 2, T)
    assert xv.shape == (B, C, T, W, H)
    assert xv32.shape == (B, 64, T // 2, W // 4, H // 4)
    assert xv16.shape == (B, 64, T // 4, W // 8, H // 8)
    assert qw.shape == (B, T // 4, W // 16, H // 16)
    print("KERNEL_OK")
</pallas_src>

<mosaic_0001>
module attributes {stable_mosaic.version = 11 : i64} {
  func.func @_conv_tap_kernel(%arg0: i32, %arg1: i32, %arg2: i32, %arg3: memref<1x256x128xbf16, #tpu.memory_space<vmem>>, %arg4: memref<1x128x128xbf16, #tpu.memory_space<vmem>>, %arg5: memref<1x128xf32, #tpu.memory_space<vmem>>, %arg6: memref<1x256x128xf32, #tpu.memory_space<vmem>>, %arg7: memref<256x128xf32, #tpu.memory_space<vmem>>) attributes {dimension_semantics = [#tpu.dimension_semantics<parallel>, #tpu.dimension_semantics<parallel>, #tpu.dimension_semantics<arbitrary>], iteration_bounds = array<i64: 2, 8, 1>, scalar_prefetch = 0 : i64, scratch_operands = 1 : i64, tpu.core_type = #tpu.core_type<tc>, window_params = [{transform_indices = @transform_0, window_bounds = array<i64: 1, 256, 128>}, {transform_indices = @transform_1, window_bounds = array<i64: 1, 128, 128>}, {pipeline_mode = #tpu.pipeline_mode<synchronous>, transform_indices = @transform_2, window_bounds = array<i64: 1, 128>}, {transform_indices = @transform_3, window_bounds = array<i64: 1, 256, 128>}]} {
    %c0_i32 = arith.constant 0 : i32
    %0 = arith.cmpi eq, %arg2, %c0_i32 : i32
    %1 = arith.extui %0 : i1 to i32
    %c0_i32_0 = arith.constant 0 : i32
    %2 = arith.cmpi ne, %1, %c0_i32_0 : i32
    scf.if %2 {
      %cst_12 = arith.constant 0.000000e+00 : f32
      %14 = vector.broadcast %cst_12 : f32 to vector<256x128xf32>
      %c0_13 = arith.constant 0 : index
      %c0_14 = arith.constant 0 : index
      %15 = vector.load %arg7[%c0_13, %c0_14] : memref<256x128xf32, #tpu.memory_space<vmem>>, vector<256x128xf32>
      tpu.vector_store %arg7[%c0_13, %c0_14], %14 {strides = array<i32>} : memref<256x128xf32, #tpu.memory_space<vmem>>, vector<256x128xf32>,
    } else {
    }
    %c0 = arith.constant 0 : index
    %c0_1 = arith.constant 0 : index
    %3 = vector.load %arg7[%c0, %c0_1] : memref<256x128xf32, #tpu.memory_space<vmem>>, vector<256x128xf32>
    %c0_2 = arith.constant 0 : index
    %c0_3 = arith.constant 0 : index
    %c0_4 = arith.constant 0 : index
    %4 = vector.load %arg3[%c0_2, %c0_3, %c0_4] : memref<1x256x128xbf16, #tpu.memory_space<vmem>>, vector<1x256x128xbf16>
    %5 = vector.shape_cast %4 : vector<1x256x128xbf16> to vector<256x128xbf16>
    %c0_5 = arith.constant 0 : index
    %c0_6 = arith.constant 0 : index
    %c0_7 = arith.constant 0 : index
    %6 = vector.load %arg4[%c0_5, %c0_6, %c0_7] : memref<1x128x128xbf16, #tpu.memory_space<vmem>>, vector<1x128x128xbf16>
    %7 = vector.shape_cast %6 : vector<1x128x128xbf16> to vector<128x128xbf16>
    %cst = arith.constant dense<0.000000e+00> : vector<256x128xf32>
    %8 = tpu.matmul %5, %7, %cst {dimension_numbers = #tpu.dot_dimension_numbers<[1], [0], [0], [1], [0, 0, 1, 1], [], []>} : vector<256x128xbf16>, vector<128x128xbf16>, vector<256x128xf32> -> vector<256x128xf32>
    %9 = arith.addf %3, %8 : vector<256x128xf32>
    %c0_8 = arith.constant 0 : index
    %c0_9 = arith.constant 0 : index
    %10 = vector.load %arg7[%c0_8, %c0_9] : memref<256x128xf32, #tpu.memory_space<vmem>>, vector<256x128xf32>
    tpu.vector_store %arg7[%c0_8, %c0_9], %9 {strides = array<i32>} : memref<256x128xf32, #tpu.memory_space<vmem>>, vector<256x128xf32>,
    %c0_i32_10 = arith.constant 0 : i32
    %11 = arith.cmpi eq, %arg2, %c0_i32_10 : i32
    %12 = arith.extui %11 : i1 to i32
    %c0_i32_11 = arith.constant 0 : i32
    %13 = arith.cmpi ne, %12, %c0_i32_11 : i32
    scf.if %13 {
      %c0_12 = arith.constant 0 : index
      %c0_13 = arith.constant 0 : index
      %14 = vector.load %arg7[%c0_12, %c0_13] : memref<256x128xf32, #tpu.memory_space<vmem>>, vector<256x128xf32>
      %c0_14 = arith.constant 0 : index
      %c0_15 = arith.constant 0 : index
      %15 = vector.load %arg5[%c0_14, %c0_15] : memref<1x128xf32, #tpu.memory_space<vmem>>, vector<1x128xf32>
      %16 = vector.broadcast %15 : vector<1x128xf32> to vector<256x128xf32>
      %17 = arith.addf %14, %16 : vector<256x128xf32>
      %cst_16 = arith.constant 0.000000e+00 : f32
      %18 = vector.broadcast %cst_16 : f32 to vector<256x128xf32>
      %19 = arith.maximumf %17, %18 : vector<256x128xf32>
      %c0_17 = arith.constant 0 : index
      %c0_18 = arith.constant 0 : index
      %c0_19 = arith.constant 0 : index
      %20 = vector.load %arg6[%c0_17, %c0_18, %c0_19] : memref<1x256x128xf32, #tpu.memory_space<vmem>>, vector<1x256x128xf32>
      %21 = vector.shape_cast %20 : vector<1x256x128xf32> to vector<256x128xf32>
      %22 = vector.shape_cast %19 : vector<256x128xf32> to vector<1x256x128xf32>
      tpu.vector_store %arg6[%c0_17, %c0_18, %c0_19], %22 {strides = array<i32>} : memref<1x256x128xf32, #tpu.memory_space<vmem>>, vector<1x256x128xf32>,
    } else {
    }
    return
  }
  func.func @transform_0(%arg0: i32, %arg1: i32, %arg2: i32) -> (i32, i32, i32) {
    %c8_i32 = arith.constant 8 : i32
    %0 = arith.muli %arg0, %c8_i32 : i32
    %1 = arith.addi %0, %arg1 : i32
    %2 = arith.addi %1, %arg2 : i32
    %c0_i32 = arith.constant 0 : i32
    %c0_i32_0 = arith.constant 0 : i32
    %c0_i32_1 = arith.constant 0 : i32
    return %2, %c0_i32, %c0_i32_0 : i32, i32, i32
  }
  func.func @transform_1(%arg0: i32, %arg1: i32, %arg2: i32) -> (i32, i32, i32) {
    %c0_i32 = arith.constant 0 : i32
    %c0_i32_0 = arith.constant 0 : i32
    %c0_i32_1 = arith.constant 0 : i32
    return %arg2, %c0_i32, %c0_i32_0 : i32, i32, i32
  }
  func.func @transform_2(%arg0: i32, %arg1: i32, %arg2: i32) -> (i32, i32) {
    %c0_i32 = arith.constant 0 : i32
    %c0_i32_0 = arith.constant 0 : i32
    %c0_i32_1 = arith.constant 0 : i32
    return %c0_i32, %c0_i32_0 : i32, i32
  }
  func.func @transform_3(%arg0: i32, %arg1: i32, %arg2: i32) -> (i32, i32, i32) {
    %c8_i32 = arith.constant 8 : i32
    %0 = arith.muli %arg0, %c8_i32 : i32
    %1 = arith.addi %0, %arg1 : i32
    %c0_i32 = arith.constant 0 : i32
    %c0_i32_0 = arith.constant 0 : i32
    %c0_i32_1 = arith.constant 0 : i32
    return %1, %c0_i32, %c0_i32_0 : i32, i32, i32
  }
}

module attributes {stable_mosaic.version = 11 : i64} {
  func.func @_conv_tap_kernel(%arg0: i32, %arg1: i32, %arg2: i32, %arg3: memref<1x64x256xbf16, #tpu.memory_space<vmem>>, %arg4: memref<1x256x128xbf16, #tpu.memory_space<vmem>>, %arg5: memref<1x128xf32, #tpu.memory_space<vmem>>, %arg6: memref<1x64x128xf32, #tpu.memory_space<vmem>>, %arg7: memref<64x128xf32, #tpu.memory_space<vmem>>) attributes {dimension_semantics = [#tpu.dimension_semantics<parallel>, #tpu.dimension_semantics<parallel>, #tpu.dimension_semantics<arbitrary>], iteration_bounds = array<i64: 2, 8, 3>, scalar_prefetch = 0 : i64, scratch_operands = 1 : i64, tpu.core_type = #tpu.core_type<tc>, window_params = [{transform_indices = @transform_0, window_bounds = array<i64: 1, 64, 256>}, {transform_indices = @transform_1, window_bounds = array<i64: 1, 256, 128>}, {pipeline_mode = #tpu.pipeline_mode<synchronous>, transform_indices = @transform_2, window_bounds = array<i64: 1, 128>}, {transform_indices = @transform_3, window_bounds = array<i64: 1, 64, 128>}]} {
    %c0_i32 = arith.constant 0 : i32
    %0 = arith.cmpi eq, %arg2, %c0_i32 : i32
    %1 = arith.extui %0 : i1 to i32
    %c0_i32_0 = arith.constant 0 : i32
    %2 = arith.cmpi ne, %1, %c0_i32_0 : i32
    scf.if %2 {
      %cst_11 = arith.constant 0.000000e+00 : f32
      %14 = vector.broadcast %cst_11 : f32 to vector<64x128xf32>
      %c0_12 = arith.constant 0 : index
      %c0_13 = arith.constant 0 : index
      %15 = vector.load %arg7[%c0_12, %c0_13] : memref<64x128xf32, #tpu.memory_space<vmem>>, vector<64x128xf32>
      tpu.vector_store %arg7[%c0_12, %c0_13], %14 {strides = array<i32>} : memref<64x128xf32, #tpu.memory_space<vmem>>, vector<64x128xf32>,
    } else {
    }
    %c0 = arith.constant 0 : index
    %c0_1 = arith.constant 0 : index
    %3 = vector.load %arg7[%c0, %c0_1] : memref<64x128xf32, #tpu.memory_space<vmem>>, vector<64x128xf32>
    %c0_2 = arith.constant 0 : index
    %c0_3 = arith.constant 0 : index
    %c0_4 = arith.constant 0 : index
    %4 = vector.load %arg3[%c0_2, %c0_3, %c0_4] : memref<1x64x256xbf16, #tpu.memory_space<vmem>>, vector<1x64x256xbf16>
    %5 = vector.shape_cast %4 : vector<1x64x256xbf16> to vector<64x256xbf16>
    %c0_5 = arith.constant 0 : index
    %c0_6 = arith.constant 0 : index
    %c0_7 = arith.constant 0 : index
    %6 = vector.load %arg4[%c0_5, %c0_6, %c0_7] : memref<1x256x128xbf16, #tpu.memory_space<vmem>>, vector<1x256x128xbf16>
    %7 = vector.shape_cast %6 : vector<1x256x128xbf16> to vector<256x128xbf16>
    %cst = arith.constant dense<0.000000e+00> : vector<64x128xf32>
    %8 = tpu.matmul %5, %7, %cst {dimension_numbers = #tpu.dot_dimension_numbers<[1], [0], [0], [1], [0, 0, 1, 1], [], []>} : vector<64x256xbf16>, vector<256x128xbf16>, vector<64x128xf32> -> vector<64x128xf32>
    %9 = arith.addf %3, %8 : vector<64x128xf32>
    %c0_8 = arith.constant 0 : index
    %c0_9 = arith.constant 0 : index
    %10 = vector.load %arg7[%c0_8, %c0_9] : memref<64x128xf32, #tpu.memory_space<vmem>>, vector<64x128xf32>
    tpu.vector_store %arg7[%c0_8, %c0_9], %9 {strides = array<i32>} : memref<64x128xf32, #tpu.memory_space<vmem>>, vector<64x128xf32>,
    %c2_i32 = arith.constant 2 : i32
    %11 = arith.cmpi eq, %arg2, %c2_i32 : i32
    %12 = arith.extui %11 : i1 to i32
    %c0_i32_10 = arith.constant 0 : i32
    %13 = arith.cmpi ne, %12, %c0_i32_10 : i32
    scf.if %13 {
      %c0_11 = arith.constant 0 : index
      %c0_12 = arith.constant 0 : index
      %14 = vector.load %arg7[%c0_11, %c0_12] : memref<64x128xf32, #tpu.memory_space<vmem>>, vector<64x128xf32>
      %c0_13 = arith.constant 0 : index
      %c0_14 = arith.constant 0 : index
      %15 = vector.load %arg5[%c0_13, %c0_14] : memref<1x128xf32, #tpu.memory_space<vmem>>, vector<1x128xf32>
      %16 = vector.broadcast %15 : vector<1x128xf32> to vector<64x128xf32>
      %17 = arith.addf %14, %16 : vector<64x128xf32>
      %cst_15 = arith.constant 0.000000e+00 : f32
      %18 = vector.broadcast %cst_15 : f32 to vector<64x128xf32>
      %19 = arith.maximumf %17, %18 : vector<64x128xf32>
      %c0_16 = arith.constant 0 : index
      %c0_17 = arith.constant 0 : index
      %c0_18 = arith.constant 0 : index
      %20 = vector.load %arg6[%c0_16, %c0_17, %c0_18] : memref<1x64x128xf32, #tpu.memory_space<vmem>>, vector<1x64x128xf32>
      %21 = vector.shape_cast %20 : vector<1x64x128xf32> to vector<64x128xf32>
      %22 = vector.shape_cast %19 : vector<64x128xf32> to vector<1x64x128xf32>
      tpu.vector_store %arg6[%c0_16, %c0_17, %c0_18], %22 {strides = array<i32>} : memref<1x64x128xf32, #tpu.memory_space<vmem>>, vector<1x64x128xf32>,
    } else {
    }
    return
  }
  func.func @transform_0(%arg0: i32, %arg1: i32, %arg2: i32) -> (i32, i32, i32) {
    %c10_i32 = arith.constant 10 : i32
    %0 = arith.muli %arg0, %c10_i32 : i32
    %1 = arith.addi %0, %arg1 : i32
    %2 = arith.addi %1, %arg2 : i32
    %c0_i32 = arith.constant 0 : i32
    %c0_i32_0 = arith.constant 0 : i32
    %c0_i32_1 = arith.constant 0 : i32
    return %2, %c0_i32, %c0_i32_0 : i32, i32, i32
  }
  func.func @transform_1(%arg0: i32, %arg1: i32, %arg2: i32) -> (i32, i32, i32) {
    %c0_i32 = arith.constant 0 : i32
    %c0_i32_0 = arith.constant 0 : i32
    %c0_i32_1 = arith.constant 0 : i32
    return %arg2, %c0_i32, %c0_i32_0 : i32, i32, i32
  }
  func.func @transform_2(%arg0: i32, %arg1: i32, %arg2: i32) -> (i32, i32) {
    %c0_i32 = arith.constant 0 : i32
    %c0_i32_0 = arith.constant 0 : i32
    %c0_i32_1 = arith.constant 0 : i32
    return %c0_i32, %c0_i32_0 : i32, i32
  }
  func.func @transform_3(%arg0: i32, %arg1: i32, %arg2: i32) -> (i32, i32, i32) {
    %c8_i32 = arith.constant 8 : i32
    %0 = arith.muli %arg0, %c8_i32 : i32
    %1 = arith.addi %0, %arg1 : i32
    %c0_i32 = arith.constant 0 : i32
    %c0_i32_0 = arith.constant 0 : i32
    %c0_i32_1 = arith.constant 0 : i32
    return %1, %c0_i32, %c0_i32_0 : i32, i32, i32
  }
}

module attributes {stable_mosaic.version = 11 : i64} {
  func.func @_conv_tap_kernel(%arg0: i32, %arg1: i32, %arg2: i32, %arg3: memref<1x64x384xbf16, #tpu.memory_space<vmem>>, %arg4: memref<1x384x128xbf16, #tpu.memory_space<vmem>>, %arg5: memref<1x128xf32, #tpu.memory_space<vmem>>, %arg6: memref<1x64x128xf32, #tpu.memory_space<vmem>>, %arg7: memref<64x128xf32, #tpu.memory_space<vmem>>) attributes {dimension_semantics = [#tpu.dimension_semantics<parallel>, #tpu.dimension_semantics<parallel>, #tpu.dimension_semantics<arbitrary>], iteration_bounds = array<i64: 2, 8, 3>, scalar_prefetch = 0 : i64, scratch_operands = 1 : i64, tpu.core_type = #tpu.core_type<tc>, window_params = [{transform_indices = @transform_0, window_bounds = array<i64: 1, 64, 384>}, {transform_indices = @transform_1, window_bounds = array<i64: 1, 384, 128>}, {pipeline_mode = #tpu.pipeline_mode<synchronous>, transform_indices = @transform_2, window_bounds = array<i64: 1, 128>}, {transform_indices = @transform_3, window_bounds = array<i64: 1, 64, 128>}]} {
    %c0_i32 = arith.constant 0 : i32
    %0 = arith.cmpi eq, %arg2, %c0_i32 : i32
    %1 = arith.extui %0 : i1 to i32
    %c0_i32_0 = arith.constant 0 : i32
    %2 = arith.cmpi ne, %1, %c0_i32_0 : i32
    scf.if %2 {
      %cst_11 = arith.constant 0.000000e+00 : f32
      %14 = vector.broadcast %cst_11 : f32 to vector<64x128xf32>
      %c0_12 = arith.constant 0 : index
      %c0_13 = arith.constant 0 : index
      %15 = vector.load %arg7[%c0_12, %c0_13] : memref<64x128xf32, #tpu.memory_space<vmem>>, vector<64x128xf32>
      tpu.vector_store %arg7[%c0_12, %c0_13], %14 {strides = array<i32>} : memref<64x128xf32, #tpu.memory_space<vmem>>, vector<64x128xf32>,
    } else {
    }
    %c0 = arith.constant 0 : index
    %c0_1 = arith.constant 0 : index
    %3 = vector.load %arg7[%c0, %c0_1] : memref<64x128xf32, #tpu.memory_space<vmem>>, vector<64x128xf32>
    %c0_2 = arith.constant 0 : index
    %c0_3 = arith.constant 0 : index
    %c0_4 = arith.constant 0 : index
    %4 = vector.load %arg3[%c0_2, %c0_3, %c0_4] : memref<1x64x384xbf16, #tpu.memory_space<vmem>>, vector<1x64x384xbf16>
    %5 = vector.shape_cast %4 : vector<1x64x384xbf16> to vector<64x384xbf16>
    %c0_5 = arith.constant 0 : index
    %c0_6 = arith.constant 0 : index
    %c0_7 = arith.constant 0 : index
    %6 = vector.load %arg4[%c0_5, %c0_6, %c0_7] : memref<1x384x128xbf16, #tpu.memory_space<vmem>>, vector<1x384x128xbf16>
    %7 = vector.shape_cast %6 : vector<1x384x128xbf16> to vector<384x128xbf16>
    %cst = arith.constant dense<0.000000e+00> : vector<64x128xf32>
    %8 = tpu.matmul %5, %7, %cst {dimension_numbers = #tpu.dot_dimension_numbers<[1], [0], [0], [1], [0, 0, 1, 1], [], []>} : vector<64x384xbf16>, vector<384x128xbf16>, vector<64x128xf32> -> vector<64x128xf32>
    %9 = arith.addf %3, %8 : vector<64x128xf32>
    %c0_8 = arith.constant 0 : index
    %c0_9 = arith.constant 0 : index
    %10 = vector.load %arg7[%c0_8, %c0_9] : memref<64x128xf32, #tpu.memory_space<vmem>>, vector<64x128xf32>
    tpu.vector_store %arg7[%c0_8, %c0_9], %9 {strides = array<i32>} : memref<64x128xf32, #tpu.memory_space<vmem>>, vector<64x128xf32>,
    %c2_i32 = arith.constant 2 : i32
    %11 = arith.cmpi eq, %arg2, %c2_i32 : i32
    %12 = arith.extui %11 : i1 to i32
    %c0_i32_10 = arith.constant 0 : i32
    %13 = arith.cmpi ne, %12, %c0_i32_10 : i32
    scf.if %13 {
      %c0_11 = arith.constant 0 : index
      %c0_12 = arith.constant 0 : index
      %14 = vector.load %arg7[%c0_11, %c0_12] : memref<64x128xf32, #tpu.memory_space<vmem>>, vector<64x128xf32>
      %c0_13 = arith.constant 0 : index
      %c0_14 = arith.constant 0 : index
      %15 = vector.load %arg5[%c0_13, %c0_14] : memref<1x128xf32, #tpu.memory_space<vmem>>, vector<1x128xf32>
      %16 = vector.broadcast %15 : vector<1x128xf32> to vector<64x128xf32>
      %17 = arith.addf %14, %16 : vector<64x128xf32>
      %cst_15 = arith.constant 0.000000e+00 : f32
      %18 = vector.broadcast %cst_15 : f32 to vector<64x128xf32>
      %19 = arith.maximumf %17, %18 : vector<64x128xf32>
      %c0_16 = arith.constant 0 : index
      %c0_17 = arith.constant 0 : index
      %c0_18 = arith.constant 0 : index
      %20 = vector.load %arg6[%c0_16, %c0_17, %c0_18] : memref<1x64x128xf32, #tpu.memory_space<vmem>>, vector<1x64x128xf32>
      %21 = vector.shape_cast %20 : vector<1x64x128xf32> to vector<64x128xf32>
      %22 = vector.shape_cast %19 : vector<64x128xf32> to vector<1x64x128xf32>
      tpu.vector_store %arg6[%c0_16, %c0_17, %c0_18], %22 {strides = array<i32>} : memref<1x64x128xf32, #tpu.memory_space<vmem>>, vector<1x64x128xf32>,
    } else {
    }
    return
  }
  func.func @transform_0(%arg0: i32, %arg1: i32, %arg2: i32) -> (i32, i32, i32) {
    %c10_i32 = arith.constant 10 : i32
    %0 = arith.muli %arg0, %c10_i32 : i32
    %1 = arith.addi %0, %arg1 : i32
    %2 = arith.addi %1, %arg2 : i32
    %c0_i32 = arith.constant 0 : i32
    %c0_i32_0 = arith.constant 0 : i32
    %c0_i32_1 = arith.constant 0 : i32
    return %2, %c0_i32, %c0_i32_0 : i32, i32, i32
  }
  func.func @transform_1(%arg0: i32, %arg1: i32, %arg2: i32) -> (i32, i32, i32) {
    %c0_i32 = arith.constant 0 : i32
    %c0_i32_0 = arith.constant 0 : i32
    %c0_i32_1 = arith.constant 0 : i32
    return %arg2, %c0_i32, %c0_i32_0 : i32, i32, i32
  }
  func.func @transform_2(%arg0: i32, %arg1: i32, %arg2: i32) -> (i32, i32) {
    %c0_i32 = arith.constant 0 : i32
    %c0_i32_0 = arith.constant 0 : i32
    %c0_i32_1 = arith.constant 0 : i32
    return %c0_i32, %c0_i32_0 : i32, i32
  }
  func.func @transform_3(%arg0: i32, %arg1: i32, %arg2: i32) -> (i32, i32, i32) {
    %c8_i32 = arith.constant 8 : i32
    %0 = arith.muli %arg0, %c8_i32 : i32
    %1 = arith.addi %0, %arg1 : i32
    %c0_i32 = arith.constant 0 : i32
    %c0_i32_0 = arith.constant 0 : i32
    %c0_i32_1 = arith.constant 0 : i32
    return %1, %c0_i32, %c0_i32_0 : i32, i32, i32
  }
}

module attributes {stable_mosaic.version = 11 : i64} {
  func.func @_conv_tap_kernel(%arg0: i32, %arg1: i32, %arg2: i32, %arg3: memref<1x16x640xbf16, #tpu.memory_space<vmem>>, %arg4: memref<1x640x128xbf16, #tpu.memory_space<vmem>>, %arg5: memref<1x128xf32, #tpu.memory_space<vmem>>, %arg6: memref<1x16x128xf32, #tpu.memory_space<vmem>>, %arg7: memref<16x128xf32, #tpu.memory_space<vmem>>) attributes {dimension_semantics = [#tpu.dimension_semantics<parallel>, #tpu.dimension_semantics<parallel>, #tpu.dimension_semantics<arbitrary>], iteration_bounds = array<i64: 2, 4, 3>, scalar_prefetch = 0 : i64, scratch_operands = 1 : i64, tpu.core_type = #tpu.core_type<tc>, window_params = [{transform_indices = @transform_0, window_bounds = array<i64: 1, 16, 640>}, {transform_indices = @transform_1, window_bounds = array<i64: 1, 640, 128>}, {pipeline_mode = #tpu.pipeline_mode<synchronous>, transform_indices = @transform_2, window_bounds = array<i64: 1, 128>}, {transform_indices = @transform_3, window_bounds = array<i64: 1, 16, 128>}]} {
    %c0_i32 = arith.constant 0 : i32
    %0 = arith.cmpi eq, %arg2, %c0_i32 : i32
    %1 = arith.extui %0 : i1 to i32
    %c0_i32_0 = arith.constant 0 : i32
    %2 = arith.cmpi ne, %1, %c0_i32_0 : i32
    scf.if %2 {
      %cst_11 = arith.constant 0.000000e+00 : f32
      %14 = vector.broadcast %cst_11 : f32 to vector<16x128xf32>
      %c0_12 = arith.constant 0 : index
      %c0_13 = arith.constant 0 : index
      %15 = vector.load %arg7[%c0_12, %c0_13] : memref<16x128xf32, #tpu.memory_space<vmem>>, vector<16x128xf32>
      tpu.vector_store %arg7[%c0_12, %c0_13], %14 {strides = array<i32>} : memref<16x128xf32, #tpu.memory_space<vmem>>, vector<16x128xf32>,
    } else {
    }
    %c0 = arith.constant 0 : index
    %c0_1 = arith.constant 0 : index
    %3 = vector.load %arg7[%c0, %c0_1] : memref<16x128xf32, #tpu.memory_space<vmem>>, vector<16x128xf32>
    %c0_2 = arith.constant 0 : index
    %c0_3 = arith.constant 0 : index
    %c0_4 = arith.constant 0 : index
    %4 = vector.load %arg3[%c0_2, %c0_3, %c0_4] : memref<1x16x640xbf16, #tpu.memory_space<vmem>>, vector<1x16x640xbf16>
    %5 = vector.shape_cast %4 : vector<1x16x640xbf16> to vector<16x640xbf16>
    %c0_5 = arith.constant 0 : index
    %c0_6 = arith.constant 0 : index
    %c0_7 = arith.constant 0 : index
    %6 = vector.load %arg4[%c0_5, %c0_6, %c0_7] : memref<1x640x128xbf16, #tpu.memory_space<vmem>>, vector<1x640x128xbf16>
    %7 = vector.shape_cast %6 : vector<1x640x128xbf16> to vector<640x128xbf16>
    %cst = arith.constant dense<0.000000e+00> : vector<16x128xf32>
    %8 = tpu.matmul %5, %7, %cst {dimension_numbers = #tpu.dot_dimension_numbers<[1], [0], [0], [1], [0, 0, 1, 1], [], []>} : vector<16x640xbf16>, vector<640x128xbf16>, vector<16x128xf32> -> vector<16x128xf32>
    %9 = arith.addf %3, %8 : vector<16x128xf32>
    %c0_8 = arith.constant 0 : index
    %c0_9 = arith.constant 0 : index
    %10 = vector.load %arg7[%c0_8, %c0_9] : memref<16x128xf32, #tpu.memory_space<vmem>>, vector<16x128xf32>
    tpu.vector_store %arg7[%c0_8, %c0_9], %9 {strides = array<i32>} : memref<16x128xf32, #tpu.memory_space<vmem>>, vector<16x128xf32>,
    %c2_i32 = arith.constant 2 : i32
    %11 = arith.cmpi eq, %arg2, %c2_i32 : i32
    %12 = arith.extui %11 : i1 to i32
    %c0_i32_10 = arith.constant 0 : i32
    %13 = arith.cmpi ne, %12, %c0_i32_10 : i32
    scf.if %13 {
      %c0_11 = arith.constant 0 : index
      %c0_12 = arith.constant 0 : index
      %14 = vector.load %arg7[%c0_11, %c0_12] : memref<16x128xf32, #tpu.memory_space<vmem>>, vector<16x128xf32>
      %c0_13 = arith.constant 0 : index
      %c0_14 = arith.constant 0 : index
      %15 = vector.load %arg5[%c0_13, %c0_14] : memref<1x128xf32, #tpu.memory_space<vmem>>, vector<1x128xf32>
      %16 = vector.broadcast %15 : vector<1x128xf32> to vector<16x128xf32>
      %17 = arith.addf %14, %16 : vector<16x128xf32>
      %cst_15 = arith.constant 0.000000e+00 : f32
      %18 = vector.broadcast %cst_15 : f32 to vector<16x128xf32>
      %19 = arith.maximumf %17, %18 : vector<16x128xf32>
      %c0_16 = arith.constant 0 : index
      %c0_17 = arith.constant 0 : index
      %c0_18 = arith.constant 0 : index
      %20 = vector.load %arg6[%c0_16, %c0_17, %c0_18] : memref<1x16x128xf32, #tpu.memory_space<vmem>>, vector<1x16x128xf32>
      %21 = vector.shape_cast %20 : vector<1x16x128xf32> to vector<16x128xf32>
      %22 = vector.shape_cast %19 : vector<16x128xf32> to vector<1x16x128xf32>
      tpu.vector_store %arg6[%c0_16, %c0_17, %c0_18], %22 {strides = array<i32>} : memref<1x16x128xf32, #tpu.memory_space<vmem>>, vector<1x16x128xf32>,
    } else {
    }
    return
  }
  func.func @transform_0(%arg0: i32, %arg1: i32, %arg2: i32) -> (i32, i32, i32) {
    %c6_i32 = arith.constant 6 : i32
    %0 = arith.muli %arg0, %c6_i32 : i32
    %1 = arith.addi %0, %arg1 : i32
    %2 = arith.addi %1, %arg2 : i32
    %c0_i32 = arith.constant 0 : i32
    %c0_i32_0 = arith.constant 0 : i32
    %c0_i32_1 = arith.constant 0 : i32
    return %2, %c0_i32, %c0_i32_0 : i32, i32, i32
  }
  func.func @transform_1(%arg0: i32, %arg1: i32, %arg2: i32) -> (i32, i32, i32) {
    %c0_i32 = arith.constant 0 : i32
    %c0_i32_0 = arith.constant 0 : i32
    %c0_i32_1 = arith.constant 0 : i32
    return %arg2, %c0_i32, %c0_i32_0 : i32, i32, i32
  }
  func.func @transform_2(%arg0: i32, %arg1: i32, %arg2: i32) -> (i32, i32) {
    %c0_i32 = arith.constant 0 : i32
    %c0_i32_0 = arith.constant 0 : i32
    %c0_i32_1 = arith.constant 0 : i32
    return %c0_i32, %c0_i32_0 : i32, i32
  }
  func.func @transform_3(%arg0: i32, %arg1: i32, %arg2: i32) -> (i32, i32, i32) {
    %c4_i32 = arith.constant 4 : i32
    %0 = arith.muli %arg0, %c4_i32 : i32
    %1 = arith.addi %0, %arg1 : i32
    %c0_i32 = arith.constant 0 : i32
    %c0_i32_0 = arith.constant 0 : i32
    %c0_i32_1 = arith.constant 0 : i32
    return %1, %c0_i32, %c0_i32_0 : i32, i32, i32
  }
}

module attributes {stable_mosaic.version = 11 : i64} {
  func.func @_conv_tap_kernel(%arg0: i32, %arg1: i32, %arg2: i32, %arg3: memref<1x4x640xbf16, #tpu.memory_space<vmem>>, %arg4: memref<1x640x128xbf16, #tpu.memory_space<vmem>>, %arg5: memref<1x128xf32, #tpu.memory_space<vmem>>, %arg6: memref<1x4x128xf32, #tpu.memory_space<vmem>>, %arg7: memref<4x128xf32, #tpu.memory_space<vmem>>) attributes {dimension_semantics = [#tpu.dimension_semantics<parallel>, #tpu.dimension_semantics<parallel>, #tpu.dimension_semantics<arbitrary>], iteration_bounds = array<i64: 2, 2, 3>, scalar_prefetch = 0 : i64, scratch_operands = 1 : i64, tpu.core_type = #tpu.core_type<tc>, window_params = [{transform_indices = @transform_0, window_bounds = array<i64: 1, 4, 640>}, {transform_indices = @transform_1, window_bounds = array<i64: 1, 640, 128>}, {pipeline_mode = #tpu.pipeline_mode<synchronous>, transform_indices = @transform_2, window_bounds = array<i64: 1, 128>}, {transform_indices = @transform_3, window_bounds = array<i64: 1, 4, 128>}]} {
    %c0_i32 = arith.constant 0 : i32
    %0 = arith.cmpi eq, %arg2, %c0_i32 : i32
    %1 = arith.extui %0 : i1 to i32
    %c0_i32_0 = arith.constant 0 : i32
    %2 = arith.cmpi ne, %1, %c0_i32_0 : i32
    scf.if %2 {
      %cst_11 = arith.constant 0.000000e+00 : f32
      %14 = vector.broadcast %cst_11 : f32 to vector<4x128xf32>
      %c0_12 = arith.constant 0 : index
      %c0_13 = arith.constant 0 : index
      %15 = vector.load %arg7[%c0_12, %c0_13] : memref<4x128xf32, #tpu.memory_space<vmem>>, vector<4x128xf32>
      tpu.vector_store %arg7[%c0_12, %c0_13], %14 {strides = array<i32>} : memref<4x128xf32, #tpu.memory_space<vmem>>, vector<4x128xf32>,
    } else {
    }
    %c0 = arith.constant 0 : index
    %c0_1 = arith.constant 0 : index
    %3 = vector.load %arg7[%c0, %c0_1] : memref<4x128xf32, #tpu.memory_space<vmem>>, vector<4x128xf32>
    %c0_2 = arith.constant 0 : index
    %c0_3 = arith.constant 0 : index
    %c0_4 = arith.constant 0 : index
    %4 = vector.load %arg3[%c0_2, %c0_3, %c0_4] : memref<1x4x640xbf16, #tpu.memory_space<vmem>>, vector<1x4x640xbf16>
    %5 = vector.shape_cast %4 : vector<1x4x640xbf16> to vector<4x640xbf16>
    %c0_5 = arith.constant 0 : index
    %c0_6 = arith.constant 0 : index
    %c0_7 = arith.constant 0 : index
    %6 = vector.load %arg4[%c0_5, %c0_6, %c0_7] : memref<1x640x128xbf16, #tpu.memory_space<vmem>>, vector<1x640x128xbf16>
    %7 = vector.shape_cast %6 : vector<1x640x128xbf16> to vector<640x128xbf16>
    %cst = arith.constant dense<0.000000e+00> : vector<4x128xf32>
    %8 = tpu.matmul %5, %7, %cst {dimension_numbers = #tpu.dot_dimension_numbers<[1], [0], [0], [1], [0, 0, 1, 1], [], []>} : vector<4x640xbf16>, vector<640x128xbf16>, vector<4x128xf32> -> vector<4x128xf32>
    %9 = arith.addf %3, %8 : vector<4x128xf32>
    %c0_8 = arith.constant 0 : index
    %c0_9 = arith.constant 0 : index
    %10 = vector.load %arg7[%c0_8, %c0_9] : memref<4x128xf32, #tpu.memory_space<vmem>>, vector<4x128xf32>
    tpu.vector_store %arg7[%c0_8, %c0_9], %9 {strides = array<i32>} : memref<4x128xf32, #tpu.memory_space<vmem>>, vector<4x128xf32>,
    %c2_i32 = arith.constant 2 : i32
    %11 = arith.cmpi eq, %arg2, %c2_i32 : i32
    %12 = arith.extui %11 : i1 to i32
    %c0_i32_10 = arith.constant 0 : i32
    %13 = arith.cmpi ne, %12, %c0_i32_10 : i32
    scf.if %13 {
      %c0_11 = arith.constant 0 : index
      %c0_12 = arith.constant 0 : index
      %14 = vector.load %arg7[%c0_11, %c0_12] : memref<4x128xf32, #tpu.memory_space<vmem>>, vector<4x128xf32>
      %c0_13 = arith.constant 0 : index
      %c0_14 = arith.constant 0 : index
      %15 = vector.load %arg5[%c0_13, %c0_14] : memref<1x128xf32, #tpu.memory_space<vmem>>, vector<1x128xf32>
      %16 = vector.broadcast %15 : vector<1x128xf32> to vector<4x128xf32>
      %17 = arith.addf %14, %16 : vector<4x128xf32>
      %cst_15 = arith.constant 0.000000e+00 : f32
      %18 = vector.broadcast %cst_15 : f32 to vector<4x128xf32>
      %19 = arith.maximumf %17, %18 : vector<4x128xf32>
      %c0_16 = arith.constant 0 : index
      %c0_17 = arith.constant 0 : index
      %c0_18 = arith.constant 0 : index
      %20 = vector.load %arg6[%c0_16, %c0_17, %c0_18] : memref<1x4x128xf32, #tpu.memory_space<vmem>>, vector<1x4x128xf32>
      %21 = vector.shape_cast %20 : vector<1x4x128xf32> to vector<4x128xf32>
      %22 = vector.shape_cast %19 : vector<4x128xf32> to vector<1x4x128xf32>
      tpu.vector_store %arg6[%c0_16, %c0_17, %c0_18], %22 {strides = array<i32>} : memref<1x4x128xf32, #tpu.memory_space<vmem>>, vector<1x4x128xf32>,
    } else {
    }
    return
  }
  func.func @transform_0(%arg0: i32, %arg1: i32, %arg2: i32) -> (i32, i32, i32) {
    %c4_i32 = arith.constant 4 : i32
    %0 = arith.muli %arg0, %c4_i32 : i32
    %1 = arith.addi %0, %arg1 : i32
    %2 = arith.addi %1, %arg2 : i32
    %c0_i32 = arith.constant 0 : i32
    %c0_i32_0 = arith.constant 0 : i32
    %c0_i32_1 = arith.constant 0 : i32
    return %2, %c0_i32, %c0_i32_0 : i32, i32, i32
  }
  func.func @transform_1(%arg0: i32, %arg1: i32, %arg2: i32) -> (i32, i32, i32) {
    %c0_i32 = arith.constant 0 : i32
    %c0_i32_0 = arith.constant 0 : i32
    %c0_i32_1 = arith.constant 0 : i32
    return %arg2, %c0_i32, %c0_i32_0 : i32, i32, i32
  }
  func.func @transform_2(%arg0: i32, %arg1: i32, %arg2: i32) -> (i32, i32) {
    %c0_i32 = arith.constant 0 : i32
    %c0_i32_0 = arith.constant 0 : i32
    %c0_i32_1 = arith.constant 0 : i32
    return %c0_i32, %c0_i32_0 : i32, i32
  }
  func.func @transform_3(%arg0: i32, %arg1: i32, %arg2: i32) -> (i32, i32, i32) {
    %c2_i32 = arith.constant 2 : i32
    %0 = arith.muli %arg0, %c2_i32 : i32
    %1 = arith.addi %0, %arg1 : i32
    %c0_i32 = arith.constant 0 : i32
    %c0_i32_0 = arith.constant 0 : i32
    %c0_i32_1 = arith.constant 0 : i32
    return %1, %c0_i32, %c0_i32_0 : i32, i32, i32
  }
}

module attributes {stable_mosaic.version = 11 : i64} {
  func.func @_conv_tap_kernel(%arg0: i32, %arg1: i32, %arg2: i32, %arg3: memref<1x1x640xbf16, #tpu.memory_space<vmem>>, %arg4: memref<1x640x128xbf16, #tpu.memory_space<vmem>>, %arg5: memref<1x128xf32, #tpu.memory_space<vmem>>, %arg6: memref<1x1x128xf32, #tpu.memory_space<vmem>>, %arg7: memref<1x128xf32, #tpu.memory_space<vmem>>) attributes {dimension_semantics = [#tpu.dimension_semantics<parallel>, #tpu.dimension_semantics<parallel>, #tpu.dimension_semantics<arbitrary>], iteration_bounds = array<i64: 2, 2, 3>, scalar_prefetch = 0 : i64, scratch_operands = 1 : i64, tpu.core_type = #tpu.core_type<tc>, window_params = [{transform_indices = @transform_0, window_bounds = array<i64: 1, 1, 640>}, {transform_indices = @transform_1, window_bounds = array<i64: 1, 640, 128>}, {pipeline_mode = #tpu.pipeline_mode<synchronous>, transform_indices = @transform_2, window_bounds = array<i64: 1, 128>}, {transform_indices = @transform_3, window_bounds = array<i64: 1, 1, 128>}]} {
    %c0_i32 = arith.constant 0 : i32
    %0 = arith.cmpi eq, %arg2, %c0_i32 : i32
    %1 = arith.extui %0 : i1 to i32
    %c0_i32_0 = arith.constant 0 : i32
    %2 = arith.cmpi ne, %1, %c0_i32_0 : i32
    scf.if %2 {
      %cst_11 = arith.constant 0.000000e+00 : f32
      %14 = vector.broadcast %cst_11 : f32 to vector<1x128xf32>
      %c0_12 = arith.constant 0 : index
      %c0_13 = arith.constant 0 : index
      %15 = vector.load %arg7[%c0_12, %c0_13] : memref<1x128xf32, #tpu.memory_space<vmem>>, vector<1x128xf32>
      tpu.vector_store %arg7[%c0_12, %c0_13], %14 {strides = array<i32>} : memref<1x128xf32, #tpu.memory_space<vmem>>, vector<1x128xf32>,
    } else {
    }
    %c0 = arith.constant 0 : index
    %c0_1 = arith.constant 0 : index
    %3 = vector.load %arg7[%c0, %c0_1] : memref<1x128xf32, #tpu.memory_space<vmem>>, vector<1x128xf32>
    %c0_2 = arith.constant 0 : index
    %c0_3 = arith.constant 0 : index
    %c0_4 = arith.constant 0 : index
    %4 = vector.load %arg3[%c0_2, %c0_3, %c0_4] : memref<1x1x640xbf16, #tpu.memory_space<vmem>>, vector<1x1x640xbf16>
    %5 = vector.shape_cast %4 : vector<1x1x640xbf16> to vector<1x640xbf16>
    %c0_5 = arith.constant 0 : index
    %c0_6 = arith.constant 0 : index
    %c0_7 = arith.constant 0 : index
    %6 = vector.load %arg4[%c0_5, %c0_6, %c0_7] : memref<1x640x128xbf16, #tpu.memory_space<vmem>>, vector<1x640x128xbf16>
    %7 = vector.shape_cast %6 : vector<1x640x128xbf16> to vector<640x128xbf16>
    %cst = arith.constant dense<0.000000e+00> : vector<1x128xf32>
    %8 = tpu.matmul %5, %7, %cst {dimension_numbers = #tpu.dot_dimension_numbers<[1], [0], [0], [1], [0, 0, 1, 1], [], []>} : vector<1x640xbf16>, vector<640x128xbf16>, vector<1x128xf32> -> vector<1x128xf32>
    %9 = arith.addf %3, %8 : vector<1x128xf32>
    %c0_8 = arith.constant 0 : index
    %c0_9 = arith.constant 0 : index
    %10 = vector.load %arg7[%c0_8, %c0_9] : memref<1x128xf32, #tpu.memory_space<vmem>>, vector<1x128xf32>
    tpu.vector_store %arg7[%c0_8, %c0_9], %9 {strides = array<i32>} : memref<1x128xf32, #tpu.memory_space<vmem>>, vector<1x128xf32>,
    %c2_i32 = arith.constant 2 : i32
    %11 = arith.cmpi eq, %arg2, %c2_i32 : i32
    %12 = arith.extui %11 : i1 to i32
    %c0_i32_10 = arith.constant 0 : i32
    %13 = arith.cmpi ne, %12, %c0_i32_10 : i32
    scf.if %13 {
      %c0_11 = arith.constant 0 : index
      %c0_12 = arith.constant 0 : index
      %14 = vector.load %arg7[%c0_11, %c0_12] : memref<1x128xf32, #tpu.memory_space<vmem>>, vector<1x128xf32>
      %c0_13 = arith.constant 0 : index
      %c0_14 = arith.constant 0 : index
      %15 = vector.load %arg5[%c0_13, %c0_14] : memref<1x128xf32, #tpu.memory_space<vmem>>, vector<1x128xf32>
      %16 = arith.addf %14, %15 : vector<1x128xf32>
      %cst_15 = arith.constant 0.000000e+00 : f32
      %17 = vector.broadcast %cst_15 : f32 to vector<1x128xf32>
      %18 = arith.maximumf %16, %17 : vector<1x128xf32>
      %c0_16 = arith.constant 0 : index
      %c0_17 = arith.constant 0 : index
      %c0_18 = arith.constant 0 : index
      %19 = vector.load %arg6[%c0_16, %c0_17, %c0_18] : memref<1x1x128xf32, #tpu.memory_space<vmem>>, vector<1x1x128xf32>
      %20 = vector.shape_cast %19 : vector<1x1x128xf32> to vector<1x128xf32>
      %21 = vector.shape_cast %18 : vector<1x128xf32> to vector<1x1x128xf32>
      tpu.vector_store %arg6[%c0_16, %c0_17, %c0_18], %21 {strides = array<i32>} : memref<1x1x128xf32, #tpu.memory_space<vmem>>, vector<1x1x128xf32>,
    } else {
    }
    return
  }
  func.func @transform_0(%arg0: i32, %arg1: i32, %arg2: i32) -> (i32, i32, i32) {
    %c4_i32 = arith.constant 4 : i32
    %0 = arith.muli %arg0, %c4_i32 : i32
    %1 = arith.addi %0, %arg1 : i32
    %2 = arith.addi %1, %arg2 : i32
    %c0_i32 = arith.constant 0 : i32
    %c0_i32_0 = arith.constant 0 : i32
    %c0_i32_1 = arith.constant 0 : i32
    return %2, %c0_i32, %c0_i32_0 : i32, i32, i32
  }
  func.func @transform_1(%arg0: i32, %arg1: i32, %arg2: i32) -> (i32, i32, i32) {
    %c0_i32 = arith.constant 0 : i32
    %c0_i32_0 = arith.constant 0 : i32
    %c0_i32_1 = arith.constant 0 : i32
    return %arg2, %c0_i32, %c0_i32_0 : i32, i32, i32
  }
  func.func @transform_2(%arg0: i32, %arg1: i32, %arg2: i32) -> (i32, i32) {
    %c0_i32 = arith.constant 0 : i32
    %c0_i32_0 = arith.constant 0 : i32
    %c0_i32_1 = arith.constant 0 : i32
    return %c0_i32, %c0_i32_0 : i32, i32
  }
  func.func @transform_3(%arg0: i32, %arg1: i32, %arg2: i32) -> (i32, i32, i32) {
    %c2_i32 = arith.constant 2 : i32
    %0 = arith.muli %arg0, %c2_i32 : i32
    %1 = arith.addi %0, %arg1 : i32
    %c0_i32 = arith.constant 0 : i32
    %c0_i32_0 = arith.constant 0 : i32
    %c0_i32_1 = arith.constant 0 : i32
    return %1, %c0_i32, %c0_i32_0 : i32, i32, i32
  }
}

module attributes {stable_mosaic.version = 11 : i64} {
  func.func @_conv_tap_kernel(%arg0: i32, %arg1: i32, %arg2: i32, %arg3: memref<1x1x128xbf16, #tpu.memory_space<vmem>>, %arg4: memref<1x128x256xbf16, #tpu.memory_space<vmem>>, %arg5: memref<1x256xf32, #tpu.memory_space<vmem>>, %arg6: memref<1x1x256xf32, #tpu.memory_space<vmem>>, %arg7: memref<1x256xf32, #tpu.memory_space<vmem>>) attributes {dimension_semantics = [#tpu.dimension_semantics<parallel>, #tpu.dimension_semantics<parallel>, #tpu.dimension_semantics<arbitrary>], iteration_bounds = array<i64: 2, 2, 1>, scalar_prefetch = 0 : i64, scratch_operands = 1 : i64, tpu.core_type = #tpu.core_type<tc>, window_params = [{transform_indices = @transform_0, window_bounds = array<i64: 1, 1, 128>}, {transform_indices = @transform_1, window_bounds = array<i64: 1, 128, 256>}, {pipeline_mode = #tpu.pipeline_mode<synchronous>, transform_indices = @transform_2, window_bounds = array<i64: 1, 256>}, {transform_indices = @transform_3, window_bounds = array<i64: 1, 1, 256>}]} {
    %c0_i32 = arith.constant 0 : i32
    %0 = arith.cmpi eq, %arg2, %c0_i32 : i32
    %1 = arith.extui %0 : i1 to i32
    %c0_i32_0 = arith.constant 0 : i32
    %2 = arith.cmpi ne, %1, %c0_i32_0 : i32
    scf.if %2 {
      %cst_12 = arith.constant 0.000000e+00 : f32
      %14 = vector.broadcast %cst_12 : f32 to vector<1x256xf32>
      %c0_13 = arith.constant 0 : index
      %c0_14 = arith.constant 0 : index
      %15 = vector.load %arg7[%c0_13, %c0_14] : memref<1x256xf32, #tpu.memory_space<vmem>>, vector<1x256xf32>
      tpu.vector_store %arg7[%c0_13, %c0_14], %14 {strides = array<i32>} : memref<1x256xf32, #tpu.memory_space<vmem>>, vector<1x256xf32>,
    } else {
    }
    %c0 = arith.constant 0 : index
    %c0_1 = arith.constant 0 : index
    %3 = vector.load %arg7[%c0, %c0_1] : memref<1x256xf32, #tpu.memory_space<vmem>>, vector<1x256xf32>
    %c0_2 = arith.constant 0 : index
    %c0_3 = arith.constant 0 : index
    %c0_4 = arith.constant 0 : index
    %4 = vector.load %arg3[%c0_2, %c0_3, %c0_4] : memref<1x1x128xbf16, #tpu.memory_space<vmem>>, vector<1x1x128xbf16>
    %5 = vector.shape_cast %4 : vector<1x1x128xbf16> to vector<1x128xbf16>
    %c0_5 = arith.constant 0 : index
    %c0_6 = arith.constant 0 : index
    %c0_7 = arith.constant 0 : index
    %6 = vector.load %arg4[%c0_5, %c0_6, %c0_7] : memref<1x128x256xbf16, #tpu.memory_space<vmem>>, vector<1x128x256xbf16>
    %7 = vector.shape_cast %6 : vector<1x128x256xbf16> to vector<128x256xbf16>
    %cst = arith.constant dense<0.000000e+00> : vector<1x256xf32>
    %8 = tpu.matmul %5, %7, %cst {dimension_numbers = #tpu.dot_dimension_numbers<[1], [0], [0], [1], [0, 0, 1, 1], [], []>} : vector<1x128xbf16>, vector<128x256xbf16>, vector<1x256xf32> -> vector<1x256xf32>
    %9 = arith.addf %3, %8 : vector<1x256xf32>
    %c0_8 = arith.constant 0 : index
    %c0_9 = arith.constant 0 : index
    %10 = vector.load %arg7[%c0_8, %c0_9] : memref<1x256xf32, #tpu.memory_space<vmem>>, vector<1x256xf32>
    tpu.vector_store %arg7[%c0_8, %c0_9], %9 {strides = array<i32>} : memref<1x256xf32, #tpu.memory_space<vmem>>, vector<1x256xf32>,
    %c0_i32_10 = arith.constant 0 : i32
    %11 = arith.cmpi eq, %arg2, %c0_i32_10 : i32
    %12 = arith.extui %11 : i1 to i32
    %c0_i32_11 = arith.constant 0 : i32
    %13 = arith.cmpi ne, %12, %c0_i32_11 : i32
    scf.if %13 {
      %c0_12 = arith.constant 0 : index
      %c0_13 = arith.constant 0 : index
      %14 = vector.load %arg7[%c0_12, %c0_13] : memref<1x256xf32, #tpu.memory_space<vmem>>, vector<1x256xf32>
      %c0_14 = arith.constant 0 : index
      %c0_15 = arith.constant 0 : index
      %15 = vector.load %arg5[%c0_14, %c0_15] : memref<1x256xf32, #tpu.memory_space<vmem>>, vector<1x256xf32>
      %16 = arith.addf %14, %15 : vector<1x256xf32>
      %c0_16 = arith.constant 0 : index
      %c0_17 = arith.constant 0 : index
      %c0_18 = arith.constant 0 : index
      %17 = vector.load %arg6[%c0_16, %c0_17, %c0_18] : memref<1x1x256xf32, #tpu.memory_space<vmem>>, vector<1x1x256xf32>
      %18 = vector.shape_cast %17 : vector<1x1x256xf32> to vector<1x256xf32>
      %19 = vector.shape_cast %16 : vector<1x256xf32> to vector<1x1x256xf32>
      tpu.vector_store %arg6[%c0_16, %c0_17, %c0_18], %19 {strides = array<i32>} : memref<1x1x256xf32, #tpu.memory_space<vmem>>, vector<1x1x256xf32>,
    } else {
    }
    return
  }
  func.func @transform_0(%arg0: i32, %arg1: i32, %arg2: i32) -> (i32, i32, i32) {
    %c2_i32 = arith.constant 2 : i32
    %0 = arith.muli %arg0, %c2_i32 : i32
    %1 = arith.addi %0, %arg1 : i32
    %2 = arith.addi %1, %arg2 : i32
    %c0_i32 = arith.constant 0 : i32
    %c0_i32_0 = arith.constant 0 : i32
    %c0_i32_1 = arith.constant 0 : i32
    return %2, %c0_i32, %c0_i32_0 : i32, i32, i32
  }
  func.func @transform_1(%arg0: i32, %arg1: i32, %arg2: i32) -> (i32, i32, i32) {
    %c0_i32 = arith.constant 0 : i32
    %c0_i32_0 = arith.constant 0 : i32
    %c0_i32_1 = arith.constant 0 : i32
    return %arg2, %c0_i32, %c0_i32_0 : i32, i32, i32
  }
  func.func @transform_2(%arg0: i32, %arg1: i32, %arg2: i32) -> (i32, i32) {
    %c0_i32 = arith.constant 0 : i32
    %c0_i32_0 = arith.constant 0 : i32
    %c0_i32_1 = arith.constant 0 : i32
    return %c0_i32, %c0_i32_0 : i32, i32
  }
  func.func @transform_3(%arg0: i32, %arg1: i32, %arg2: i32) -> (i32, i32, i32) {
    %c2_i32 = arith.constant 2 : i32
    %0 = arith.muli %arg0, %c2_i32 : i32
    %1 = arith.addi %0, %arg1 : i32
    %c0_i32 = arith.constant 0 : i32
    %c0_i32_0 = arith.constant 0 : i32
    %c0_i32_1 = arith.constant 0 : i32
    return %1, %c0_i32, %c0_i32_0 : i32, i32, i32
  }
}

module attributes {stable_mosaic.version = 11 : i64} {
  func.func @_conv_tap_kernel(%arg0: i32, %arg1: i32, %arg2: i32, %arg3: memref<1x1x128xbf16, #tpu.memory_space<vmem>>, %arg4: memref<1x128x256xbf16, #tpu.memory_space<vmem>>, %arg5: memref<1x256xf32, #tpu.memory_space<vmem>>, %arg6: memref<1x1x256xf32, #tpu.memory_space<vmem>>, %arg7: memref<1x256xf32, #tpu.memory_space<vmem>>) attributes {dimension_semantics = [#tpu.dimension_semantics<parallel>, #tpu.dimension_semantics<parallel>, #tpu.dimension_semantics<arbitrary>], iteration_bounds = array<i64: 2, 4, 1>, scalar_prefetch = 0 : i64, scratch_operands = 1 : i64, tpu.core_type = #tpu.core_type<tc>, window_params = [{transform_indices = @transform_0, window_bounds = array<i64: 1, 1, 128>}, {transform_indices = @transform_1, window_bounds = array<i64: 1, 128, 256>}, {pipeline_mode = #tpu.pipeline_mode<synchronous>, transform_indices = @transform_2, window_bounds = array<i64: 1, 256>}, {transform_indices = @transform_3, window_bounds = array<i64: 1, 1, 256>}]} {
    %c0_i32 = arith.constant 0 : i32
    %0 = arith.cmpi eq, %arg2, %c0_i32 : i32
    %1 = arith.extui %0 : i1 to i32
    %c0_i32_0 = arith.constant 0 : i32
    %2 = arith.cmpi ne, %1, %c0_i32_0 : i32
    scf.if %2 {
      %cst_12 = arith.constant 0.000000e+00 : f32
      %14 = vector.broadcast %cst_12 : f32 to vector<1x256xf32>
      %c0_13 = arith.constant 0 : index
      %c0_14 = arith.constant 0 : index
      %15 = vector.load %arg7[%c0_13, %c0_14] : memref<1x256xf32, #tpu.memory_space<vmem>>, vector<1x256xf32>
      tpu.vector_store %arg7[%c0_13, %c0_14], %14 {strides = array<i32>} : memref<1x256xf32, #tpu.memory_space<vmem>>, vector<1x256xf32>,
    } else {
    }
    %c0 = arith.constant 0 : index
    %c0_1 = arith.constant 0 : index
    %3 = vector.load %arg7[%c0, %c0_1] : memref<1x256xf32, #tpu.memory_space<vmem>>, vector<1x256xf32>
    %c0_2 = arith.constant 0 : index
    %c0_3 = arith.constant 0 : index
    %c0_4 = arith.constant 0 : index
    %4 = vector.load %arg3[%c0_2, %c0_3, %c0_4] : memref<1x1x128xbf16, #tpu.memory_space<vmem>>, vector<1x1x128xbf16>
    %5 = vector.shape_cast %4 : vector<1x1x128xbf16> to vector<1x128xbf16>
    %c0_5 = arith.constant 0 : index
    %c0_6 = arith.constant 0 : index
    %c0_7 = arith.constant 0 : index
    %6 = vector.load %arg4[%c0_5, %c0_6, %c0_7] : memref<1x128x256xbf16, #tpu.memory_space<vmem>>, vector<1x128x256xbf16>
    %7 = vector.shape_cast %6 : vector<1x128x256xbf16> to vector<128x256xbf16>
    %cst = arith.constant dense<0.000000e+00> : vector<1x256xf32>
    %8 = tpu.matmul %5, %7, %cst {dimension_numbers = #tpu.dot_dimension_numbers<[1], [0], [0], [1], [0, 0, 1, 1], [], []>} : vector<1x128xbf16>, vector<128x256xbf16>, vector<1x256xf32> -> vector<1x256xf32>
    %9 = arith.addf %3, %8 : vector<1x256xf32>
    %c0_8 = arith.constant 0 : index
    %c0_9 = arith.constant 0 : index
    %10 = vector.load %arg7[%c0_8, %c0_9] : memref<1x256xf32, #tpu.memory_space<vmem>>, vector<1x256xf32>
    tpu.vector_store %arg7[%c0_8, %c0_9], %9 {strides = array<i32>} : memref<1x256xf32, #tpu.memory_space<vmem>>, vector<1x256xf32>,
    %c0_i32_10 = arith.constant 0 : i32
    %11 = arith.cmpi eq, %arg2, %c0_i32_10 : i32
    %12 = arith.extui %11 : i1 to i32
    %c0_i32_11 = arith.constant 0 : i32
    %13 = arith.cmpi ne, %12, %c0_i32_11 : i32
    scf.if %13 {
      %c0_12 = arith.constant 0 : index
      %c0_13 = arith.constant 0 : index
      %14 = vector.load %arg7[%c0_12, %c0_13] : memref<1x256xf32, #tpu.memory_space<vmem>>, vector<1x256xf32>
      %c0_14 = arith.constant 0 : index
      %c0_15 = arith.constant 0 : index
      %15 = vector.load %arg5[%c0_14, %c0_15] : memref<1x256xf32, #tpu.memory_space<vmem>>, vector<1x256xf32>
      %16 = arith.addf %14, %15 : vector<1x256xf32>
      %c0_16 = arith.constant 0 : index
      %c0_17 = arith.constant 0 : index
      %c0_18 = arith.constant 0 : index
      %17 = vector.load %arg6[%c0_16, %c0_17, %c0_18] : memref<1x1x256xf32, #tpu.memory_space<vmem>>, vector<1x1x256xf32>
      %18 = vector.shape_cast %17 : vector<1x1x256xf32> to vector<1x256xf32>
      %19 = vector.shape_cast %16 : vector<1x256xf32> to vector<1x1x256xf32>
      tpu.vector_store %arg6[%c0_16, %c0_17, %c0_18], %19 {strides = array<i32>} : memref<1x1x256xf32, #tpu.memory_space<vmem>>, vector<1x1x256xf32>,
    } else {
    }
    return
  }
  func.func @transform_0(%arg0: i32, %arg1: i32, %arg2: i32) -> (i32, i32, i32) {
    %c4_i32 = arith.constant 4 : i32
    %0 = arith.muli %arg0, %c4_i32 : i32
    %1 = arith.addi %0, %arg1 : i32
    %2 = arith.addi %1, %arg2 : i32
    %c0_i32 = arith.constant 0 : i32
    %c0_i32_0 = arith.constant 0 : i32
    %c0_i32_1 = arith.constant 0 : i32
    return %2, %c0_i32, %c0_i32_0 : i32, i32, i32
  }
  func.func @transform_1(%arg0: i32, %arg1: i32, %arg2: i32) -> (i32, i32, i32) {
    %c0_i32 = arith.constant 0 : i32
    %c0_i32_0 = arith.constant 0 : i32
    %c0_i32_1 = arith.constant 0 : i32
    return %arg2, %c0_i32, %c0_i32_0 : i32, i32, i32
  }
  func.func @transform_2(%arg0: i32, %arg1: i32, %arg2: i32) -> (i32, i32) {
    %c0_i32 = arith.constant 0 : i32
    %c0_i32_0 = arith.constant 0 : i32
    %c0_i32_1 = arith.constant 0 : i32
    return %c0_i32, %c0_i32_0 : i32, i32
  }
  func.func @transform_3(%arg0: i32, %arg1: i32, %arg2: i32) -> (i32, i32, i32) {
    %c4_i32 = arith.constant 4 : i32
    %0 = arith.muli %arg0, %c4_i32 : i32
    %1 = arith.addi %0, %arg1 : i32
    %c0_i32 = arith.constant 0 : i32
    %c0_i32_0 = arith.constant 0 : i32
    %c0_i32_1 = arith.constant 0 : i32
    return %1, %c0_i32, %c0_i32_0 : i32, i32, i32
  }
}

</mosaic_0001>

<bundles_post_ra>
// kernel: _lambda_.11
= control target key start
LH: loop header
LB: loop body
LE: loop exit
PB: predicated region body
PF: predicated region fallthrough
CT: control target
= control target key end

     0   :  { %s1213_s12 = smov 0   ;;  %s1215_s13 = smov 0   ;;  %s1381_s0 = inlined_call_operand.vmem [shape: bf16[16,256,128], index: 0, kind: input, shape index: {}]   ;;  %s1382_s1 = inlined_call_operand.vmem [shape: bf16[1,128,128], index: 1, kind: input, shape index: {}]   ;;  %s1383_s2 = inlined_call_operand.vmem [shape: f32[1,128], index: 2, kind: input, shape index: {}]   ;;  %s1384_s3 = inlined_call_operand.vmem [shape: f32[16,256,128], index: 3, kind: output, shape index: {}]  }
   0x1   :  { %s1217_s14 = smov 0   ;;  %s1219_s15 = smov 0  }
   0x2   :  { %s1221_s16 = smov 0  }
   0x3 LB: > { %s28_s17 = sadd.s32 1, %s1183_s14  ;;  %s32_s18 = sadd.s32 1, %s1187_s15  ;;  %s1191_s16 = sphi %s1221_s16, %s13_s16   ;;  %s1187_s15 = sphi %s1219_s15, %s1388_s15   ;;  %s1183_s14 = sphi %s1217_s14, %s1387_s14   ;;  %s1179_s13 = sphi %s1215_s13, %s1386_s13   ;;  %s1175_s12 = sphi %s1213_s12, %s1385_s12  }
   0x4   : > { %p30_p0 = scmp.ge.s32.totalorder %s28_s17, 8  ;;  %p965_p1 = scmp.ge.s32.totalorder %s1191_s16, 1 }
   0x5   : > { %p182_p2 = scmp.lt.s32.totalorder %s1191_s16, 17 }
   0x6   : > { %s1390_s17 = smov (%p30_p0, %s28_s17), 0  ;;  %s1392_s18 = smov (!%p30_p0, %s32_s18), %s1187_s15 }
   0x7   : > { %p183_p3 = pnand %p965_p1, %p182_p2  ;;  %p34_p4 = scmp.ge.s32.totalorder %s1392_s18, 2 }
   0x8   : > { %v1129_v0 = vld [vmem:[%s1382_s1] sm:$0xff] (!%p183_p3)   ;;  %s966_s21 = sshll.u32 (!%p183_p3), %s1179_s13, 3  ;;  %v1130_v1 = vld [vmem:[%s1382_s1 + $0x8] sm:$0xff] (!%p183_p3)   ;;  %v1131_v2 = vld [vmem:[%s1382_s1 + $0x10] sm:$0xff] (!%p183_p3)  }
   0x9   : > { %s1394_s18 = smov (%p34_p4, %s1392_s18), 0  ;;  %186 = sbr.rel (%p183_p3) target bundleno = 286 (0x11e), region = 32 }
   0xa   : > { %s217_s24 = sadd.s32 (!%p183_p3), %s1175_s12, %s966_s21  ;;  %1025 = vmatprep.subr.bf16.mxu0 (!%p183_p3), %v1129_v0  ;;  %1073 = vmatprep.subr.bf16.mxu1 (!%p183_p3), %v1129_v0  ;;  %v1132_v3 = vld [vmem:[%s1382_s1 + $0x18] sm:$0xff] (!%p183_p3)   ;;  %v1133_v6 = vld [vmem:[%s1382_s1 + $0x20] sm:$0xff] (!%p183_p3)   ;;  %v1134_v7 = vld [vmem:[%s1382_s1 + $0x28] sm:$0xff] (!%p183_p3)  }
   0xb   : > { %p219_p5 = scmp.lt.s32.totalorder (!%p183_p3), %s217_s24, 15  ;;  %1026 = vmatpush3.bf16.msra.mxu0 (!%p183_p3), %v1129_v0  ;;  %1081 = vmatpush3.bf16.msra.mxu1 (!%p183_p3), %v1129_v0  ;;  %v1135_v8 = vld [vmem:[%s1382_s1 + $0x30] sm:$0xff] (!%p183_p3)   ;;  %v1136_v9 = vld [vmem:[%s1382_s1 + $0x38] sm:$0xff] (!%p183_p3)   ;;  %v1294_v24 = vld [vmem:[%s1383_s2] ss:$0 sm:$0xff] (!%p183_p3) }
   0xc   : > { %1027 = vmatprep.subr.bf16.mxu0 (!%p183_p3), %v1130_v1  ;;  %1074 = vmatprep.subr.bf16.mxu1 (!%p183_p3), %v1130_v1 }
   0xf   : > { %1028 = vmatpush3.bf16.msra.mxu0 (!%p183_p3), %v1130_v1  ;;  %1082 = vmatpush3.bf16.msra.mxu1 (!%p183_p3), %v1130_v1 }
  0x10   : > { %s1396_s24 = smov (!%p219_p5, %s217_s24), 15  ;;  %1029 = vmatprep.subr.bf16.mxu0 %v1131_v2  ;;  %1075 = vmatprep.subr.bf16.mxu1 %v1131_v2 }
  0x11   : > { %s999_s27 = sshll.u32 %s1396_s24, 7  ;;  %s1000_s21 = sshll.u32 %s1396_s24, 8 }
  0x12   : > { %s1261_s5 = scalar_lea.vmem %s1381_s0, %s999_s27  ;;  %s1302_s25 = scalar_lea.vmem %s1384_s3, %s1000_s21 }
  0x13   : > { %v1137_v4 = vld [vmem:[%s1261_s5] sm:$0xff]   ;;  %1030 = vmatpush3.bf16.msra.mxu0 %v1131_v2  ;;  %1083 = vmatpush3.bf16.msra.mxu1 %v1131_v2  ;;  %v1139_v10 = vld [vmem:[%s1261_s5 + $0x8] sm:$0xff]   ;;  %v1141_v12 = vld [vmem:[%s1261_s5 + $0x10] sm:$0xff]  }
  0x14   : > { %v1138_v5 = vld [vmem:[%s1261_s5 + $0x40] sm:$0xff]   ;;  %1041 = vmatprep.mubr.bf16.mxu0 %v1137_v4  ;;  %1031 = vmatprep.subr.bf16.mxu0 %v1132_v3  ;;  %v1140_v11 = vld [vmem:[%s1261_s5 + $0x48] sm:$0xff]   ;;  %v1142_v13 = vld [vmem:[%s1261_s5 + $0x50] sm:$0xff]  }
  0x15   : > { %1076 = vmatprep.subr.bf16.mxu1 %v1132_v3  ;;  %1057 = vmatprep.mubr.bf16.mxu1 %v1138_v5  ;;  %v1143_v14 = vld [vmem:[%s1261_s5 + $0x18] sm:$0xff]   ;;  %v1145_v16 = vld [vmem:[%s1261_s5 + $0x20] sm:$0xff]   ;;  %v1147_v18 = vld [vmem:[%s1261_s5 + $0x28] sm:$0xff]  }
  0x16   : > { %v1144_v15 = vld [vmem:[%s1261_s5 + $0x58] sm:$0xff]   ;;  %v1146_v17 = vld [vmem:[%s1261_s5 + $0x60] sm:$0xff]   ;;  %v1148_v19 = vld [vmem:[%s1261_s5 + $0x68] sm:$0xff]  }
  0x17   : > { %1032 = vmatpush3.bf16.msra.mxu0 %v1132_v3  ;;  %1084 = vmatpush3.bf16.msra.mxu1 %v1132_v3  ;;  %v1149_v20 = vld [vmem:[%s1261_s5 + $0x30] sm:$0xff]   ;;  %v1151_v22 = vld [vmem:[%s1261_s5 + $0x38] sm:$0xff]  }
  0x18   : > { %1033 = vmatprep.subr.bf16.mxu0 %v1133_v6  ;;  %1077 = vmatprep.subr.bf16.mxu1 %v1133_v6  ;;  %v1150_v21 = vld [vmem:[%s1261_s5 + $0x70] sm:$0xff]   ;;  %v1152_v23 = vld [vmem:[%s1261_s5 + $0x78] sm:$0xff]  }
  0x1b   : > { %1034 = vmatpush3.bf16.msra.mxu0 %v1133_v6  ;;  %1085 = vmatpush3.bf16.msra.mxu1 %v1133_v6 }
  0x1c   : > { %1035 = vmatprep.subr.bf16.mxu0 %v1134_v7  ;;  %1078 = vmatprep.subr.bf16.mxu1 %v1134_v7 }
  0x1f   : > { %1036 = vmatpush3.bf16.msra.mxu0 %v1134_v7  ;;  %1086 = vmatpush3.bf16.msra.mxu1 %v1134_v7 }
  0x20   : > { %1037 = vmatprep.subr.bf16.mxu0 %v1135_v8  ;;  %1079 = vmatprep.subr.bf16.mxu1 %v1135_v8 }
  0x23   : > { %1038 = vmatpush3.bf16.msra.mxu0 %v1135_v8  ;;  %1087 = vmatpush3.bf16.msra.mxu1 %v1135_v8 }
  0x24   : > { %1039 = vmatprep.subr.bf16.mxu0 %v1136_v9  ;;  %1080 = vmatprep.subr.bf16.mxu1 %v1136_v9 }
  0x27   : > { %1040 = vmatpush3.bf16.msra.mxu0 %v1136_v9  ;;  %1088 = vmatpush3.bf16.msra.mxu1 %v1136_v9 }
  0x2a   : > { %1042 = vmatmul.mubr.bf16.vlgmr.msra.gmra.mrb[0].mxu0 %v1139_v10  ;;  %1058 = vmatmul.mubr.bf16.vlgmr.msra.gmra.mrb[0].mxu1 %v1140_v11 }
  0x2b   : > { %1045 = vmatprep.mubr.bf16.mxu0 %v1141_v12  ;;  %1061 = vmatprep.mubr.bf16.mxu1 %v1142_v13 }
  0x32   : > { %1046 = vmatmul.mubr.bf16.gmra.mrb[4].mxu0 %v1143_v14  ;;  %1062 = vmatmul.mubr.bf16.gmra.mrb[4].mxu1 %v1144_v15 }
  0x33   : > { %1049 = vmatprep.mubr.bf16.mxu0 %v1145_v16  ;;  %1065 = vmatprep.mubr.bf16.mxu1 %v1146_v17 }
  0x3a   : > { %1050 = vmatmul.mubr.bf16.gmra.mrb[8].mxu0 %v1147_v18  ;;  %1066 = vmatmul.mubr.bf16.gmra.mrb[8].mxu1 %v1148_v19 }
  0x3b   : > { %1053 = vmatprep.mubr.bf16.mxu0 %v1149_v20  ;;  %1069 = vmatprep.mubr.bf16.mxu1 %v1150_v21 }
  0x42   : > { %1054 = vmatmul.mubr.bf16.gmra.mrb[12].mxu0 %v1151_v22  ;;  %1070 = vmatmul.mubr.bf16.gmra.mrb[12].mxu1 %v1152_v23 }
  0xfd   : > { %v1043_v25 = vpop.f32.mrb[0].mxu0  ;;  %v1059_v26 = vpop.f32.mrb[0].mxu1 }
  0xfe   : > { %v771_v27 = vadd.f32 %v1043_v25, %v1294_v24  ;;  %v787_v28 = vadd.f32 %v1059_v26, %v1294_v24  ;;  %v536_v29 = vpop.f32.mrb[1].mxu0  ;;  %v600_v30 = vpop.f32.mrb[1].mxu1 }
  0xff   : > { %v769_v31 = vadd.f32 %v1294_v24, %v536_v29  ;;  %v785_v32 = vadd.f32 %v1294_v24, %v600_v30  ;;  %v1044_v33 = vpop.f32.mrb[2].mxu0  ;;  %v1060_v34 = vpop.f32.mrb[2].mxu1 }
 0x100   : > { %v803_v35 = vmax.f32 %v771_v27, 0.0  ;;  %v819_v36 = vmax.f32 %v787_v28, 0.0  ;;  %v772_v37 = vadd.f32 %v1044_v33, %v1294_v24  ;;  %v788_v38 = vadd.f32 %v1060_v34, %v1294_v24  ;;  %v539_v39 = vpop.f32.mrb[3].mxu0  ;;  %v603_v40 = vpop.f32.mrb[3].mxu1 }
 0x101   : > { %v801_v41 = vmax.f32 %v769_v31, 0.0  ;;  %v817_v42 = vmax.f32 %v785_v32, 0.0  ;;  %v770_v43 = vadd.f32 %v1294_v24, %v539_v39  ;;  %v786_v44 = vadd.f32 %v1294_v24, %v603_v40 }
 0x102   : > { %835 = vst [vmem:[%s1302_s25 + $0x10] sm:$0xff] %v803_v35  ;;  %851 = vst [vmem:[%s1302_s25 + $0x90] sm:$0xff] %v819_v36  ;;  %v804_v45 = vmax.f32 %v772_v37, 0.0  ;;  %v820_v46 = vmax.f32 %v788_v38, 0.0 }
 0x103   : > { %833 = vst [vmem:[%s1302_s25] sm:$0xff] %v801_v41  ;;  %849 = vst [vmem:[%s1302_s25 + $0x80] sm:$0xff] %v817_v42  ;;  %v802_v47 = vmax.f32 %v770_v43, 0.0  ;;  %v818_v48 = vmax.f32 %v786_v44, 0.0 }
 0x104   : > { %836 = vst [vmem:[%s1302_s25 + $0x18] sm:$0xff] %v804_v45  ;;  %852 = vst [vmem:[%s1302_s25 + $0x98] sm:$0xff] %v820_v46 }
 0x105   : > { %834 = vst [vmem:[%s1302_s25 + $0x8] sm:$0xff] %v802_v47  ;;  %850 = vst [vmem:[%s1302_s25 + $0x88] sm:$0xff] %v818_v48  ;;  %v1047_v49 = vpop.f32.mrb[4].mxu0  ;;  %v1063_v50 = vpop.f32.mrb[4].mxu1 }
 0x106   : > { %v775_v51 = vadd.f32 %v1047_v49, %v1294_v24  ;;  %v791_v52 = vadd.f32 %v1063_v50, %v1294_v24  ;;  %v552_v53 = vpop.f32.mrb[5].mxu0  ;;  %v616_v54 = vpop.f32.mrb[5].mxu1 }
 0x107   : > { %v773_v55 = vadd.f32 %v1294_v24, %v552_v53  ;;  %v789_v56 = vadd.f32 %v1294_v24, %v616_v54  ;;  %v1048_v57 = vpop.f32.mrb[6].mxu0  ;;  %v1064_v58 = vpop.f32.mrb[6].mxu1 }
 0x108   : > { %v807_v59 = vmax.f32 %v775_v51, 0.0  ;;  %v823_v60 = vmax.f32 %v791_v52, 0.0  ;;  %v776_v61 = vadd.f32 %v1048_v57, %v1294_v24  ;;  %v792_v62 = vadd.f32 %v1064_v58, %v1294_v24  ;;  %v555_v63 = vpop.f32.mrb[7].mxu0  ;;  %v619_v0 = vpop.f32.mrb[7].mxu1 }
 0x109   : > { %v805_v1 = vmax.f32 %v773_v55, 0.0  ;;  %v821_v2 = vmax.f32 %v789_v56, 0.0  ;;  %v774_v3 = vadd.f32 %v1294_v24, %v555_v63  ;;  %v790_v4 = vadd.f32 %v1294_v24, %v619_v0 }
 0x10a   : > { %839 = vst [vmem:[%s1302_s25 + $0x30] sm:$0xff] %v807_v59  ;;  %855 = vst [vmem:[%s1302_s25 + $0xb0] sm:$0xff] %v823_v60  ;;  %v808_v5 = vmax.f32 %v776_v61, 0.0  ;;  %v824_v6 = vmax.f32 %v792_v62, 0.0 }
 0x10b   : > { %837 = vst [vmem:[%s1302_s25 + $0x20] sm:$0xff] %v805_v1  ;;  %853 = vst [vmem:[%s1302_s25 + $0xa0] sm:$0xff] %v821_v2  ;;  %v806_v7 = vmax.f32 %v774_v3, 0.0  ;;  %v822_v8 = vmax.f32 %v790_v4, 0.0 }
 0x10c   : > { %840 = vst [vmem:[%s1302_s25 + $0x38] sm:$0xff] %v808_v5  ;;  %856 = vst [vmem:[%s1302_s25 + $0xb8] sm:$0xff] %v824_v6 }
 0x10d   : > { %838 = vst [vmem:[%s1302_s25 + $0x28] sm:$0xff] %v806_v7  ;;  %854 = vst [vmem:[%s1302_s25 + $0xa8] sm:$0xff] %v822_v8  ;;  %v1051_v9 = vpop.f32.mrb[8].mxu0  ;;  %v1067_v10 = vpop.f32.mrb[8].mxu1 }
 0x10e   : > { %v779_v11 = vadd.f32 %v1051_v9, %v1294_v24  ;;  %v795_v12 = vadd.f32 %v1067_v10, %v1294_v24  ;;  %v568_v13 = vpop.f32.mrb[9].mxu0  ;;  %v632_v14 = vpop.f32.mrb[9].mxu1 }
 0x10f   : > { %v777_v15 = vadd.f32 %v1294_v24, %v568_v13  ;;  %v793_v16 = vadd.f32 %v1294_v24, %v632_v14  ;;  %v1052_v17 = vpop.f32.mrb[10].mxu0  ;;  %v1068_v18 = vpop.f32.mrb[10].mxu1 }
 0x110   : > { %v811_v19 = vmax.f32 %v779_v11, 0.0  ;;  %v827_v20 = vmax.f32 %v795_v12, 0.0  ;;  %v780_v21 = vadd.f32 %v1052_v17, %v1294_v24  ;;  %v796_v22 = vadd.f32 %v1068_v18, %v1294_v24  ;;  %v571_v23 = vpop.f32.mrb[11].mxu0  ;;  %v635_v25 = vpop.f32.mrb[11].mxu1 }
 0x111   : > { %v809_v26 = vmax.f32 %v777_v15, 0.0  ;;  %v825_v27 = vmax.f32 %v793_v16, 0.0  ;;  %v778_v28 = vadd.f32 %v1294_v24, %v571_v23  ;;  %v794_v29 = vadd.f32 %v1294_v24, %v635_v25 }
 0x112   : > { %843 = vst [vmem:[%s1302_s25 + $0x50] sm:$0xff] %v811_v19  ;;  %859 = vst [vmem:[%s1302_s25 + $0xd0] sm:$0xff] %v827_v20  ;;  %v812_v30 = vmax.f32 %v780_v21, 0.0  ;;  %v828_v31 = vmax.f32 %v796_v22, 0.0 }
 0x113   : > { %841 = vst [vmem:[%s1302_s25 + $0x40] sm:$0xff] %v809_v26  ;;  %857 = vst [vmem:[%s1302_s25 + $0xc0] sm:$0xff] %v825_v27  ;;  %v810_v32 = vmax.f32 %v778_v28, 0.0  ;;  %v826_v33 = vmax.f32 %v794_v29, 0.0 }
 0x114   : > { %844 = vst [vmem:[%s1302_s25 + $0x58] sm:$0xff] %v812_v30  ;;  %860 = vst [vmem:[%s1302_s25 + $0xd8] sm:$0xff] %v828_v31 }
 0x115   : > { %842 = vst [vmem:[%s1302_s25 + $0x48] sm:$0xff] %v810_v32  ;;  %858 = vst [vmem:[%s1302_s25 + $0xc8] sm:$0xff] %v826_v33  ;;  %v1055_v34 = vpop.f32.mrb[12].mxu0  ;;  %v1071_v35 = vpop.f32.mrb[12].mxu1 }
 0x116   : > { %v783_v36 = vadd.f32 %v1055_v34, %v1294_v24  ;;  %v799_v37 = vadd.f32 %v1071_v35, %v1294_v24  ;;  %v584_v38 = vpop.f32.mrb[13].mxu0  ;;  %v648_v39 = vpop.f32.mrb[13].mxu1 }
 0x117   : > { %v781_v40 = vadd.f32 %v1294_v24, %v584_v38  ;;  %v797_v41 = vadd.f32 %v1294_v24, %v648_v39  ;;  %v1056_v42 = vpop.f32.mrb[14].mxu0  ;;  %v1072_v43 = vpop.f32.mrb[14].mxu1 }
 0x118   : > { %v815_v44 = vmax.f32 %v783_v36, 0.0  ;;  %v831_v45 = vmax.f32 %v799_v37, 0.0  ;;  %v784_v46 = vadd.f32 %v1056_v42, %v1294_v24  ;;  %v800_v47 = vadd.f32 %v1072_v43, %v1294_v24  ;;  %v587_v48 = vpop.f32.mrb[15].mxu0  ;;  %v651_v49 = vpop.f32.mrb[15].mxu1 }
 0x119   : > { %v813_v50 = vmax.f32 %v781_v40, 0.0  ;;  %v829_v51 = vmax.f32 %v797_v41, 0.0  ;;  %v782_v52 = vadd.f32 %v1294_v24, %v587_v48  ;;  %v798_v53 = vadd.f32 %v1294_v24, %v651_v49 }
 0x11a   : > { %847 = vst [vmem:[%s1302_s25 + $0x70] sm:$0xff] %v815_v44  ;;  %863 = vst [vmem:[%s1302_s25 + $0xf0] sm:$0xff] %v831_v45  ;;  %v816_v54 = vmax.f32 %v784_v46, 0.0  ;;  %v832_v55 = vmax.f32 %v800_v47, 0.0 }
 0x11b   : > { %845 = vst [vmem:[%s1302_s25 + $0x60] sm:$0xff] %v813_v50  ;;  %861 = vst [vmem:[%s1302_s25 + $0xe0] sm:$0xff] %v829_v51  ;;  %v814_v56 = vmax.f32 %v782_v52, 0.0  ;;  %v830_v57 = vmax.f32 %v798_v53, 0.0 }
 0x11c   : > { %848 = vst [vmem:[%s1302_s25 + $0x78] sm:$0xff] %v816_v54  ;;  %864 = vst [vmem:[%s1302_s25 + $0xf8] sm:$0xff] %v832_v55 }
 0x11d   : > { %846 = vst [vmem:[%s1302_s25 + $0x68] sm:$0xff] %v814_v56  ;;  %862 = vst [vmem:[%s1302_s25 + $0xe8] sm:$0xff] %v830_v57 }
 0x11e PF: > { %s13_s16 = sadd.s32 1, %s1191_s16   ;;  %s1385_s12 = smov %s1183_s14 }
 0x11f   : > { %p10_p6 = scmp.ge.s32.totalorder %s13_s16, 18   ;;  %s1386_s13 = smov %s1187_s15 }
 0x120   : > { %s1387_s14 = smov %s1390_s17  ;;  %s1388_s15 = smov %s1394_s18 }
 0x121   :  { %12 = sbr.rel (!%p10_p6) target bundleno = 3 (0x3), region = 73 }

// kernel: _lambda_.12
= control target key start
LH: loop header
LB: loop body
LE: loop exit
PB: predicated region body
PF: predicated region fallthrough
CT: control target
= control target key end

     0   :  { %s917_s12 = smov 0   ;;  %s919_s13 = smov 0   ;;  %s1037_s0 = inlined_call_operand.vmem [shape: bf16[20,64,256], index: 0, kind: input, shape index: {}]   ;;  %s1038_s1 = inlined_call_operand.vmem [shape: bf16[3,256,128], index: 1, kind: input, shape index: {}]   ;;  %s1039_s2 = inlined_call_operand.vmem [shape: f32[1,128], index: 2, kind: input, shape index: {}]   ;;  %s1040_s3 = inlined_call_operand.vmem [shape: f32[16,64,128], index: 3, kind: output, shape index: {}]  }
   0x1   :  { %s921_s14 = smov 0   ;;  %s923_s15 = smov 0  }
   0x2   :  { %s925_s16 = smov 0   ;;  %s927_s17 = smov 0  }
   0x3   :  { %s929_s18 = smov 0  }
   0x4 LB: > { %s25_s19 = sadd.s32 1, %s882_s15  ;;  %s28_s20 = sadd.s32 1, %s886_s16  ;;  %s894_s18 = sphi %s929_s18, %s13_s18   ;;  %s890_s17 = sphi %s927_s17, %s1046_s17   ;;  %s886_s16 = sphi %s925_s16, %s1045_s16   ;;  %s882_s15 = sphi %s923_s15, %s1044_s15   ;;  %s878_s14 = sphi %s921_s14, %s1043_s14   ;;  %s874_s13 = sphi %s919_s13, %s1042_s13   ;;  %s870_s12 = sphi %s917_s12, %s1041_s12  }
   0x5   : > { %p26_p0 = scmp.ge.s32.totalorder %s25_s19, 3  ;;  %p659_p1 = scmp.ge.s32.totalorder %s894_s18, 1 }
   0x6   : > { %p182_p2 = scmp.lt.s32.totalorder %s894_s18, 49  ;;  %s32_s21 = sadd.s32 1, %s890_s17 }
   0x7   : > { %s1048_s19 = smov (%p26_p0, %s25_s19), 0  ;;  %s1050_s20 = smov (!%p26_p0, %s28_s20), %s886_s16 }
   0x8   : > { %p183_p3 = pnand %p659_p1, %p182_p2  ;;  %p30_p4 = scmp.ge.s32.totalorder %s1050_s20, 8 }
   0x9   : > { %s216_s22 = smul.u32 (!%p183_p3), 10, %s878_s14  ;;  %p227_p6 = scmp.lt.s32.totalorder (!%p183_p3), %s870_s12, 2 }
   0xa   : > { %s1052_s20 = smov (%p30_p4, %s1050_s20), 0  ;;  %s1054_s21 = smov (!%p30_p4, %s32_s21), %s890_s17 }
   0xb   : > { %p34_p5 = scmp.ge.s32.totalorder %s1054_s21, 2  ;;  %186 = sbr.rel (%p183_p3) target bundleno = 303 (0x12f), region = 32 }
   0xc   : > { %s664_s23 = sshll.u32 (!%p183_p3), %s878_s14, 3  ;;  %s217_s24 = sadd.s32 (!%p183_p3), %s874_s13, %s216_s22 }
   0xd   : > { %s1056_s21 = smov (%p34_p5, %s1054_s21), 0  ;;  %s233_s25 = sadd.s32 (!%p183_p3), %s874_s13, %s664_s23 }
   0xe   : > { %s218_s26 = sadd.s32 (!%p183_p3), %s870_s12, %s217_s24  ;;  %p234_p8 = scmp.lt.s32.totalorder (!%p183_p3), %s233_s25, 15 }
   0xf   : > { %p219_p7 = scmp.lt.s32.totalorder (!%p183_p3), %s218_s26, 19  ;;  %p667_p9 = scmp.ne.s32.totalorder (!%p183_p3), %s870_s12, 0 }
  0x12   : > { %s228_s27 = scalar_select %p227_p6, %s870_s12, 2 }
  0x13   : > { %s1058_s26 = smov (!%p219_p7, %s218_s26), 19  ;;  %s1060_s25 = smov (!%p234_p8, %s233_s25), 15 }
  0x14   : > { %s697_s28 = sshll.u32 %s228_s27, 7  ;;  %s696_s29 = sshll.u32 %s1058_s26, 6  ;;  %v896_v0 = vmov (!%p667_p9), 0.0  }
  0x15   : > { %s967_s5 = scalar_lea.vmem %s1038_s1, %s697_s28  ;;  %s972_s8 = scalar_lea.vmem %s1037_s0, %s696_s29  ;;  %246 = vst [vmem:[#allocation2] sm:$0xff] (!%p667_p9), %v896_v0  ;;  %247 = vst [vmem:[#allocation2 + $0x8] sm:$0xff] (!%p667_p9), %v896_v0 }
  0x16   : > { %s698_s9 = sshll.u32 %s1060_s25, 6  ;;  %245 = sbr.rel (%p667_p9) target bundleno = 29 (0x1d), region = 36  ;;  %248 = vst [vmem:[#allocation2 + $0x10] sm:$0xff] (!%p667_p9), %v896_v0  ;;  %249 = vst [vmem:[#allocation2 + $0x18] sm:$0xff] (!%p667_p9), %v896_v0 }
  0x17   : > { %s977_s13 = scalar_lea.vmem %s1040_s3, %s698_s9  ;;  %250 = vst [vmem:[#allocation2 + $0x20] sm:$0xff] (!%p667_p9), %v896_v0  ;;  %251 = vst [vmem:[#allocation2 + $0x28] sm:$0xff] (!%p667_p9), %v896_v0 }
  0x18   : > { %252 = vst [vmem:[#allocation2 + $0x30] sm:$0xff] (!%p667_p9), %v896_v0  ;;  %253 = vst [vmem:[#allocation2 + $0x38] sm:$0xff] (!%p667_p9), %v896_v0 }
  0x1d PF: > { %v812_v1 = vld [vmem:[%s967_s5 + $0x40] sm:$0xff]   ;;  %v814_v3 = vld [vmem:[%s967_s5 + $0x48] sm:$0xff]   ;;  %v816_v5 = vld [vmem:[%s967_s5 + $0x50] sm:$0xff]   ;;  %p692_p10 = scmp.ne.s32.totalorder %s870_s12, 2 }
  0x1e   : > { %v813_v2 = vld [vmem:[%s967_s5] sm:$0xff]   ;;  %699 = vmatprep.subr.bf16.mxu0 %v812_v1  ;;  %739 = vmatprep.subr.bf16.mxu1 %v812_v1  ;;  %v815_v4 = vld [vmem:[%s967_s5 + $0x8] sm:$0xff]   ;;  %v817_v6 = vld [vmem:[%s967_s5 + $0x10] sm:$0xff]  }
  0x1f   : > { %700 = vmatpush3.bf16.msra.mxu0 %v813_v2  ;;  %747 = vmatpush3.bf16.msra.mxu1 %v813_v2  ;;  %v818_v7 = vld [vmem:[%s967_s5 + $0x58] sm:$0xff]   ;;  %v820_v9 = vld [vmem:[%s967_s5 + $0x60] sm:$0xff]   ;;  %v822_v11 = vld [vmem:[%s967_s5 + $0x68] sm:$0xff]  }
  0x20   : > { %701 = vmatprep.subr.bf16.mxu0 %v814_v3  ;;  %740 = vmatprep.subr.bf16.mxu1 %v814_v3  ;;  %v819_v8 = vld [vmem:[%s967_s5 + $0x18] sm:$0xff]   ;;  %v821_v10 = vld [vmem:[%s967_s5 + $0x20] sm:$0xff]   ;;  %v823_v14 = vld [vmem:[%s967_s5 + $0x28] sm:$0xff]  }
  0x21   : > { %v830_v12 = vld [vmem:[%s972_s8 + $0x4] ss:$8 sps:$4 sm:$0xff]   ;;  %v824_v15 = vld [vmem:[%s967_s5 + $0x70] sm:$0xff]   ;;  %v826_v17 = vld [vmem:[%s967_s5 + $0x78] sm:$0xff]  }
  0x22   : > { %v833_v13 = vld [vmem:[%s972_s8 + $0x24] ss:$8 sps:$4 sm:$0xff]   ;;  %470 = vmatprep.mubr.bf16.mxu0 %v830_v12  ;;  %v825_v16 = vld [vmem:[%s967_s5 + $0x30] sm:$0xff]   ;;  %v827_v18 = vld [vmem:[%s967_s5 + $0x38] sm:$0xff]  }
  0x23   : > { %702 = vmatpush3.bf16.msra.mxu0 %v815_v4  ;;  %748 = vmatpush3.bf16.msra.mxu1 %v815_v4  ;;  %v828_v19 = vld [vmem:[%s972_s8] ss:$8 sps:$4 sm:$0xff]   ;;  %v834_v21 = vld [vmem:[%s972_s8 + $0x14] ss:$8 sps:$4 sm:$0xff]   ;;  %v838_v23 = vld [vmem:[%s972_s8 + $0x10] ss:$8 sps:$4 sm:$0xff]  }
  0x24   : > { %703 = vmatprep.subr.bf16.mxu0 %v816_v5  ;;  %741 = vmatprep.subr.bf16.mxu1 %v816_v5  ;;  %v831_v20 = vld [vmem:[%s972_s8 + $0x20] ss:$8 sps:$4 sm:$0xff]   ;;  %v836_v22 = vld [vmem:[%s972_s8 + $0x34] ss:$8 sps:$4 sm:$0xff]   ;;  %v839_v24 = vld [vmem:[%s972_s8 + $0x30] ss:$8 sps:$4 sm:$0xff]  }
  0x25   : > { %486 = vmatprep.mubr.bf16.mxu1 %v833_v13  ;;  %v254_v27 = vld [vmem:[#allocation2] sm:$0xff]  ;;  %v255_v35 = vld [vmem:[#allocation2 + $0x8] sm:$0xff]  ;;  %v256_v47 = vld [vmem:[#allocation2 + $0x10] sm:$0xff] }
  0x26   : > { %v258_v29 = vld [vmem:[#allocation2 + $0x20] sm:$0xff]  ;;  %v259_v37 = vld [vmem:[#allocation2 + $0x28] sm:$0xff]  ;;  %v260_v49 = vld [vmem:[#allocation2 + $0x30] sm:$0xff] }
  0x27   : > { %704 = vmatpush3.bf16.msra.mxu0 %v817_v6  ;;  %749 = vmatpush3.bf16.msra.mxu1 %v817_v6  ;;  %v257_v55 = vld [vmem:[#allocation2 + $0x18] sm:$0xff]  ;;  %v693_v2 = vld [vmem:[%s1039_s2] ss:$0 sm:$0xff] (!%p692_p10) }
  0x28   : > { %705 = vmatprep.subr.bf16.mxu0 %v818_v7  ;;  %742 = vmatprep.subr.bf16.mxu1 %v818_v7  ;;  %v261_v57 = vld [vmem:[#allocation2 + $0x38] sm:$0xff] }
  0x2b   : > { %706 = vmatpush3.bf16.msra.mxu0 %v819_v8  ;;  %750 = vmatpush3.bf16.msra.mxu1 %v819_v8 }
  0x2c   : > { %707 = vmatprep.subr.bf16.mxu0 %v820_v9  ;;  %743 = vmatprep.subr.bf16.mxu1 %v820_v9 }
  0x2f   : > { %708 = vmatpush3.bf16.msra.mxu0 %v821_v10  ;;  %751 = vmatpush3.bf16.msra.mxu1 %v821_v10 }
  0x30   : > { %709 = vmatprep.subr.bf16.mxu0 %v822_v11  ;;  %744 = vmatprep.subr.bf16.mxu1 %v822_v11 }
  0x33   : > { %710 = vmatpush3.bf16.msra.mxu0 %v823_v14  ;;  %752 = vmatpush3.bf16.msra.mxu1 %v823_v14 }
  0x34   : > { %711 = vmatprep.subr.bf16.mxu0 %v824_v15  ;;  %745 = vmatprep.subr.bf16.mxu1 %v824_v15 }
  0x37   : > { %712 = vmatpush3.bf16.msra.mxu0 %v825_v16  ;;  %753 = vmatpush3.bf16.msra.mxu1 %v825_v16 }
  0x38   : > { %713 = vmatprep.subr.bf16.mxu0 %v826_v17  ;;  %746 = vmatprep.subr.bf16.mxu1 %v826_v17 }
  0x3b   : > { %714 = vmatpush3.bf16.msra.mxu0 %v827_v18  ;;  %754 = vmatpush3.bf16.msra.mxu1 %v827_v18 }
  0x3e   : > { %471 = vmatmul.mubr.bf16.vlgmr.msra.gmra.mrb[0].mxu0 %v828_v19  ;;  %487 = vmatmul.mubr.bf16.vlgmr.msra.gmra.mrb[0].mxu1 %v831_v20 }
  0x3f   : > { %478 = vmatprep.mubr.bf16.mxu0 %v834_v21  ;;  %494 = vmatprep.mubr.bf16.mxu1 %v836_v22 }
  0x46   : > { %479 = vmatmul.mubr.bf16.gmra.mrb[4].mxu0 %v838_v23  ;;  %495 = vmatmul.mubr.bf16.gmra.mrb[4].mxu1 %v839_v24 }
 0x111   : > { %v715_v25 = vpop.f32.mrb[0].mxu0  ;;  %v727_v26 = vpop.f32.mrb[0].mxu1 }
 0x112   : > { %v716_v28 = vpop.f32.mrb[1].mxu0  ;;  %v728_v30 = vpop.f32.mrb[1].mxu1 }
 0x113   : > { %v717_v31 = vadd.f32 %v716_v28, %v715_v25  ;;  %v729_v32 = vadd.f32 %v728_v30, %v727_v26  ;;  %v718_v33 = vpop.f32.mrb[2].mxu0  ;;  %v730_v34 = vpop.f32.mrb[2].mxu1 }
 0x114   : > { %v719_v36 = vpop.f32.mrb[3].mxu0  ;;  %v731_v38 = vpop.f32.mrb[3].mxu1 }
 0x115   : > { %v503_v39 = vadd.f32 %v717_v31, %v254_v27  ;;  %v507_v40 = vadd.f32 %v729_v32, %v258_v29  ;;  %v720_v41 = vadd.f32 %v719_v36, %v718_v33  ;;  %v732_v42 = vadd.f32 %v731_v38, %v730_v34 }
 0x117   : > { %511 = vst [vmem:[#allocation2] sm:$0xff] %v503_v39  ;;  %515 = vst [vmem:[#allocation2 + $0x20] sm:$0xff] %v507_v40  ;;  %v504_v43 = vadd.f32 %v720_v41, %v255_v35  ;;  %v508_v44 = vadd.f32 %v732_v42, %v259_v37 }
 0x119   : > { %512 = vst [vmem:[#allocation2 + $0x8] sm:$0xff] %v504_v43  ;;  %516 = vst [vmem:[#allocation2 + $0x28] sm:$0xff] %v508_v44  ;;  %v721_v45 = vpop.f32.mrb[4].mxu0  ;;  %v733_v46 = vpop.f32.mrb[4].mxu1 }
 0x11a   : > { %v722_v48 = vpop.f32.mrb[5].mxu0  ;;  %v734_v50 = vpop.f32.mrb[5].mxu1 }
 0x11b   : > { %v723_v51 = vadd.f32 %v722_v48, %v721_v45  ;;  %v735_v52 = vadd.f32 %v734_v50, %v733_v46  ;;  %v724_v53 = vpop.f32.mrb[6].mxu0  ;;  %v736_v54 = vpop.f32.mrb[6].mxu1  ;;  %522 = sbr.rel (%p692_p10) target bundleno = 303 (0x12f), region = 40 }
 0x11c   : > { %v725_v56 = vpop.f32.mrb[7].mxu0  ;;  %v737_v58 = vpop.f32.mrb[7].mxu1 }
 0x11d   : > { %v505_v59 = vadd.f32 %v723_v51, %v256_v47  ;;  %v509_v60 = vadd.f32 %v735_v52, %v260_v49  ;;  %v726_v61 = vadd.f32 %v725_v56, %v724_v53  ;;  %v738_v62 = vadd.f32 %v737_v58, %v736_v54 }
 0x11e   : > { %v523_v1 = vld [vmem:[#allocation2] sm:$0xff] (!%p692_p10) }
 0x11f   : > { %513 = vst [vmem:[#allocation2 + $0x10] sm:$0xff] %v505_v59  ;;  %517 = vst [vmem:[#allocation2 + $0x30] sm:$0xff] %v509_v60  ;;  %v506_v63 = vadd.f32 %v726_v61, %v257_v55  ;;  %v510_v0 = vadd.f32 %v738_v62, %v261_v57  ;;  %v538_v4 = vadd.f32 (!%p692_p10), %v693_v2, %v523_v1  ;;  %v527_v8 = vld [vmem:[#allocation2 + $0x20] sm:$0xff] (!%p692_p10) }
 0x120   : > { %v524_v3 = vld [vmem:[#allocation2 + $0x8] sm:$0xff] (!%p692_p10)  ;;  %v542_v11 = vadd.f32 (!%p692_p10), %v693_v2, %v527_v8 }
 0x121   : > { %514 = vst [vmem:[#allocation2 + $0x18] sm:$0xff] %v506_v63  ;;  %518 = vst [vmem:[#allocation2 + $0x38] sm:$0xff] %v510_v0  ;;  %v539_v5 = vadd.f32 (!%p692_p10), %v693_v2, %v524_v3  ;;  %v528_v12 = vld [vmem:[#allocation2 + $0x28] sm:$0xff] (!%p692_p10)  ;;  %v546_v15 = vmax.f32 (!%p692_p10), %v538_v4, 0.0 }
 0x122   : > { %v543_v17 = vadd.f32 %v693_v2, %v528_v12  ;;  %v550_v21 = vmax.f32 %v542_v11, 0.0 }
 0x123   : > { %v547_v16 = vmax.f32 %v539_v5, 0.0  ;;  %554 = vst [vmem:[%s977_s13] sm:$0xff] %v546_v15 }
 0x124   : > { %v551_v23 = vmax.f32 %v543_v17, 0.0  ;;  %558 = vst [vmem:[%s977_s13 + $0x20] sm:$0xff] %v550_v21 }
 0x125   : > { %555 = vst [vmem:[%s977_s13 + $0x8] sm:$0xff] %v547_v16 }
 0x126   : > { %v525_v6 = vld [vmem:[#allocation2 + $0x10] sm:$0xff]  ;;  %559 = vst [vmem:[%s977_s13 + $0x28] sm:$0xff] %v551_v23 }
 0x127   : > { %v540_v9 = vadd.f32 %v693_v2, %v525_v6  ;;  %v529_v13 = vld [vmem:[#allocation2 + $0x30] sm:$0xff] }
 0x128   : > { %v526_v7 = vld [vmem:[#allocation2 + $0x18] sm:$0xff]  ;;  %v544_v18 = vadd.f32 %v693_v2, %v529_v13 }
 0x129   : > { %v541_v10 = vadd.f32 %v693_v2, %v526_v7  ;;  %v530_v14 = vld [vmem:[#allocation2 + $0x38] sm:$0xff]  ;;  %v548_v19 = vmax.f32 %v540_v9, 0.0 }
 0x12a   : > { %v545_v22 = vadd.f32 %v693_v2, %v530_v14  ;;  %v552_v24 = vmax.f32 %v544_v18, 0.0 }
 0x12b   : > { %v549_v20 = vmax.f32 %v541_v10, 0.0  ;;  %556 = vst [vmem:[%s977_s13 + $0x10] sm:$0xff] %v548_v19 }
 0x12c   : > { %v553_v25 = vmax.f32 %v545_v22, 0.0  ;;  %560 = vst [vmem:[%s977_s13 + $0x30] sm:$0xff] %v552_v24 }
 0x12d   : > { %557 = vst [vmem:[%s977_s13 + $0x18] sm:$0xff] %v549_v20 }
 0x12e   : > { %561 = vst [vmem:[%s977_s13 + $0x38] sm:$0xff] %v553_v25 }
 0x12f PF: > { %s13_s18 = sadd.s32 1, %s894_s18   ;;  %s1041_s12 = smov %s882_s15 }
 0x130   : > { %p10_p11 = scmp.ge.s32.totalorder %s13_s18, 50   ;;  %s1042_s13 = smov %s886_s16 }
 0x131   : > { %s1043_s14 = smov %s890_s17  ;;  %s1044_s15 = smov %s1048_s19 }
 0x132   : > { %s1045_s16 = smov %s1052_s20  ;;  %s1046_s17 = smov %s1056_s21 }
 0x133   :  { %12 = sbr.rel (!%p10_p11) target bundleno = 4 (0x4), region = 73 }

// kernel: _lambda_.13
= control target key start
LH: loop header
LB: loop body
LE: loop exit
PB: predicated region body
PF: predicated region fallthrough
CT: control target
= control target key end

     0   :  { %s1120_s12 = smov 0   ;;  %s1122_s13 = smov 0   ;;  %s1252_s0 = inlined_call_operand.vmem [shape: bf16[20,64,384], index: 0, kind: input, shape index: {}]   ;;  %s1253_s1 = inlined_call_operand.vmem [shape: bf16[3,384,128], index: 1, kind: input, shape index: {}]   ;;  %s1254_s2 = inlined_call_operand.vmem [shape: f32[1,128], index: 2, kind: input, shape index: {}]   ;;  %s1255_s3 = inlined_call_operand.vmem [shape: f32[16,64,128], index: 3, kind: output, shape index: {}]  }
   0x1   :  { %s1124_s14 = smov 0   ;;  %s1126_s15 = smov 0  }
   0x2   :  { %s1128_s16 = smov 0   ;;  %s1130_s17 = smov 0  }
   0x3   :  { %s1132_s18 = smov 0  }
   0x4 LB: > { %s25_s19 = sadd.s32 1, %s1085_s15  ;;  %s28_s20 = sadd.s32 1, %s1089_s16  ;;  %s1097_s18 = sphi %s1132_s18, %s13_s18   ;;  %s1093_s17 = sphi %s1130_s17, %s1261_s17   ;;  %s1089_s16 = sphi %s1128_s16, %s1260_s16   ;;  %s1085_s15 = sphi %s1126_s15, %s1259_s15   ;;  %s1081_s14 = sphi %s1124_s14, %s1258_s14   ;;  %s1077_s13 = sphi %s1122_s13, %s1257_s13   ;;  %s1073_s12 = sphi %s1120_s12, %s1256_s12  }
   0x5   : > { %p26_p0 = scmp.ge.s32.totalorder %s25_s19, 3  ;;  %p820_p1 = scmp.ge.s32.totalorder %s1097_s18, 1 }
   0x6   : > { %p182_p2 = scmp.lt.s32.totalorder %s1097_s18, 49  ;;  %s32_s21 = sadd.s32 1, %s1093_s17 }
   0x7   : > { %s1263_s19 = smov (%p26_p0, %s25_s19), 0  ;;  %s1265_s20 = smov (!%p26_p0, %s28_s20), %s1089_s16 }
   0x8   : > { %p183_p3 = pnand %p820_p1, %p182_p2  ;;  %p30_p4 = scmp.ge.s32.totalorder %s1265_s20, 8 }
   0x9   : > { %s216_s22 = smul.u32 (!%p183_p3), 10, %s1081_s14  ;;  %p227_p6 = scmp.lt.s32.totalorder (!%p183_p3), %s1073_s12, 2 }
   0xa   : > { %s1267_s20 = smov (%p30_p4, %s1265_s20), 0  ;;  %s1269_s21 = smov (!%p30_p4, %s32_s21), %s1093_s17 }
   0xb   : > { %p34_p5 = scmp.ge.s32.totalorder %s1269_s21, 2  ;;  %186 = sbr.rel (%p183_p3) target bundleno = 320 (0x140), region = 32 }
   0xc   : > { %s823_s23 = sshll.u32 (!%p183_p3), %s1081_s14, 3  ;;  %s217_s24 = sadd.s32 (!%p183_p3), %s1077_s13, %s216_s22 }
   0xd   : > { %s1271_s21 = smov (%p34_p5, %s1269_s21), 0  ;;  %s218_s25 = sadd.s32 (!%p183_p3), %s1073_s12, %s217_s24 }
   0xe   : > { %p219_p7 = scmp.lt.s32.totalorder (!%p183_p3), %s218_s25, 19  ;;  %s233_s26 = sadd.s32 (!%p183_p3), %s1077_s13, %s823_s23 }
   0xf   : > { %p234_p8 = scmp.lt.s32.totalorder (!%p183_p3), %s233_s26, 15  ;;  %p826_p9 = scmp.ne.s32.totalorder (!%p183_p3), %s1073_s12, 0 }
  0x12   : > { %s228_s27 = scalar_select %p227_p6, %s1073_s12, 2 }
  0x13   : > { %s1273_s25 = smov (!%p219_p7, %s218_s25), 19  ;;  %s1275_s26 = smov (!%p234_p8, %s233_s26), 15 }
  0x14   : > { %s945_s28 = smul.u32 192, %s228_s27  ;;  %s867_s9 = sshll.u32 %s1275_s26, 6  ;;  %v1099_v0 = vmov (!%p826_p9), 0.0  }
  0x15   : > { %s944_s29 = smul.u32 96, %s1273_s25  ;;  %s1180_s13 = scalar_lea.vmem %s1255_s3, %s867_s9  ;;  %246 = vst [vmem:[#allocation2] sm:$0xff] (!%p826_p9), %v1099_v0  ;;  %247 = vst [vmem:[#allocation2 + $0x8] sm:$0xff] (!%p826_p9), %v1099_v0 }
  0x16   : > { %s1170_s5 = scalar_lea.vmem %s1253_s1, %s945_s28  ;;  %245 = sbr.rel (%p826_p9) target bundleno = 29 (0x1d), region = 36  ;;  %248 = vst [vmem:[#allocation2 + $0x10] sm:$0xff] (!%p826_p9), %v1099_v0  ;;  %249 = vst [vmem:[#allocation2 + $0x18] sm:$0xff] (!%p826_p9), %v1099_v0 }
  0x17   : > { %s1175_s8 = scalar_lea.vmem %s1252_s0, %s944_s29  ;;  %250 = vst [vmem:[#allocation2 + $0x20] sm:$0xff] (!%p826_p9), %v1099_v0  ;;  %251 = vst [vmem:[#allocation2 + $0x28] sm:$0xff] (!%p826_p9), %v1099_v0 }
  0x18   : > { %252 = vst [vmem:[#allocation2 + $0x30] sm:$0xff] (!%p826_p9), %v1099_v0  ;;  %253 = vst [vmem:[#allocation2 + $0x38] sm:$0xff] (!%p826_p9), %v1099_v0 }
  0x1d PF: > { %v1003_v1 = vld [vmem:[%s1170_s5 + $0x40] sm:$0xff]   ;;  %v1006_v4 = vld [vmem:[%s1170_s5 + $0x48] sm:$0xff]   ;;  %v1009_v7 = vld [vmem:[%s1170_s5 + $0x50] sm:$0xff]   ;;  %p863_p10 = scmp.ne.s32.totalorder %s1073_s12, 2 }
  0x1e   : > { %v1004_v2 = vld [vmem:[%s1170_s5] sm:$0xff]   ;;  %868 = vmatprep.subr.bf16.mxu0 %v1003_v1  ;;  %v1007_v5 = vld [vmem:[%s1170_s5 + $0x8] sm:$0xff]   ;;  %v1010_v8 = vld [vmem:[%s1170_s5 + $0x10] sm:$0xff]  }
  0x1f   : > { %v1005_v3 = vld [vmem:[%s1170_s5 + $0x80] sm:$0xff]   ;;  %869 = vmatpush3.bf16.msra.mxu0 %v1004_v2  ;;  %v1008_v6 = vld [vmem:[%s1170_s5 + $0x88] sm:$0xff]   ;;  %v1011_v9 = vld [vmem:[%s1170_s5 + $0x90] sm:$0xff]  }
  0x20   : > { %920 = vmatprep.subr.bf16.mxu1 %v1005_v3  ;;  %870 = vmatprep.subr.bf16.mxu0 %v1006_v4  ;;  %v1012_v10 = vld [vmem:[%s1170_s5 + $0x58] sm:$0xff]   ;;  %v1015_v13 = vld [vmem:[%s1170_s5 + $0x60] sm:$0xff]   ;;  %v1018_v16 = vld [vmem:[%s1170_s5 + $0x68] sm:$0xff]  }
  0x21   : > { %921 = vmatpush3.bf16.msra.mxu1 %v1005_v3  ;;  %v1013_v11 = vld [vmem:[%s1170_s5 + $0x18] sm:$0xff]   ;;  %v1017_v14 = vld [vmem:[%s1170_s5 + $0xa0] sm:$0xff]   ;;  %v1020_v17 = vld [vmem:[%s1170_s5 + $0xa8] sm:$0xff]  }
  0x22   : > { %922 = vmatprep.subr.bf16.mxu1 %v1008_v6  ;;  %v1014_v12 = vld [vmem:[%s1170_s5 + $0x98] sm:$0xff]   ;;  %v1016_v15 = vld [vmem:[%s1170_s5 + $0x20] sm:$0xff]   ;;  %v1019_v18 = vld [vmem:[%s1170_s5 + $0x28] sm:$0xff]  }
  0x23   : > { %871 = vmatpush3.bf16.msra.mxu0 %v1007_v5  ;;  %v1021_v19 = vld [vmem:[%s1170_s5 + $0x70] sm:$0xff]   ;;  %v1024_v22 = vld [vmem:[%s1170_s5 + $0x78] sm:$0xff]   ;;  %v1027_v27 = vld [vmem:[%s1175_s8] ss:$12 sps:$4 sm:$0xff]  }
  0x24   : > { %872 = vmatprep.subr.bf16.mxu0 %v1009_v7  ;;  %v1022_v20 = vld [vmem:[%s1170_s5 + $0x30] sm:$0xff]   ;;  %v1026_v23 = vld [vmem:[%s1170_s5 + $0xb8] sm:$0xff]   ;;  %v1031_v29 = vld [vmem:[%s1175_s8 + $0x20] ss:$12 sps:$4 sm:$0xff]  }
  0x25   : > { %923 = vmatpush3.bf16.msra.mxu1 %v1008_v6  ;;  %v1023_v21 = vld [vmem:[%s1170_s5 + $0xb0] sm:$0xff]   ;;  %v1025_v26 = vld [vmem:[%s1170_s5 + $0x38] sm:$0xff]   ;;  %v254_v43 = vld [vmem:[#allocation2] sm:$0xff] }
  0x26   : > { %924 = vmatprep.subr.bf16.mxu1 %v1011_v9  ;;  %v1029_v24 = vld [vmem:[%s1175_s8 + $0x4] ss:$12 sps:$4 sm:$0xff]   ;;  %v1030_v25 = vld [vmem:[%s1175_s8 + $0x8] ss:$12 sps:$4 sm:$0xff]   ;;  %v1040_v35 = vld [vmem:[%s1175_s8 + $0x4c] ss:$12 sps:$4 sm:$0xff]  }
  0x27   : > { %873 = vmatpush3.bf16.msra.mxu0 %v1010_v8  ;;  %566 = vmatprep.mubr.bf16.mxu0 %v1029_v24  ;;  %v1032_v28 = vld [vmem:[%s1175_s8 + $0x1c] ss:$12 sps:$4 sm:$0xff]   ;;  %v1038_v30 = vld [vmem:[%s1175_s8 + $0x38] ss:$12 sps:$4 sm:$0xff]   ;;  %v1035_v32 = vld [vmem:[%s1175_s8 + $0x34] ss:$12 sps:$4 sm:$0xff]  }
  0x28   : > { %874 = vmatprep.subr.bf16.mxu0 %v1012_v10  ;;  %936 = vmatprep.mubr.bf16.mxu1 %v1030_v25  ;;  %v1034_v31 = vld [vmem:[%s1175_s8 + $0x18] ss:$12 sps:$4 sm:$0xff]   ;;  %v1039_v33 = vld [vmem:[%s1175_s8 + $0x50] ss:$12 sps:$4 sm:$0xff]   ;;  %v1042_v36 = vld [vmem:[%s1175_s8 + $0x48] ss:$12 sps:$4 sm:$0xff]  }
  0x29   : > { %925 = vmatpush3.bf16.msra.mxu1 %v1011_v9  ;;  %v1037_v34 = vld [vmem:[%s1175_s8 + $0x30] ss:$12 sps:$4 sm:$0xff]   ;;  %v255_v48 = vld [vmem:[#allocation2 + $0x8] sm:$0xff]  ;;  %v258_v10 = vld [vmem:[#allocation2 + $0x20] sm:$0xff] }
  0x2a   : > { %926 = vmatprep.subr.bf16.mxu1 %v1014_v12  ;;  %v256_v58 = vld [vmem:[#allocation2 + $0x10] sm:$0xff]  ;;  %v257_v0 = vld [vmem:[#allocation2 + $0x18] sm:$0xff] }
  0x2b   : > { %875 = vmatpush3.bf16.msra.mxu0 %v1013_v11  ;;  %v261_v25 = vld [vmem:[#allocation2 + $0x38] sm:$0xff] }
  0x2c   : > { %876 = vmatprep.subr.bf16.mxu0 %v1015_v13  ;;  %v259_v13 = vld [vmem:[#allocation2 + $0x28] sm:$0xff] }
  0x2d   : > { %927 = vmatpush3.bf16.msra.mxu1 %v1014_v12 }
  0x2e   : > { %928 = vmatprep.subr.bf16.mxu1 %v1017_v14 }
  0x2f   : > { %877 = vmatpush3.bf16.msra.mxu0 %v1016_v15 }
  0x30   : > { %878 = vmatprep.subr.bf16.mxu0 %v1018_v16 }
  0x31   : > { %929 = vmatpush3.bf16.msra.mxu1 %v1017_v14 }
  0x32   : > { %930 = vmatprep.subr.bf16.mxu1 %v1020_v17 }
  0x33   : > { %879 = vmatpush3.bf16.msra.mxu0 %v1019_v18 }
  0x34   : > { %880 = vmatprep.subr.bf16.mxu0 %v1021_v19 }
  0x35   : > { %931 = vmatpush3.bf16.msra.mxu1 %v1020_v17 }
  0x36   : > { %932 = vmatprep.subr.bf16.mxu1 %v1023_v21 }
  0x37   : > { %881 = vmatpush3.bf16.msra.mxu0 %v1022_v20 }
  0x38   : > { %882 = vmatprep.subr.bf16.mxu0 %v1024_v22 }
  0x39   : > { %933 = vmatpush3.bf16.msra.mxu1 %v1023_v21  ;;  %v260_v21 = vld [vmem:[#allocation2 + $0x30] sm:$0xff] }
  0x3a   : > { %934 = vmatprep.subr.bf16.mxu1 %v1026_v23 }
  0x3b   : > { %883 = vmatpush3.bf16.msra.mxu0 %v1025_v26 }
  0x3d   : > { %935 = vmatpush3.bf16.msra.mxu1 %v1026_v23 }
  0x3e   : > { %567 = vmatmul.mubr.bf16.vlgmr.msra.gmra.mrb[0].mxu0 %v1027_v27 }
  0x3f   : > { %574 = vmatprep.mubr.bf16.mxu0 %v1032_v28 }
  0x40   : > { %937 = vmatmul.mubr.bf16.vlgmr.msra.gmra.mrb[0].mxu1 %v1031_v29 }
  0x41   : > { %940 = vmatprep.mubr.bf16.mxu1 %v1038_v30  ;;  %v864_v30 = vld [vmem:[%s1254_s2] ss:$0 sm:$0xff] (!%p863_p10) }
  0x46   : > { %575 = vmatmul.mubr.bf16.gmra.mrb[4].mxu0 %v1034_v31 }
  0x47   : > { %582 = vmatprep.mubr.bf16.mxu0 %v1035_v32 }
  0x48   : > { %941 = vmatmul.mubr.bf16.gmra.mrb[4].mxu1 %v1039_v33 }
  0x4e   : > { %583 = vmatmul.mubr.bf16.gmra.mrb[8].mxu0 %v1037_v34 }
  0x4f   : > { %590 = vmatprep.mubr.bf16.mxu0 %v1040_v35 }
  0x56   : > { %591 = vmatmul.mubr.bf16.gmra.mrb[12].mxu0 %v1042_v36 }
 0x111   : > { %v884_v37 = vpop.f32.mrb[0].mxu0 }
 0x112   : > { %v885_v38 = vpop.f32.mrb[1].mxu0 }
 0x113   : > { %v886_v39 = vadd.f32 %v885_v38, %v884_v37  ;;  %v887_v40 = vpop.f32.mrb[2].mxu0  ;;  %v938_v41 = vpop.f32.mrb[0].mxu1 }
 0x114   : > { %v888_v42 = vpop.f32.mrb[3].mxu0  ;;  %v633_v44 = vpop.f32.mrb[1].mxu1 }
 0x115   : > { %v889_v45 = vadd.f32 %v888_v42, %v887_v40  ;;  %v634_v46 = vadd.f32 %v886_v39, %v633_v44  ;;  %v939_v47 = vpop.f32.mrb[2].mxu1 }
 0x116   : > { %v636_v49 = vpop.f32.mrb[3].mxu1 }
 0x117   : > { %v664_v50 = vadd.f32 %v634_v46, %v254_v43  ;;  %v637_v51 = vadd.f32 %v889_v45, %v636_v49 }
 0x119   : > { %672 = vst [vmem:[#allocation2] sm:$0xff] %v664_v50  ;;  %v665_v52 = vadd.f32 %v637_v51, %v255_v48  ;;  %v890_v53 = vpop.f32.mrb[4].mxu0 }
 0x11a   : > { %v891_v54 = vpop.f32.mrb[5].mxu0 }
 0x11b   : > { %673 = vst [vmem:[#allocation2 + $0x8] sm:$0xff] %v665_v52  ;;  %v892_v55 = vadd.f32 %v891_v54, %v890_v53  ;;  %v893_v56 = vpop.f32.mrb[6].mxu0  ;;  %v942_v57 = vpop.f32.mrb[4].mxu1 }
 0x11c   : > { %v894_v59 = vpop.f32.mrb[7].mxu0  ;;  %v649_v60 = vpop.f32.mrb[5].mxu1 }
 0x11d   : > { %v642_v61 = vadd.f32 %v938_v41, %v892_v55  ;;  %v895_v62 = vadd.f32 %v894_v59, %v893_v56  ;;  %v943_v63 = vpop.f32.mrb[6].mxu1 }
 0x11e   : > { %v652_v1 = vpop.f32.mrb[7].mxu1 }
 0x11f   : > { %v666_v2 = vadd.f32 %v642_v61, %v256_v58  ;;  %v645_v3 = vadd.f32 %v939_v47, %v895_v62 }
 0x120   : > { %v684_v29 = vld [vmem:[#allocation2] sm:$0xff] (!%p863_p10) }
 0x121   : > { %674 = vst [vmem:[#allocation2 + $0x10] sm:$0xff] %v666_v2  ;;  %v667_v4 = vadd.f32 %v645_v3, %v257_v0  ;;  %v896_v5 = vpop.f32.mrb[8].mxu0  ;;  %v699_v32 = vadd.f32 (!%p863_p10), %v864_v30, %v684_v29 }
 0x122   : > { %v897_v6 = vpop.f32.mrb[9].mxu0  ;;  %v685_v31 = vld [vmem:[#allocation2 + $0x8] sm:$0xff] (!%p863_p10) }
 0x123   : > { %675 = vst [vmem:[#allocation2 + $0x18] sm:$0xff] %v667_v4  ;;  %v898_v7 = vadd.f32 %v897_v6, %v896_v5  ;;  %v899_v8 = vpop.f32.mrb[10].mxu0  ;;  %v700_v33 = vadd.f32 (!%p863_p10), %v864_v30, %v685_v31  ;;  %v707_v43 = vmax.f32 (!%p863_p10), %v699_v32, 0.0 }
 0x124   : > { %v900_v9 = vpop.f32.mrb[11].mxu0 }
 0x125   : > { %v901_v11 = vadd.f32 %v900_v9, %v899_v8  ;;  %v650_v12 = vadd.f32 %v898_v7, %v649_v60  ;;  %v708_v44 = vmax.f32 (!%p863_p10), %v700_v33, 0.0  ;;  %715 = vst [vmem:[%s1180_s13] sm:$0xff] (!%p863_p10), %v707_v43 }
 0x127   : > { %v668_v14 = vadd.f32 %v650_v12, %v258_v10  ;;  %v653_v15 = vadd.f32 %v901_v11, %v652_v1  ;;  %716 = vst [vmem:[%s1180_s13 + $0x8] sm:$0xff] (!%p863_p10), %v708_v44 }
 0x128   : > { %v686_v34 = vld [vmem:[#allocation2 + $0x10] sm:$0xff] (!%p863_p10) }
 0x129   : > { %676 = vst [vmem:[#allocation2 + $0x20] sm:$0xff] %v668_v14  ;;  %v669_v16 = vadd.f32 %v653_v15, %v259_v13  ;;  %v902_v17 = vpop.f32.mrb[12].mxu0  ;;  %v701_v37 = vadd.f32 (!%p863_p10), %v864_v30, %v686_v34 }
 0x12a   : > { %v903_v18 = vpop.f32.mrb[13].mxu0  ;;  %v687_v35 = vld [vmem:[#allocation2 + $0x18] sm:$0xff] (!%p863_p10) }
 0x12b   : > { %677 = vst [vmem:[#allocation2 + $0x28] sm:$0xff] %v669_v16  ;;  %v904_v19 = vadd.f32 %v903_v18, %v902_v17  ;;  %v905_v20 = vpop.f32.mrb[14].mxu0  ;;  %v702_v38 = vadd.f32 (!%p863_p10), %v864_v30, %v687_v35  ;;  %v709_v47 = vmax.f32 (!%p863_p10), %v701_v37, 0.0 }
 0x12c   : > { %v906_v22 = vpop.f32.mrb[15].mxu0 }
 0x12d   : > { %v658_v23 = vadd.f32 %v942_v57, %v904_v19  ;;  %v907_v24 = vadd.f32 %v906_v22, %v905_v20  ;;  %683 = sbr.rel (%p863_p10) target bundleno = 320 (0x140), region = 40  ;;  %v710_v48 = vmax.f32 (!%p863_p10), %v702_v38, 0.0  ;;  %717 = vst [vmem:[%s1180_s13 + $0x10] sm:$0xff] (!%p863_p10), %v709_v47 }
 0x12f   : > { %v670_v26 = vadd.f32 %v658_v23, %v260_v21  ;;  %v661_v27 = vadd.f32 %v943_v63, %v907_v24  ;;  %718 = vst [vmem:[%s1180_s13 + $0x18] sm:$0xff] (!%p863_p10), %v710_v48 }
 0x130   : > { %v688_v36 = vld [vmem:[#allocation2 + $0x20] sm:$0xff] (!%p863_p10) }
 0x131   : > { %678 = vst [vmem:[#allocation2 + $0x30] sm:$0xff] %v670_v26  ;;  %v671_v28 = vadd.f32 %v661_v27, %v261_v25  ;;  %v703_v39 = vadd.f32 (!%p863_p10), %v864_v30, %v688_v36 }
 0x132   : > { %v689_v40 = vld [vmem:[#allocation2 + $0x28] sm:$0xff] (!%p863_p10) }
 0x133   : > { %679 = vst [vmem:[#allocation2 + $0x38] sm:$0xff] %v671_v28  ;;  %v704_v45 = vadd.f32 (!%p863_p10), %v864_v30, %v689_v40  ;;  %v711_v49 = vmax.f32 (!%p863_p10), %v703_v39, 0.0 }
 0x135   : > { %v712_v51 = vmax.f32 %v704_v45, 0.0  ;;  %719 = vst [vmem:[%s1180_s13 + $0x20] sm:$0xff] %v711_v49 }
 0x137   : > { %720 = vst [vmem:[%s1180_s13 + $0x28] sm:$0xff] %v712_v51 }
 0x138   : > { %v690_v41 = vld [vmem:[#allocation2 + $0x30] sm:$0xff] }
 0x139   : > { %v705_v46 = vadd.f32 %v864_v30, %v690_v41 }
 0x13a   : > { %v691_v42 = vld [vmem:[#allocation2 + $0x38] sm:$0xff] }
 0x13b   : > { %v706_v50 = vadd.f32 %v864_v30, %v691_v42  ;;  %v713_v52 = vmax.f32 %v705_v46, 0.0 }
 0x13d   : > { %v714_v53 = vmax.f32 %v706_v50, 0.0  ;;  %721 = vst [vmem:[%s1180_s13 + $0x30] sm:$0xff] %v713_v52 }
 0x13f   : > { %722 = vst [vmem:[%s1180_s13 + $0x38] sm:$0xff] %v714_v53 }
 0x140 PF: > { %s13_s18 = sadd.s32 1, %s1097_s18   ;;  %s1256_s12 = smov %s1085_s15 }
 0x141   : > { %p10_p11 = scmp.ge.s32.totalorder %s13_s18, 50   ;;  %s1257_s13 = smov %s1089_s16 }
 0x142   : > { %s1258_s14 = smov %s1093_s17  ;;  %s1259_s15 = smov %s1263_s19 }
 0x143   : > { %s1260_s16 = smov %s1267_s20  ;;  %s1261_s17 = smov %s1271_s21 }
 0x144   :  { %12 = sbr.rel (!%p10_p11) target bundleno = 4 (0x4), region = 73 }

// kernel: _lambda_.14
= control target key start
LH: loop header
LB: loop body
LE: loop exit
PB: predicated region body
PF: predicated region fallthrough
CT: control target
= control target key end

     0   :  { %s1162_s12 = smov 0   ;;  %s1164_s13 = smov 0   ;;  %s1297_s0 = inlined_call_operand.vmem [shape: bf16[12,16,640], index: 0, kind: input, shape index: {}]   ;;  %s1298_s1 = inlined_call_operand.vmem [shape: bf16[3,640,128], index: 1, kind: input, shape index: {}]   ;;  %s1299_s2 = inlined_call_operand.vmem [shape: f32[1,128], index: 2, kind: input, shape index: {}]   ;;  %s1300_s3 = inlined_call_operand.vmem [shape: f32[8,16,128], index: 3, kind: output, shape index: {}]  }
   0x1   :  { %s1166_s14 = smov 0   ;;  %s1168_s15 = smov 0  }
   0x2   :  { %s1170_s16 = smov 0   ;;  %s1172_s17 = smov 0  }
   0x3   :  { %s1174_s18 = smov 0  }
   0x4 LB: > { %s25_s19 = sadd.s32 1, %s1125_s15  ;;  %s28_s20 = sadd.s32 1, %s1129_s16  ;;  %s1137_s18 = sphi %s1174_s18, %s13_s18   ;;  %s1133_s17 = sphi %s1172_s17, %s1306_s17   ;;  %s1129_s16 = sphi %s1170_s16, %s1305_s16   ;;  %s1125_s15 = sphi %s1168_s15, %s1304_s15   ;;  %s1121_s14 = sphi %s1166_s14, %s1303_s14   ;;  %s1117_s13 = sphi %s1164_s13, %s1302_s13   ;;  %s1113_s12 = sphi %s1162_s12, %s1301_s12  }
   0x5   : > { %p26_p0 = scmp.ge.s32.totalorder %s25_s19, 3  ;;  %p845_p1 = scmp.ge.s32.totalorder %s1137_s18, 1 }
   0x6   : > { %p182_p2 = scmp.lt.s32.totalorder %s1137_s18, 25  ;;  %s32_s21 = sadd.s32 1, %s1133_s17 }
   0x7   : > { %s1308_s19 = smov (%p26_p0, %s25_s19), 0  ;;  %s1310_s20 = smov (!%p26_p0, %s28_s20), %s1129_s16 }
   0x8   : > { %p183_p3 = pnand %p845_p1, %p182_p2  ;;  %p30_p4 = scmp.ge.s32.totalorder %s1310_s20, 4 }
   0x9   : > { %s216_s22 = smul.u32 (!%p183_p3), 6, %s1121_s14  ;;  %p227_p6 = scmp.lt.s32.totalorder (!%p183_p3), %s1113_s12, 2 }
   0xa   : > { %s1312_s20 = smov (%p30_p4, %s1310_s20), 0  ;;  %s1314_s21 = smov (!%p30_p4, %s32_s21), %s1133_s17 }
   0xb   : > { %p34_p5 = scmp.ge.s32.totalorder %s1314_s21, 2  ;;  %186 = sbr.rel (%p183_p3) target bundleno = 326 (0x146), region = 32 }
   0xc   : > { %s848_s23 = sshll.u32 (!%p183_p3), %s1121_s14, 2  ;;  %s217_s24 = sadd.s32 (!%p183_p3), %s1117_s13, %s216_s22 }
   0xd   : > { %s1316_s21 = smov (%p34_p5, %s1314_s21), 0  ;;  %s218_s25 = sadd.s32 (!%p183_p3), %s1113_s12, %s217_s24 }
   0xe   : > { %p219_p7 = scmp.lt.s32.totalorder (!%p183_p3), %s218_s25, 11  ;;  %s233_s26 = sadd.s32 (!%p183_p3), %s1117_s13, %s848_s23 }
   0xf   : > { %p234_p8 = scmp.lt.s32.totalorder (!%p183_p3), %s233_s26, 7  ;;  %p851_p9 = scmp.ne.s32.totalorder (!%p183_p3), %s1113_s12, 0 }
  0x12   : > { %s228_s27 = scalar_select %p227_p6, %s1113_s12, 2 }
  0x13   : > { %s1318_s25 = smov (!%p219_p7, %s218_s25), 11  ;;  %s1320_s26 = smov (!%p234_p8, %s233_s26), 7 }
  0x14   : > { %s976_s28 = smul.u32 320, %s228_s27  ;;  %s901_s9 = sshll.u32 %s1320_s26, 4  ;;  %v1139_v0 = vmov (!%p851_p9), 0.0  }
  0x15   : > { %s975_s29 = smul.u32 40, %s1318_s25  ;;  %s1222_s13 = scalar_lea.vmem %s1300_s3, %s901_s9  ;;  %246 = vst [vmem:[#allocation2] sm:$0xff] (!%p851_p9), %v1139_v0  ;;  %247 = vst [vmem:[#allocation2 + $0x8] sm:$0xff] (!%p851_p9), %v1139_v0 }
  0x16   : > { %s1212_s5 = scalar_lea.vmem %s1298_s1, %s976_s28  ;;  %245 = sbr.rel (%p851_p9) target bundleno = 29 (0x1d), region = 36 }
  0x17   : > { %s1217_s8 = scalar_lea.vmem %s1297_s0, %s975_s29 }
  0x1d PF: > { %v1036_v1 = vld [vmem:[%s1212_s5 + $0x40] sm:$0xff]   ;;  %v1040_v5 = vld [vmem:[%s1212_s5 + $0x48] sm:$0xff]   ;;  %v1044_v9 = vld [vmem:[%s1212_s5 + $0x50] sm:$0xff]   ;;  %v1140_v35 = vmov 0.0   ;;  %vm1141_vm0 = vmmov 0   ;;  %p897_p10 = scmp.ne.s32.totalorder %s1113_s12, 2 }
  0x1e   : > { %v1037_v2 = vld [vmem:[%s1212_s5 + $0xc0] sm:$0xff]   ;;  %902 = vmatprep.subr.bf16.mxu0 %v1036_v1  ;;  %v1041_v6 = vld [vmem:[%s1212_s5 + $0xc8] sm:$0xff]   ;;  %v1045_v10 = vld [vmem:[%s1212_s5 + $0xd0] sm:$0xff]  }
  0x1f   : > { %v1038_v3 = vld [vmem:[%s1212_s5] sm:$0xff]   ;;  %924 = vmatprep.subr.bf16.mxu1 %v1037_v2  ;;  %v1042_v7 = vld [vmem:[%s1212_s5 + $0x8] sm:$0xff]   ;;  %v1046_v11 = vld [vmem:[%s1212_s5 + $0x10] sm:$0xff]  }
  0x20   : > { %v1039_v4 = vld [vmem:[%s1212_s5 + $0x80] sm:$0xff]   ;;  %903 = vmatpush3.bf16.msra.mxu0 %v1038_v3  ;;  %v1043_v8 = vld [vmem:[%s1212_s5 + $0x88] sm:$0xff]   ;;  %v1047_v12 = vld [vmem:[%s1212_s5 + $0x90] sm:$0xff]  }
  0x21   : > { %925 = vmatpush3.bf16.msra.mxu1 %v1039_v4  ;;  %904 = vmatprep.subr.bf16.mxu0 %v1040_v5  ;;  %v1048_v13 = vld [vmem:[%s1212_s5 + $0x58] sm:$0xff]   ;;  %v1052_v17 = vld [vmem:[%s1212_s5 + $0x60] sm:$0xff]   ;;  %v1056_v21 = vld [vmem:[%s1212_s5 + $0x68] sm:$0xff]  }
  0x22   : > { %926 = vmatprep.subr.bf16.mxu1 %v1041_v6  ;;  %v1049_v14 = vld [vmem:[%s1212_s5 + $0xd8] sm:$0xff]   ;;  %v1053_v18 = vld [vmem:[%s1212_s5 + $0xe0] sm:$0xff]   ;;  %v1057_v22 = vld [vmem:[%s1212_s5 + $0xe8] sm:$0xff]  }
  0x23   : > { %v1050_v15 = vld [vmem:[%s1212_s5 + $0x18] sm:$0xff]   ;;  %v1054_v19 = vld [vmem:[%s1212_s5 + $0x20] sm:$0xff]   ;;  %v1058_v23 = vld [vmem:[%s1212_s5 + $0x28] sm:$0xff]  }
  0x24   : > { %905 = vmatpush3.bf16.msra.mxu0 %v1042_v7  ;;  %v1051_v16 = vld [vmem:[%s1212_s5 + $0x98] sm:$0xff]   ;;  %v1055_v20 = vld [vmem:[%s1212_s5 + $0xa0] sm:$0xff]   ;;  %v1059_v24 = vld [vmem:[%s1212_s5 + $0xa8] sm:$0xff]  }
  0x25   : > { %927 = vmatpush3.bf16.msra.mxu1 %v1043_v8  ;;  %906 = vmatprep.subr.bf16.mxu0 %v1044_v9  ;;  %v1060_v25 = vld [vmem:[%s1212_s5 + $0x70] sm:$0xff]   ;;  %v1064_v29 = vld [vmem:[%s1212_s5 + $0x78] sm:$0xff]   ;;  %v1073_v37 = vld [vmem:[%s1217_s8 + $0xc] ss:$20 sps:$4 sm:$0xff]  }
  0x26   : > { %928 = vmatprep.subr.bf16.mxu1 %v1045_v10  ;;  %v1061_v26 = vld [vmem:[%s1212_s5 + $0xf0] sm:$0xff]   ;;  %v1065_v30 = vld [vmem:[%s1212_s5 + $0xf8] sm:$0xff]   ;;  %v1074_v38 = vld [vmem:[%s1212_s5 + $0x100] sm:$0xff]   ;;  %675 = vmatprep.mubr.bf16.mxu1 %v1073_v37 }
  0x27   : > { %v1062_v27 = vld [vmem:[%s1212_s5 + $0x30] sm:$0xff]   ;;  %v1066_v31 = vld [vmem:[%s1212_s5 + $0x38] sm:$0xff]   ;;  %v1075_v39 = vld [vmem:[%s1212_s5 + $0x108] sm:$0xff]  }
  0x28   : > { %907 = vmatpush3.bf16.msra.mxu0 %v1046_v11  ;;  %v1063_v28 = vld [vmem:[%s1212_s5 + $0xb0] sm:$0xff]   ;;  %v1067_v32 = vld [vmem:[%s1212_s5 + $0xb8] sm:$0xff]   ;;  %v1078_v42 = vld [vmem:[%s1212_s5 + $0x120] sm:$0xff]  }
  0x29   : > { %929 = vmatpush3.bf16.msra.mxu1 %v1047_v12  ;;  %908 = vmatprep.subr.bf16.mxu0 %v1048_v13  ;;  %v1068_v33 = vld [vmem:[%s1217_s8] ss:$20 sps:$4 sm:$0xff]   ;;  %v1070_v34 = vld [vmem:[%s1217_s8 + $0x4] ss:$20 sps:$4 sm:$0xff]   ;;  %v1071_v36 = vld [vmem:[%s1217_s8 + $0x8] ss:$20 sps:$4 sm:$0xff]  }
  0x2a   : > { %930 = vmatprep.subr.bf16.mxu1 %v1049_v14  ;;  %634 = vmatprep.mubr.bf16.mxu0 %v1070_v34  ;;  %v1076_v40 = vld [vmem:[%s1212_s5 + $0x110] sm:$0xff]   ;;  %v1077_v41 = vld [vmem:[%s1212_s5 + $0x118] sm:$0xff]   ;;  %v1079_v43 = vld [vmem:[%s1212_s5 + $0x128] sm:$0xff]  }
  0x2b   : > { %v1080_v44 = vld [vmem:[%s1212_s5 + $0x130] sm:$0xff]   ;;  %v1081_v45 = vld [vmem:[%s1212_s5 + $0x138] sm:$0xff]   ;;  %v248_v61 = vld [vmem:[#allocation2] sm:$0xff] }
  0x2c   : > { %909 = vmatpush3.bf16.msra.mxu0 %v1050_v15  ;;  %v1082_v46 = vld [vmem:[%s1217_s8 + $0x10] ss:$20 sps:$4 sm:$0xff]   ;;  %v249_v1 = vld [vmem:[#allocation2 + $0x8] sm:$0xff]  ;;  %v898_v8 = vld [vmem:[%s1299_s2] ss:$0 sm:$0xff] (!%p897_p10) }
  0x2d   : > { %931 = vmatpush3.bf16.msra.mxu1 %v1051_v16  ;;  %910 = vmatprep.subr.bf16.mxu0 %v1052_v17 }
  0x2e   : > { %932 = vmatprep.subr.bf16.mxu1 %v1053_v18 }
  0x30   : > { %911 = vmatpush3.bf16.msra.mxu0 %v1054_v19 }
  0x31   : > { %933 = vmatpush3.bf16.msra.mxu1 %v1055_v20  ;;  %912 = vmatprep.subr.bf16.mxu0 %v1056_v21 }
  0x32   : > { %934 = vmatprep.subr.bf16.mxu1 %v1057_v22 }
  0x34   : > { %913 = vmatpush3.bf16.msra.mxu0 %v1058_v23 }
  0x35   : > { %935 = vmatpush3.bf16.msra.mxu1 %v1059_v24  ;;  %914 = vmatprep.subr.bf16.mxu0 %v1060_v25 }
  0x36   : > { %936 = vmatprep.subr.bf16.mxu1 %v1061_v26 }
  0x38   : > { %915 = vmatpush3.bf16.msra.mxu0 %v1062_v27 }
  0x39   : > { %937 = vmatpush3.bf16.msra.mxu1 %v1063_v28  ;;  %916 = vmatprep.subr.bf16.mxu0 %v1064_v29 }
  0x3a   : > { %938 = vmatprep.subr.bf16.mxu1 %v1065_v30 }
  0x3c   : > { %917 = vmatpush3.bf16.msra.mxu0 %v1066_v31 }
  0x3d   : > { %939 = vmatpush3.bf16.msra.mxu1 %v1067_v32  ;;  %955 = vmatprep.subr.bf16.mxu0 %v1140_v35 }
  0x3f   : > { %635 = vmatmul.mubr.bf16.vlgmr.msra.gmra.mrb[0].mxu0 %v1068_v33 }
  0x40   : > { %676 = vmatmul.mubr.bf16.vlgmr.msra.gmra.mrb[0].mxu1 %v1071_v36  ;;  %956 = vmatpush3.bf16.msra.mxu0 %v1074_v38 }
  0x41   : > { %957 = vmatprep.subr.bf16.mxu0 %v1140_v35  ;;  %971 = vmatprep.mubr.msk.bf16.mxu0 %vm1141_vm0, %v1140_v35 }
  0x44   : > { %958 = vmatpush3.bf16.msra.mxu0 %v1075_v39 }
  0x45   : > { %959 = vmatprep.subr.bf16.mxu0 %v1140_v35 }
  0x48   : > { %960 = vmatpush3.bf16.msra.mxu0 %v1076_v40 }
  0x49   : > { %961 = vmatprep.subr.bf16.mxu0 %v1140_v35 }
  0x4c   : > { %962 = vmatpush3.bf16.msra.mxu0 %v1077_v41 }
  0x4d   : > { %963 = vmatprep.subr.bf16.mxu0 %v1140_v35 }
  0x50   : > { %964 = vmatpush3.bf16.msra.mxu0 %v1078_v42 }
  0x51   : > { %965 = vmatprep.subr.bf16.mxu0 %v1140_v35 }
  0x54   : > { %966 = vmatpush3.bf16.msra.mxu0 %v1079_v43 }
  0x55   : > { %967 = vmatprep.subr.bf16.mxu0 %v1140_v35 }
  0x58   : > { %968 = vmatpush3.bf16.msra.mxu0 %v1080_v44 }
  0x59   : > { %969 = vmatprep.subr.bf16.mxu0 %v1140_v35 }
  0x5c   : > { %970 = vmatpush3.bf16.msra.mxu0 %v1081_v45 }
  0x5f   : > { %972 = vmatmul.mubr.bf16.vlgmr.msra.gmra.mrb[4].mxu0 %v1082_v46 }
 0x112   : > { %v918_v47 = vpop.f32.mrb[0].mxu0 }
 0x113   : > { %v940_v48 = vpop.f32.mrb[0].mxu1  ;;  %v919_v49 = vpop.f32.mrb[1].mxu0 }
 0x114   : > { %v920_v50 = vadd.f32 %v919_v49, %v918_v47  ;;  %v941_v51 = vpop.f32.mrb[1].mxu1  ;;  %v921_v52 = vpop.f32.mrb[2].mxu0 }
 0x115   : > { %v942_v53 = vadd.f32 %v941_v51, %v940_v48  ;;  %v943_v54 = vpop.f32.mrb[2].mxu1  ;;  %v922_v55 = vpop.f32.mrb[3].mxu0 }
 0x116   : > { %v923_v56 = vadd.f32 %v922_v55, %v921_v52  ;;  %v944_v57 = vpop.f32.mrb[3].mxu1 }
 0x117   : > { %v945_v58 = vadd.f32 %v944_v57, %v943_v54  ;;  %v678_v59 = vadd.f32 %v942_v53, %v920_v50 }
 0x119   : > { %v681_v60 = vadd.f32 %v945_v58, %v923_v56 }
 0x132   : > { %v718_v62 = vpop.f32.mrb[4].mxu0 }
 0x133   : > { %v719_v63 = vadd.f32 %v718_v62, %v678_v59  ;;  %v973_v0 = vpop.f32.mrb[5].mxu0  ;;  %732 = sbr.rel (%p897_p10) target bundleno = 326 (0x146), region = 40 }
 0x134   : > { %v721_v2 = vpop.f32.mrb[6].mxu0 }
 0x135   : > { %v725_v3 = vadd.f32 %v719_v63, %v248_v61  ;;  %v722_v4 = vadd.f32 %v721_v2, %v681_v60  ;;  %v974_v5 = vpop.f32.mrb[7].mxu0 }
 0x137   : > { %727 = vst [vmem:[#allocation2] sm:$0xff] %v725_v3  ;;  %v726_v6 = vadd.f32 %v722_v4, %v249_v1 }
 0x139   : > { %728 = vst [vmem:[#allocation2 + $0x8] sm:$0xff] %v726_v6 }
 0x13e   : > { %v733_v7 = vld [vmem:[#allocation2] sm:$0xff] }
 0x13f   : > { %v742_v10 = vadd.f32 %v898_v8, %v733_v7 }
 0x140   : > { %v734_v9 = vld [vmem:[#allocation2 + $0x8] sm:$0xff] }
 0x141   : > { %v743_v11 = vadd.f32 %v898_v8, %v734_v9  ;;  %v744_v12 = vmax.f32 %v742_v10, 0.0 }
 0x143   : > { %v745_v13 = vmax.f32 %v743_v11, 0.0  ;;  %746 = vst [vmem:[%s1222_s13] sm:$0xff] %v744_v12 }
 0x145   : > { %747 = vst [vmem:[%s1222_s13 + $0x8] sm:$0xff] %v745_v13 }
 0x146 PF: > { %s13_s18 = sadd.s32 1, %s1137_s18   ;;  %s1301_s12 = smov %s1125_s15 }
 0x147   : > { %p10_p11 = scmp.ge.s32.totalorder %s13_s18, 26   ;;  %s1302_s13 = smov %s1129_s16 }
 0x148   : > { %s1303_s14 = smov %s1133_s17  ;;  %s1304_s15 = smov %s1308_s19 }
 0x149   : > { %s1305_s16 = smov %s1312_s20  ;;  %s1306_s17 = smov %s1316_s21 }
 0x14a   :  { %12 = sbr.rel (!%p10_p11) target bundleno = 4 (0x4), region = 73 }

// kernel: _lambda_.16
= control target key start
LH: loop header
LB: loop body
LE: loop exit
PB: predicated region body
PF: predicated region fallthrough
CT: control target
= control target key end

     0   :  { %s1141_s12 = smov 0   ;;  %s1143_s13 = smov 0   ;;  %s1272_s0 = inlined_call_operand.vmem [shape: bf16[8,4,640], index: 0, kind: input, shape index: {}]   ;;  %s1273_s1 = inlined_call_operand.vmem [shape: bf16[3,640,128], index: 1, kind: input, shape index: {}]   ;;  %s1274_s2 = inlined_call_operand.vmem [shape: f32[1,128], index: 2, kind: input, shape index: {}]   ;;  %s1275_s3 = inlined_call_operand.vmem [shape: f32[4,4,128], index: 3, kind: output, shape index: {}]  }
   0x1   :  { %s1145_s14 = smov 0   ;;  %s1147_s15 = smov 0  }
   0x2   :  { %s1149_s16 = smov 0   ;;  %s1151_s17 = smov 0  }
   0x3   :  { %s1153_s18 = smov 0  }
   0x4 LB: > { %s25_s19 = sadd.s32 1, %s1103_s15  ;;  %s28_s20 = sadd.s32 1, %s1107_s16  ;;  %s1115_s18 = sphi %s1153_s18, %s13_s18   ;;  %s1111_s17 = sphi %s1151_s17, %s1281_s17   ;;  %s1107_s16 = sphi %s1149_s16, %s1280_s16   ;;  %s1103_s15 = sphi %s1147_s15, %s1279_s15   ;;  %s1099_s14 = sphi %s1145_s14, %s1278_s14   ;;  %s1095_s13 = sphi %s1143_s13, %s1277_s13   ;;  %s1091_s12 = sphi %s1141_s12, %s1276_s12  }
   0x5   : > { %p26_p0 = scmp.ge.s32.totalorder %s25_s19, 3  ;;  %p833_p1 = scmp.ge.s32.totalorder %s1115_s18, 1 }
   0x6   : > { %p182_p2 = scmp.lt.s32.totalorder %s1115_s18, 13  ;;  %s32_s21 = sadd.s32 1, %s1111_s17 }
   0x7   : > { %s1283_s19 = smov (%p26_p0, %s25_s19), 0  ;;  %s1285_s20 = smov (!%p26_p0, %s28_s20), %s1107_s16 }
   0x8   : > { %p183_p3 = pnand %p833_p1, %p182_p2  ;;  %p30_p4 = scmp.ge.s32.totalorder %s1285_s20, 2 }
   0x9   : > { %s834_s22 = sshll.u32 (!%p183_p3), %s1099_s14, 2  ;;  %p226_p6 = scmp.lt.s32.totalorder (!%p183_p3), %s1091_s12, 2 }
   0xa   : > { %s1287_s20 = smov (%p30_p4, %s1285_s20), 0  ;;  %s1289_s21 = smov (!%p30_p4, %s32_s21), %s1111_s17 }
   0xb   : > { %p34_p5 = scmp.ge.s32.totalorder %s1289_s21, 2  ;;  %186 = sbr.rel (%p183_p3) target bundleno = 324 (0x144), region = 32 }
   0xc   : > { %s216_s23 = sadd.s32 (!%p183_p3), %s1095_s13, %s834_s22  ;;  %s837_s24 = sshll.u32 (!%p183_p3), %s1099_s14, 1 }
   0xd   : > { %s1291_s21 = smov (%p34_p5, %s1289_s21), 0  ;;  %s217_s25 = sadd.s32 (!%p183_p3), %s1091_s12, %s216_s23 }
   0xe   : > { %p218_p7 = scmp.lt.s32.totalorder (!%p183_p3), %s217_s25, 7  ;;  %s232_s26 = sadd.s32 (!%p183_p3), %s1095_s13, %s837_s24 }
   0xf   : > { %p233_p8 = scmp.lt.s32.totalorder (!%p183_p3), %s232_s26, 3  ;;  %p839_p9 = scmp.ne.s32.totalorder (!%p183_p3), %s1091_s12, 0 }
  0x12   : > { %s227_s27 = scalar_select %p226_p6, %s1091_s12, 2 }
  0x13   : > { %s1293_s25 = smov (!%p218_p7, %s217_s25), 7  ;;  %s1295_s26 = smov (!%p233_p8, %s232_s26), 3 }
  0x14   : > { %s959_s28 = smul.u32 320, %s227_s27  ;;  %s838_s9 = sshll.u32 %s1295_s26, 2  ;;  %v1117_v0 = vmov (!%p839_p9), 0.0  }
  0x15   : > { %s958_s29 = smul.u32 10, %s1293_s25  ;;  %s1201_s13 = scalar_lea.vmem %s1275_s3, %s838_s9  ;;  %244 = vst [vmem:[#allocation2] sm:$0xf] (!%p839_p9), %v1117_v0 }
  0x16   : > { %s1191_s5 = scalar_lea.vmem %s1273_s1, %s959_s28  ;;  %243 = sbr.rel (%p839_p9) target bundleno = 29 (0x1d), region = 36 }
  0x17   : > { %s1196_s8 = scalar_lea.vmem %s1272_s0, %s958_s29 }
  0x1d PF: > { %v1020_v1 = vld [vmem:[%s1191_s5 + $0x40] sm:$0xff]   ;;  %v1024_v5 = vld [vmem:[%s1191_s5 + $0x48] sm:$0xff]   ;;  %v1028_v9 = vld [vmem:[%s1191_s5 + $0x50] sm:$0xff]   ;;  %v334_v30 = vlaneseq  ;;  %v1118_v36 = vmov 1983009808   ;;  %v1119_v38 = vmov 0.0  }
  0x1e   : > { %v1021_v2 = vld [vmem:[%s1191_s5 + $0xc0] sm:$0xff]   ;;  %885 = vmatprep.subr.bf16.mxu0 %v1020_v1  ;;  %v1025_v6 = vld [vmem:[%s1191_s5 + $0xc8] sm:$0xff]   ;;  %v1029_v10 = vld [vmem:[%s1191_s5 + $0xd0] sm:$0xff]   ;;  %v332_v37 = vunpack.c.l.s4 %v1118_v36  ;;  %vm1120_vm0 = vmmov 0   ;;  %p881_p10 = scmp.ne.s32.totalorder %s1091_s12, 2 }
  0x1f   : > { %v1022_v3 = vld [vmem:[%s1191_s5] sm:$0xff]   ;;  %907 = vmatprep.subr.bf16.mxu1 %v1021_v2  ;;  %v1026_v7 = vld [vmem:[%s1191_s5 + $0x8] sm:$0xff]   ;;  %v1030_v11 = vld [vmem:[%s1191_s5 + $0x10] sm:$0xff]   ;;  %v335_v35 = vshrl.u32 %v334_v30, 7 }
  0x20   : > { %v1023_v4 = vld [vmem:[%s1191_s5 + $0x80] sm:$0xff]   ;;  %886 = vmatpush3.bf16.msra.mxu0 %v1022_v3  ;;  %v1027_v8 = vld [vmem:[%s1191_s5 + $0x88] sm:$0xff]   ;;  %v1031_v12 = vld [vmem:[%s1191_s5 + $0x90] sm:$0xff]   ;;  %v333_v39 = vunpack.c.0.s8 %v332_v37 }
  0x21   : > { %908 = vmatpush3.bf16.msra.mxu1 %v1023_v4  ;;  %887 = vmatprep.subr.bf16.mxu0 %v1024_v5  ;;  %v1032_v13 = vld [vmem:[%s1191_s5 + $0x58] sm:$0xff]   ;;  %v1036_v17 = vld [vmem:[%s1191_s5 + $0x60] sm:$0xff]   ;;  %v1040_v21 = vld [vmem:[%s1191_s5 + $0x68] sm:$0xff]  }
  0x22   : > { %909 = vmatprep.subr.bf16.mxu1 %v1025_v6  ;;  %v1033_v14 = vld [vmem:[%s1191_s5 + $0xd8] sm:$0xff]   ;;  %v1037_v18 = vld [vmem:[%s1191_s5 + $0xe0] sm:$0xff]   ;;  %v1041_v22 = vld [vmem:[%s1191_s5 + $0xe8] sm:$0xff]   ;;  %v336_v41 = vsub.s32 %v333_v39, %v335_v35 }
  0x23   : > { %v1034_v15 = vld [vmem:[%s1191_s5 + $0x18] sm:$0xff]   ;;  %v1038_v19 = vld [vmem:[%s1191_s5 + $0x20] sm:$0xff]   ;;  %v1042_v23 = vld [vmem:[%s1191_s5 + $0x28] sm:$0xff]  }
  0x24   : > { %888 = vmatpush3.bf16.msra.mxu0 %v1026_v7  ;;  %v1035_v16 = vld [vmem:[%s1191_s5 + $0x98] sm:$0xff]   ;;  %v1039_v20 = vld [vmem:[%s1191_s5 + $0xa0] sm:$0xff]   ;;  %v1043_v24 = vld [vmem:[%s1191_s5 + $0xa8] sm:$0xff]  }
  0x25   : > { %910 = vmatpush3.bf16.msra.mxu1 %v1027_v8  ;;  %889 = vmatprep.subr.bf16.mxu0 %v1028_v9  ;;  %v1044_v25 = vld [vmem:[%s1191_s5 + $0x70] sm:$0xff]   ;;  %v1048_v29 = vld [vmem:[%s1191_s5 + $0x78] sm:$0xff]   ;;  %v246_v34 = vld [vmem:[%s1196_s8] sm:$0xff] }
  0x26   : > { %911 = vmatprep.subr.bf16.mxu1 %v1029_v10  ;;  %v1045_v26 = vld [vmem:[%s1191_s5 + $0xf0] sm:$0xff]   ;;  %v1049_v31 = vld [vmem:[%s1191_s5 + $0xf8] sm:$0xff]   ;;  %v330_v40 = vcombine.high %v246_v34, %v246_v34  ;;  %v337_v42 = vrot.slane %v246_v34, %v336_v41  ;;  %v1053_v46 = vld [vmem:[%s1191_s5 + $0x100] sm:$0xff]  }
  0x27   : > { %v1046_v27 = vld [vmem:[%s1191_s5 + $0x30] sm:$0xff]   ;;  %v1050_v32 = vld [vmem:[%s1191_s5 + $0x38] sm:$0xff]   ;;  %v1054_v47 = vld [vmem:[%s1191_s5 + $0x108] sm:$0xff]  }
  0x28   : > { %890 = vmatpush3.bf16.msra.mxu0 %v1030_v11  ;;  %v1047_v28 = vld [vmem:[%s1191_s5 + $0xb0] sm:$0xff]   ;;  %v1051_v33 = vld [vmem:[%s1191_s5 + $0xb8] sm:$0xff]   ;;  %v344_v43 = vrot.slane %v330_v40, %v336_v41  ;;  %v345_v44 = vcombine.high %v337_v42, %v337_v42  ;;  %v1057_v50 = vld [vmem:[%s1191_s5 + $0x120] sm:$0xff]  }
  0x29   : > { %912 = vmatpush3.bf16.msra.mxu1 %v1031_v12  ;;  %891 = vmatprep.subr.bf16.mxu0 %v1032_v13  ;;  %v1055_v48 = vld [vmem:[%s1191_s5 + $0x110] sm:$0xff]   ;;  %v1056_v49 = vld [vmem:[%s1191_s5 + $0x118] sm:$0xff]   ;;  %v1058_v51 = vld [vmem:[%s1191_s5 + $0x128] sm:$0xff]  }
  0x2a   : > { %913 = vmatprep.subr.bf16.mxu1 %v1033_v14  ;;  %v346_v45 = vcombine.high %v344_v43, %v344_v43  ;;  %631 = vmatprep.mubr.bf16.mxu0 %v345_v44  ;;  %v1059_v52 = vld [vmem:[%s1191_s5 + $0x130] sm:$0xff]   ;;  %v1060_v53 = vld [vmem:[%s1191_s5 + $0x138] sm:$0xff]   ;;  %v840_v54 = vld.sshfl [vmem:[%s1196_s8 + $0x8] sm:$0x3 pattern:$0x76325410] }
  0x2b   : > { %v245_v2 = vld [vmem:[#allocation2] sm:$0xf] }
  0x2c   : > { %892 = vmatpush3.bf16.msra.mxu0 %v1034_v15  ;;  %671 = vmatprep.mubr.bf16.mxu1 %v346_v45  ;;  %v882_v10 = vld [vmem:[%s1274_s2] ss:$0 sm:$0xff] (!%p881_p10) }
  0x2d   : > { %914 = vmatpush3.bf16.msra.mxu1 %v1035_v16  ;;  %893 = vmatprep.subr.bf16.mxu0 %v1036_v17 }
  0x2e   : > { %915 = vmatprep.subr.bf16.mxu1 %v1037_v18 }
  0x30   : > { %894 = vmatpush3.bf16.msra.mxu0 %v1038_v19 }
  0x31   : > { %916 = vmatpush3.bf16.msra.mxu1 %v1039_v20  ;;  %895 = vmatprep.subr.bf16.mxu0 %v1040_v21 }
  0x32   : > { %917 = vmatprep.subr.bf16.mxu1 %v1041_v22 }
  0x34   : > { %896 = vmatpush3.bf16.msra.mxu0 %v1042_v23 }
  0x35   : > { %918 = vmatpush3.bf16.msra.mxu1 %v1043_v24  ;;  %897 = vmatprep.subr.bf16.mxu0 %v1044_v25 }
  0x36   : > { %919 = vmatprep.subr.bf16.mxu1 %v1045_v26 }
  0x38   : > { %898 = vmatpush3.bf16.msra.mxu0 %v1046_v27 }
  0x39   : > { %920 = vmatpush3.bf16.msra.mxu1 %v1047_v28  ;;  %899 = vmatprep.subr.bf16.mxu0 %v1048_v29 }
  0x3a   : > { %921 = vmatprep.subr.bf16.mxu1 %v1049_v31 }
  0x3c   : > { %900 = vmatpush3.bf16.msra.mxu0 %v1050_v32 }
  0x3d   : > { %922 = vmatpush3.bf16.msra.mxu1 %v1051_v33  ;;  %938 = vmatprep.subr.bf16.mxu0 %v1119_v38 }
  0x3f   : > { %632 = vmatmul.mubr.bf16.vlgmr.msra.gmra.mrb[0].mxu0 %v337_v42 }
  0x40   : > { %672 = vmatmul.mubr.bf16.vlgmr.msra.gmra.mrb[0].mxu1 %v344_v43  ;;  %939 = vmatpush3.bf16.msra.mxu0 %v1053_v46 }
  0x41   : > { %954 = vmatprep.mubr.msk.bf16.mxu0 %vm1120_vm0, %v1119_v38  ;;  %940 = vmatprep.subr.bf16.mxu0 %v1119_v38 }
  0x44   : > { %941 = vmatpush3.bf16.msra.mxu0 %v1054_v47 }
  0x45   : > { %942 = vmatprep.subr.bf16.mxu0 %v1119_v38 }
  0x48   : > { %943 = vmatpush3.bf16.msra.mxu0 %v1055_v48 }
  0x49   : > { %944 = vmatprep.subr.bf16.mxu0 %v1119_v38 }
  0x4c   : > { %945 = vmatpush3.bf16.msra.mxu0 %v1056_v49 }
  0x4d   : > { %946 = vmatprep.subr.bf16.mxu0 %v1119_v38 }
  0x50   : > { %947 = vmatpush3.bf16.msra.mxu0 %v1057_v50 }
  0x51   : > { %948 = vmatprep.subr.bf16.mxu0 %v1119_v38 }
  0x54   : > { %949 = vmatpush3.bf16.msra.mxu0 %v1058_v51 }
  0x55   : > { %950 = vmatprep.subr.bf16.mxu0 %v1119_v38 }
  0x58   : > { %951 = vmatpush3.bf16.msra.mxu0 %v1059_v52 }
  0x59   : > { %952 = vmatprep.subr.bf16.mxu0 %v1119_v38 }
  0x5c   : > { %953 = vmatpush3.bf16.msra.mxu0 %v1060_v53 }
  0x5f   : > { %955 = vmatmul.mubr.bf16.vlgmr.msra.gmra.mrb[4].mxu0 %v840_v54 }
 0x112   : > { %v901_v55 = vpop.f32.mrb[0].mxu0 }
 0x113   : > { %v923_v56 = vpop.f32.mrb[0].mxu1  ;;  %v902_v57 = vpop.f32.mrb[1].mxu0 }
 0x114   : > { %v924_v58 = vpop.f32.mrb[1].mxu1  ;;  %v903_v59 = vadd.f32 %v902_v57, %v901_v55  ;;  %v904_v61 = vpop.f32.mrb[2].mxu0 }
 0x115   : > { %v925_v60 = vadd.f32 %v924_v58, %v923_v56  ;;  %v926_v62 = vpop.f32.mrb[2].mxu1  ;;  %v905_v63 = vpop.f32.mrb[3].mxu0 }
 0x116   : > { %v927_v0 = vpop.f32.mrb[3].mxu1 }
 0x117   : > { %v674_v1 = vadd.f32 %v925_v60, %v903_v59 }
 0x131   : > { %724 = sbr.rel (%p881_p10) target bundleno = 324 (0x144), region = 40 }
 0x132   : > { %v713_v3 = vpop.f32.mrb[4].mxu0 }
 0x133   : > { %v714_v4 = vadd.f32 %v713_v3, %v674_v1  ;;  %v956_v5 = vpop.f32.mrb[5].mxu0 }
 0x134   : > { %v716_v6 = vpop.f32.mrb[6].mxu0 }
 0x135   : > { %v719_v7 = vadd.f32 %v714_v4, %v245_v2  ;;  %v957_v8 = vpop.f32.mrb[7].mxu0 }
 0x137   : > { %720 = vst [vmem:[#allocation2] sm:$0xf] %v719_v7 }
 0x13e   : > { %v725_v9 = vld [vmem:[#allocation2] sm:$0xf] }
 0x13f   : > { %v733_v11 = vadd.f32 %v882_v10, %v725_v9 }
 0x141   : > { %v734_v12 = vmax.f32 %v733_v11, 0.0 }
 0x143   : > { %735 = vst [vmem:[%s1201_s13] sm:$0xf] %v734_v12 }
 0x144 PF: > { %s13_s18 = sadd.s32 1, %s1115_s18   ;;  %s1276_s12 = smov %s1103_s15 }
 0x145   : > { %p10_p11 = scmp.ge.s32.totalorder %s13_s18, 14   ;;  %s1277_s13 = smov %s1107_s16 }
 0x146   : > { %s1278_s14 = smov %s1111_s17  ;;  %s1279_s15 = smov %s1283_s19 }
 0x147   : > { %s1280_s16 = smov %s1287_s20  ;;  %s1281_s17 = smov %s1291_s21 }
 0x148   :  { %12 = sbr.rel (!%p10_p11) target bundleno = 4 (0x4), region = 73 }

// kernel: _lambda_.20
= control target key start
LH: loop header
LB: loop body
LE: loop exit
PB: predicated region body
PF: predicated region fallthrough
CT: control target
= control target key end

     0   :  { %s660_s12 = smov 0   ;;  %s662_s13 = smov 0   ;;  %s782_s0 = inlined_call_operand.vmem [shape: bf16[4,1,128], index: 0, kind: input, shape index: {}]   ;;  %s783_s1 = inlined_call_operand.vmem [shape: bf16[1,128,256], index: 1, kind: input, shape index: {}]   ;;  %s784_s2 = inlined_call_operand.vmem [shape: f32[1,256], index: 2, kind: input, shape index: {}]   ;;  %s785_s3 = inlined_call_operand.vmem [shape: f32[4,1,256], index: 3, kind: output, shape index: {}]  }
   0x1   :  { %s664_s14 = smov 0   ;;  %s666_s15 = smov 0  }
   0x2   :  { %s668_s16 = smov 0  }
   0x3 LB: > { %s28_s17 = sadd.s32 1, %s627_s14  ;;  %s32_s18 = sadd.s32 1, %s631_s15  ;;  %s635_s16 = sphi %s668_s16, %s13_s16   ;;  %s631_s15 = sphi %s666_s15, %s791_s15   ;;  %s627_s14 = sphi %s664_s14, %s790_s14   ;;  %s623_s13 = sphi %s662_s13, %s789_s13   ;;  %s619_s12 = sphi %s660_s12, %s788_s12  }
   0x4   : > { %p30_p0 = scmp.ge.s32.totalorder %s28_s17, 2  ;;  %p508_p1 = scmp.ge.s32.totalorder %s635_s16, 1 }
   0x5   : > { %p180_p2 = scmp.lt.s32.totalorder %s635_s16, 5 }
   0x6   : > { %s793_s17 = smov (%p30_p0, %s28_s17), 0  ;;  %s795_s18 = smov (!%p30_p0, %s32_s18), %s631_s15 }
   0x7   : > { %p181_p3 = pnand %p508_p1, %p180_p2  ;;  %p34_p4 = scmp.ge.s32.totalorder %s795_s18, 2 }
   0x8   : > { %v573_v0 = vld [vmem:[%s783_s1 + $0x4] ss:$8 sps:$4 sm:$0xff] (!%p181_p3)   ;;  %v575_v1 = vld [vmem:[%s783_s1] ss:$8 sps:$4 sm:$0xff] (!%p181_p3)   ;;  %v637_v2 = vmov (!%p181_p3), 0   ;;  %s509_s10 = sshll.u32 (!%p181_p3), %s623_s13, 1  ;;  %v238_v18 = vlaneseq (!%p181_p3) }
   0x9   : > { %s797_s18 = smov (%p34_p4, %s795_s18), 0  ;;  %184 = sbr.rel (%p181_p3) target bundleno = 274 (0x112), region = 32 }
   0xa   : > { %373 = vmatprep.mubr.bf16.mxu0 (!%p181_p3), %v637_v2  ;;  %341 = vmatprep.subr.bf16.mxu0 (!%p181_p3), %v573_v0  ;;  %v576_v3 = vld [vmem:[%s783_s1 + $0x14] ss:$8 sps:$4 sm:$0xff] (!%p181_p3)   ;;  %v578_v4 = vld [vmem:[%s783_s1 + $0x10] ss:$8 sps:$4 sm:$0xff] (!%p181_p3)   ;;  %v579_v5 = vld [vmem:[%s783_s1 + $0x24] ss:$8 sps:$4 sm:$0xff] (!%p181_p3)   ;;  %s212_s22 = sadd.s32 (!%p181_p3), %s619_s12, %s509_s10 }
   0xb   : > { %342 = vmatpush1.bf16.msra.mxu0 (!%p181_p3), %v575_v1  ;;  %v581_v6 = vld [vmem:[%s783_s1 + $0x20] ss:$8 sps:$4 sm:$0xff] (!%p181_p3)   ;;  %v582_v7 = vld [vmem:[%s783_s1 + $0x34] ss:$8 sps:$4 sm:$0xff] (!%p181_p3)   ;;  %v584_v8 = vld [vmem:[%s783_s1 + $0x30] ss:$8 sps:$4 sm:$0xff] (!%p181_p3)  }
   0xc   : > { %343 = vmatprep.subr.bf16.mxu0 (!%p181_p3), %v576_v3  ;;  %v585_v9 = vld [vmem:[%s783_s1 + $0x44] ss:$8 sps:$4 sm:$0xff] (!%p181_p3)   ;;  %v587_v10 = vld [vmem:[%s783_s1 + $0x40] ss:$8 sps:$4 sm:$0xff] (!%p181_p3)   ;;  %v588_v11 = vld [vmem:[%s783_s1 + $0x54] ss:$8 sps:$4 sm:$0xff] (!%p181_p3)  }
   0xd   : > { %v590_v12 = vld [vmem:[%s783_s1 + $0x50] ss:$8 sps:$4 sm:$0xff] (!%p181_p3)   ;;  %v591_v13 = vld [vmem:[%s783_s1 + $0x64] ss:$8 sps:$4 sm:$0xff] (!%p181_p3)   ;;  %p214_p5 = scmp.lt.s32.totalorder (!%p181_p3), %s212_s22, 3  ;;  %vm750_vm0 = vcmp.lt.s32.totalorder (!%p181_p3), %v238_v18, 256 }
   0xe   : > { %v593_v14 = vld [vmem:[%s783_s1 + $0x60] ss:$8 sps:$4 sm:$0xff] (!%p181_p3)   ;;  %v594_v15 = vld [vmem:[%s783_s1 + $0x74] ss:$8 sps:$4 sm:$0xff] (!%p181_p3)   ;;  %v596_v16 = vld [vmem:[%s783_s1 + $0x70] ss:$8 sps:$4 sm:$0xff] (!%p181_p3)  }
   0xf   : > { %344 = vmatpush1.bf16.msra.mxu0 (!%p181_p3), %v578_v4  ;;  %v638_v20 = vmov (!%p181_p3), 0.0   ;;  %v639_v21 = vmov (!%p181_p3), 1966171168   ;;  %v389_v24 = vshrl.u32 (!%p181_p3), %v238_v18, 7  ;;  %v410_v35 = vld [vmem:[%s784_s2] sm:$0x3] (!%p181_p3) }
  0x10   : > { %345 = vmatprep.subr.bf16.mxu0 %v579_v5  ;;  %s799_s22 = smov (!%p214_p5, %s212_s22), 3  ;;  %242 = vst.msk [vmem:[#allocation2] sm:$0x3] %vm750_vm0, %v638_v20  ;;  %v386_v22 = vunpack.c.l.s4 %v639_v21 }
  0x11   : > { %s216_s6 = scalar_lea.vmem %s782_s0, %s799_s22  ;;  %s511_s7 = sshll.u32 %s799_s22, 1 }
  0x12   : > { %v244_v17 = vld [vmem:[%s216_s6] sm:$0x1]  ;;  %v387_v23 = vunpack.c.0.s8 %v386_v22  ;;  %s230_s19 = scalar_lea.vmem %s785_s3, %s511_s7 }
  0x13   : > { %346 = vmatpush1.bf16.msra.mxu0 %v581_v6 }
  0x14   : > { %347 = vmatprep.subr.bf16.mxu0 %v582_v7  ;;  %v390_v26 = vsub.s32 %v387_v23, %v389_v24 }
  0x17   : > { %348 = vmatpush1.bf16.msra.mxu0 %v584_v8  ;;  %v243_v32 = vld [vmem:[#allocation2] sm:$0x3] }
  0x18   : > { %349 = vmatprep.subr.bf16.mxu0 %v585_v9 }
  0x1b   : > { %350 = vmatpush1.bf16.msra.mxu0 %v587_v10 }
  0x1c   : > { %351 = vmatprep.subr.bf16.mxu0 %v588_v11 }
  0x1f   : > { %352 = vmatpush1.bf16.msra.mxu0 %v590_v12 }
  0x20   : > { %353 = vmatprep.subr.bf16.mxu0 %v591_v13 }
  0x23   : > { %354 = vmatpush1.bf16.msra.mxu0 %v593_v14 }
  0x24   : > { %355 = vmatprep.subr.bf16.mxu0 %v594_v15 }
  0x27   : > { %356 = vmatpush1.bf16.msra.mxu0 %v596_v16 }
  0x2a   : > { %374 = vmatmul.mubr.bf16.vlgmr.msra.gmra.mrb[0].mxu0 %v244_v17 }
  0xfd   : > { %v375_v25 = vpop.f32.mrb[0].mxu0 }
  0xfe   : > { %v377_v27 = vpop.f32.mrb[1].mxu0 }
  0xff   : > { %v384_v28 = vcombine.low %v375_v25, %v377_v27  ;;  %v379_v29 = vpop.f32.mrb[2].mxu0 }
 0x100   : > { %v380_v30 = vpop.f32.mrb[3].mxu0 }
 0x101   : > { %v391_v31 = vrot.slane %v384_v28, %v390_v26 }
 0x103   : > { %v398_v33 = vrot.slane %v391_v31, %v390_v26 }
 0x105   : > { %v400_v34 = vadd.f32 %v398_v33, %v243_v32 }
 0x107   : > { %405 = vst.msk [vmem:[#allocation2] sm:$0x3] %vm750_vm0, %v400_v34 }
 0x10e   : > { %v409_v36 = vld [vmem:[#allocation2] sm:$0x3] }
 0x10f   : > { %v411_v37 = vadd.f32 %v410_v35, %v409_v36 }
 0x111   : > { %412 = vst.msk [vmem:[%s230_s19] sm:$0x3] %vm750_vm0, %v411_v37 }
 0x112 PF: > { %s13_s16 = sadd.s32 1, %s635_s16   ;;  %s788_s12 = smov %s627_s14 }
 0x113   : > { %p10_p6 = scmp.ge.s32.totalorder %s13_s16, 6   ;;  %s789_s13 = smov %s631_s15 }
 0x114   : > { %s790_s14 = smov %s793_s17  ;;  %s791_s15 = smov %s797_s18 }
 0x115   :  { %12 = sbr.rel (!%p10_p6) target bundleno = 3 (0x3), region = 73 }

// kernel: _lambda_.18
= control target key start
LH: loop header
LB: loop body
LE: loop exit
PB: predicated region body
PF: predicated region fallthrough
CT: control target
= control target key end

     0   :  { %s1133_s12 = smov 0   ;;  %s1135_s13 = smov 0   ;;  %s1268_s0 = inlined_call_operand.vmem [shape: bf16[8,1,640], index: 0, kind: input, shape index: {}]   ;;  %s1269_s1 = inlined_call_operand.vmem [shape: bf16[3,640,128], index: 1, kind: input, shape index: {}]   ;;  %s1270_s2 = inlined_call_operand.vmem [shape: f32[1,128], index: 2, kind: input, shape index: {}]   ;;  %s1271_s3 = inlined_call_operand.vmem [shape: f32[4,1,128], index: 3, kind: output, shape index: {}]  }
   0x1   :  { %s1137_s14 = smov 0   ;;  %s1139_s15 = smov 0  }
   0x2   :  { %s1141_s16 = smov 0   ;;  %s1143_s17 = smov 0  }
   0x3   :  { %s1145_s18 = smov 0  }
   0x4 LB: > { %s25_s19 = sadd.s32 1, %s1095_s15  ;;  %s28_s20 = sadd.s32 1, %s1099_s16  ;;  %s1107_s18 = sphi %s1145_s18, %s13_s18   ;;  %s1103_s17 = sphi %s1143_s17, %s1277_s17   ;;  %s1099_s16 = sphi %s1141_s16, %s1276_s16   ;;  %s1095_s15 = sphi %s1139_s15, %s1275_s15   ;;  %s1091_s14 = sphi %s1137_s14, %s1274_s14   ;;  %s1087_s13 = sphi %s1135_s13, %s1273_s13   ;;  %s1083_s12 = sphi %s1133_s12, %s1272_s12  }
   0x5   : > { %p26_p0 = scmp.ge.s32.totalorder %s25_s19, 3  ;;  %p829_p1 = scmp.ge.s32.totalorder %s1107_s18, 1 }
   0x6   : > { %p181_p2 = scmp.lt.s32.totalorder %s1107_s18, 13  ;;  %s32_s21 = sadd.s32 1, %s1103_s17 }
   0x7   : > { %s1279_s19 = smov (%p26_p0, %s25_s19), 0  ;;  %s1281_s20 = smov (!%p26_p0, %s28_s20), %s1099_s16 }
   0x8   : > { %p182_p3 = pnand %p829_p1, %p181_p2  ;;  %p30_p4 = scmp.ge.s32.totalorder %s1281_s20, 2 }
   0x9   : > { %s830_s22 = sshll.u32 (!%p182_p3), %s1091_s14, 2  ;;  %p222_p6 = scmp.lt.s32.totalorder (!%p182_p3), %s1083_s12, 2 }
   0xa   : > { %s1283_s20 = smov (%p30_p4, %s1281_s20), 0  ;;  %s1285_s21 = smov (!%p30_p4, %s32_s21), %s1103_s17 }
   0xb   : > { %p34_p5 = scmp.ge.s32.totalorder %s1285_s21, 2  ;;  %185 = sbr.rel (%p182_p3) target bundleno = 324 (0x144), region = 32 }
   0xc   : > { %s213_s23 = sadd.s32 (!%p182_p3), %s1087_s13, %s830_s22  ;;  %s832_s24 = sshll.u32 (!%p182_p3), %s1091_s14, 1 }
   0xd   : > { %s1287_s21 = smov (%p34_p5, %s1285_s21), 0  ;;  %s214_s25 = sadd.s32 (!%p182_p3), %s1083_s12, %s213_s23 }
   0xe   : > { %p215_p7 = scmp.lt.s32.totalorder (!%p182_p3), %s214_s25, 7  ;;  %s228_s26 = sadd.s32 (!%p182_p3), %s1087_s13, %s832_s24 }
   0xf   : > { %p229_p8 = scmp.lt.s32.totalorder (!%p182_p3), %s228_s26, 3  ;;  %p833_p9 = scmp.ne.s32.totalorder (!%p182_p3), %s1083_s12, 0 }
  0x12   : > { %s223_s27 = scalar_select %p222_p6, %s1083_s12, 2 }
  0x13   : > { %s1289_s25 = smov (!%p215_p7, %s214_s25), 7  ;;  %s1291_s26 = smov (!%p229_p8, %s228_s26), 3 }
  0x14   : > { %s951_s28 = smul.u32 320, %s223_s27  ;;  %s231_s11 = scalar_lea.vmem %s1271_s3, %s1291_s26  ;;  %v1109_v0 = vmov (!%p833_p9), 0.0  }
  0x15   : > { %s950_s29 = smul.u32 5, %s1289_s25  ;;  %239 = vst [vmem:[#allocation2] sm:$0x1] (!%p833_p9), %v1109_v0 }
  0x16   : > { %s1183_s5 = scalar_lea.vmem %s1269_s1, %s951_s28  ;;  %238 = sbr.rel (%p833_p9) target bundleno = 29 (0x1d), region = 36 }
  0x17   : > { %s1188_s8 = scalar_lea.vmem %s1268_s0, %s950_s29 }
  0x1d PF: > { %v1012_v1 = vld [vmem:[%s1183_s5 + $0x40] sm:$0xff]   ;;  %v1016_v5 = vld [vmem:[%s1183_s5 + $0x48] sm:$0xff]   ;;  %v1020_v9 = vld [vmem:[%s1183_s5 + $0x50] sm:$0xff]   ;;  %v327_v31 = vlaneseq  ;;  %v1110_v34 = vmov 1966171168   ;;  %v1111_v37 = vmov 0.0  }
  0x1e   : > { %v1013_v2 = vld [vmem:[%s1183_s5 + $0xc0] sm:$0xff]   ;;  %877 = vmatprep.subr.bf16.mxu0 %v1012_v1  ;;  %v1017_v6 = vld [vmem:[%s1183_s5 + $0xc8] sm:$0xff]   ;;  %v1021_v10 = vld [vmem:[%s1183_s5 + $0xd0] sm:$0xff]   ;;  %v325_v35 = vunpack.c.l.s4 %v1110_v34  ;;  %vm1112_vm0 = vmmov 0   ;;  %p874_p10 = scmp.ne.s32.totalorder %s1083_s12, 2 }
  0x1f   : > { %v1014_v3 = vld [vmem:[%s1183_s5] sm:$0xff]   ;;  %899 = vmatprep.subr.bf16.mxu1 %v1013_v2  ;;  %v1018_v7 = vld [vmem:[%s1183_s5 + $0x8] sm:$0xff]   ;;  %v1022_v11 = vld [vmem:[%s1183_s5 + $0x10] sm:$0xff]   ;;  %v328_v36 = vshrl.u32 %v327_v31, 7 }
  0x20   : > { %v1015_v4 = vld [vmem:[%s1183_s5 + $0x80] sm:$0xff]   ;;  %878 = vmatpush3.bf16.msra.mxu0 %v1014_v3  ;;  %v1019_v8 = vld [vmem:[%s1183_s5 + $0x88] sm:$0xff]   ;;  %v1023_v12 = vld [vmem:[%s1183_s5 + $0x90] sm:$0xff]   ;;  %v326_v38 = vunpack.c.0.s8 %v325_v35 }
  0x21   : > { %900 = vmatpush3.bf16.msra.mxu1 %v1015_v4  ;;  %879 = vmatprep.subr.bf16.mxu0 %v1016_v5  ;;  %v1024_v13 = vld [vmem:[%s1183_s5 + $0x58] sm:$0xff]   ;;  %v1028_v17 = vld [vmem:[%s1183_s5 + $0x60] sm:$0xff]   ;;  %v1032_v21 = vld [vmem:[%s1183_s5 + $0x68] sm:$0xff]  }
  0x22   : > { %901 = vmatprep.subr.bf16.mxu1 %v1017_v6  ;;  %v1025_v14 = vld [vmem:[%s1183_s5 + $0xd8] sm:$0xff]   ;;  %v1029_v18 = vld [vmem:[%s1183_s5 + $0xe0] sm:$0xff]   ;;  %v1033_v22 = vld [vmem:[%s1183_s5 + $0xe8] sm:$0xff]   ;;  %v329_v40 = vsub.s32 %v326_v38, %v328_v36 }
  0x23   : > { %v1026_v15 = vld [vmem:[%s1183_s5 + $0x18] sm:$0xff]   ;;  %v1030_v19 = vld [vmem:[%s1183_s5 + $0x20] sm:$0xff]   ;;  %v1034_v23 = vld [vmem:[%s1183_s5 + $0x28] sm:$0xff]  }
  0x24   : > { %880 = vmatpush3.bf16.msra.mxu0 %v1018_v7  ;;  %v1027_v16 = vld [vmem:[%s1183_s5 + $0x98] sm:$0xff]   ;;  %v1031_v20 = vld [vmem:[%s1183_s5 + $0xa0] sm:$0xff]   ;;  %v1035_v24 = vld [vmem:[%s1183_s5 + $0xa8] sm:$0xff]  }
  0x25   : > { %902 = vmatpush3.bf16.msra.mxu1 %v1019_v8  ;;  %881 = vmatprep.subr.bf16.mxu0 %v1020_v9  ;;  %v1036_v25 = vld [vmem:[%s1183_s5 + $0x70] sm:$0xff]   ;;  %v1040_v29 = vld [vmem:[%s1183_s5 + $0x78] sm:$0xff]   ;;  %v241_v39 = vld [vmem:[%s1188_s8] sm:$0x1f] }
  0x26   : > { %903 = vmatprep.subr.bf16.mxu1 %v1021_v10  ;;  %v1037_v26 = vld [vmem:[%s1183_s5 + $0xf0] sm:$0xff]   ;;  %v1041_v30 = vld [vmem:[%s1183_s5 + $0xf8] sm:$0xff]   ;;  %v330_v41 = vrot.slane %v241_v39, %v329_v40  ;;  %v1045_v45 = vld [vmem:[%s1183_s5 + $0x100] sm:$0xff]   ;;  %v323_v53 = vcombine.high %v241_v39, %v241_v39 }
  0x27   : > { %v1038_v27 = vld [vmem:[%s1183_s5 + $0x30] sm:$0xff]   ;;  %v1042_v32 = vld [vmem:[%s1183_s5 + $0x38] sm:$0xff]   ;;  %v1046_v48 = vld [vmem:[%s1183_s5 + $0x108] sm:$0xff]  }
  0x28   : > { %882 = vmatpush3.bf16.msra.mxu0 %v1022_v11  ;;  %v1039_v28 = vld [vmem:[%s1183_s5 + $0xb0] sm:$0xff]   ;;  %v1043_v33 = vld [vmem:[%s1183_s5 + $0xb8] sm:$0xff]   ;;  %v338_v42 = vcombine.high %v330_v41, %v330_v41  ;;  %v345_v43 = vrot.slane %v330_v41, %v329_v40  ;;  %v1049_v51 = vld [vmem:[%s1183_s5 + $0x120] sm:$0xff]   ;;  %v337_v55 = vrot.slane %v323_v53, %v329_v40 }
  0x29   : > { %904 = vmatpush3.bf16.msra.mxu1 %v1023_v12  ;;  %883 = vmatprep.subr.bf16.mxu0 %v1024_v13  ;;  %v1047_v49 = vld [vmem:[%s1183_s5 + $0x110] sm:$0xff]   ;;  %v1048_v50 = vld [vmem:[%s1183_s5 + $0x118] sm:$0xff]   ;;  %v1050_v52 = vld [vmem:[%s1183_s5 + $0x128] sm:$0xff]  }
  0x2a   : > { %905 = vmatprep.subr.bf16.mxu1 %v1025_v14  ;;  %v359_v44 = vrot.slane %v338_v42, %v329_v40  ;;  %v360_v46 = vcombine.high %v345_v43, %v345_v43  ;;  %v1051_v54 = vld [vmem:[%s1183_s5 + $0x130] sm:$0xff]   ;;  %v1052_v56 = vld [vmem:[%s1183_s5 + $0x138] sm:$0xff]   ;;  %v352_v57 = vrot.slane %v337_v55, %v329_v40  ;;  %v240_v5 = vld [vmem:[#allocation2] sm:$0x1] }
  0x2b   : > { %v734_v13 = vld [vmem:[%s1270_s2] sm:$0x1] (!%p874_p10) }
  0x2c   : > { %884 = vmatpush3.bf16.msra.mxu0 %v1026_v15  ;;  %639 = vmatprep.mubr.bf16.mxu0 %v359_v44  ;;  %v361_v47 = vcombine.high %v359_v44, %v359_v44 }
  0x2d   : > { %906 = vmatpush3.bf16.msra.mxu1 %v1027_v16  ;;  %885 = vmatprep.subr.bf16.mxu0 %v1028_v17 }
  0x2e   : > { %907 = vmatprep.subr.bf16.mxu1 %v1029_v18  ;;  %679 = vmatprep.mubr.bf16.mxu1 %v361_v47 }
  0x30   : > { %886 = vmatpush3.bf16.msra.mxu0 %v1030_v19 }
  0x31   : > { %908 = vmatpush3.bf16.msra.mxu1 %v1031_v20  ;;  %887 = vmatprep.subr.bf16.mxu0 %v1032_v21 }
  0x32   : > { %909 = vmatprep.subr.bf16.mxu1 %v1033_v22 }
  0x34   : > { %888 = vmatpush3.bf16.msra.mxu0 %v1034_v23 }
  0x35   : > { %910 = vmatpush3.bf16.msra.mxu1 %v1035_v24  ;;  %889 = vmatprep.subr.bf16.mxu0 %v1036_v25 }
  0x36   : > { %911 = vmatprep.subr.bf16.mxu1 %v1037_v26 }
  0x38   : > { %890 = vmatpush3.bf16.msra.mxu0 %v1038_v27 }
  0x39   : > { %912 = vmatpush3.bf16.msra.mxu1 %v1039_v28  ;;  %891 = vmatprep.subr.bf16.mxu0 %v1040_v29 }
  0x3a   : > { %913 = vmatprep.subr.bf16.mxu1 %v1041_v30 }
  0x3c   : > { %892 = vmatpush3.bf16.msra.mxu0 %v1042_v32 }
  0x3d   : > { %914 = vmatpush3.bf16.msra.mxu1 %v1043_v33  ;;  %930 = vmatprep.subr.bf16.mxu0 %v1111_v37 }
  0x3f   : > { %640 = vmatmul.mubr.bf16.vlgmr.msra.gmra.mrb[0].mxu0 %v345_v43 }
  0x40   : > { %931 = vmatpush3.bf16.msra.mxu0 %v1045_v45  ;;  %680 = vmatmul.mubr.bf16.vlgmr.msra.gmra.mrb[0].mxu1 %v360_v46 }
  0x41   : > { %932 = vmatprep.subr.bf16.mxu0 %v1111_v37  ;;  %946 = vmatprep.mubr.msk.bf16.mxu0 %vm1112_vm0, %v1111_v37 }
  0x44   : > { %933 = vmatpush3.bf16.msra.mxu0 %v1046_v48 }
  0x45   : > { %934 = vmatprep.subr.bf16.mxu0 %v1111_v37 }
  0x48   : > { %935 = vmatpush3.bf16.msra.mxu0 %v1047_v49 }
  0x49   : > { %936 = vmatprep.subr.bf16.mxu0 %v1111_v37 }
  0x4c   : > { %937 = vmatpush3.bf16.msra.mxu0 %v1048_v50 }
  0x4d   : > { %938 = vmatprep.subr.bf16.mxu0 %v1111_v37 }
  0x50   : > { %939 = vmatpush3.bf16.msra.mxu0 %v1049_v51 }
  0x51   : > { %940 = vmatprep.subr.bf16.mxu0 %v1111_v37 }
  0x54   : > { %941 = vmatpush3.bf16.msra.mxu0 %v1050_v52 }
  0x55   : > { %942 = vmatprep.subr.bf16.mxu0 %v1111_v37 }
  0x58   : > { %943 = vmatpush3.bf16.msra.mxu0 %v1051_v54 }
  0x59   : > { %944 = vmatprep.subr.bf16.mxu0 %v1111_v37 }
  0x5c   : > { %945 = vmatpush3.bf16.msra.mxu0 %v1052_v56 }
  0x5f   : > { %947 = vmatmul.mubr.bf16.vlgmr.msra.gmra.mrb[4].mxu0 %v352_v57 }
 0x112   : > { %v893_v58 = vpop.f32.mrb[0].mxu0 }
 0x113   : > { %v894_v59 = vpop.f32.mrb[1].mxu0  ;;  %v915_v60 = vpop.f32.mrb[0].mxu1 }
 0x114   : > { %v895_v61 = vadd.f32 %v894_v59, %v893_v58  ;;  %v896_v62 = vpop.f32.mrb[2].mxu0  ;;  %v916_v63 = vpop.f32.mrb[1].mxu1 }
 0x115   : > { %v897_v0 = vpop.f32.mrb[3].mxu0  ;;  %v917_v1 = vadd.f32 %v916_v63, %v915_v60  ;;  %v918_v2 = vpop.f32.mrb[2].mxu1 }
 0x116   : > { %v919_v3 = vpop.f32.mrb[3].mxu1 }
 0x117   : > { %v682_v4 = vadd.f32 %v917_v1, %v895_v61 }
 0x131   : > { %732 = sbr.rel (%p874_p10) target bundleno = 324 (0x144), region = 40 }
 0x132   : > { %v721_v6 = vpop.f32.mrb[4].mxu0 }
 0x133   : > { %v722_v7 = vadd.f32 %v721_v6, %v682_v4  ;;  %v948_v8 = vpop.f32.mrb[5].mxu0 }
 0x134   : > { %v724_v9 = vpop.f32.mrb[6].mxu0 }
 0x135   : > { %v727_v10 = vadd.f32 %v722_v7, %v240_v5  ;;  %v949_v11 = vpop.f32.mrb[7].mxu0 }
 0x137   : > { %728 = vst [vmem:[#allocation2] sm:$0x1] %v727_v10 }
 0x13e   : > { %v733_v12 = vld [vmem:[#allocation2] sm:$0x1] }
 0x13f   : > { %v735_v14 = vadd.f32 %v734_v13, %v733_v12 }
 0x141   : > { %v736_v15 = vmax.f32 %v735_v14, 0.0 }
 0x143   : > { %737 = vst [vmem:[%s231_s11] sm:$0x1] %v736_v15 }
 0x144 PF: > { %s13_s18 = sadd.s32 1, %s1107_s18   ;;  %s1272_s12 = smov %s1095_s15 }
 0x145   : > { %p10_p11 = scmp.ge.s32.totalorder %s13_s18, 14   ;;  %s1273_s13 = smov %s1099_s16 }
 0x146   : > { %s1274_s14 = smov %s1103_s17  ;;  %s1275_s15 = smov %s1279_s19 }
 0x147   : > { %s1276_s16 = smov %s1283_s20  ;;  %s1277_s17 = smov %s1287_s21 }
 0x148   :  { %12 = sbr.rel (!%p10_p11) target bundleno = 4 (0x4), region = 73 }

// kernel: _lambda_.21
= control target key start
LH: loop header
LB: loop body
LE: loop exit
PB: predicated region body
PF: predicated region fallthrough
CT: control target
= control target key end

     0   :  { %s660_s12 = smov 0   ;;  %s662_s13 = smov 0   ;;  %s782_s0 = inlined_call_operand.vmem [shape: bf16[8,1,128], index: 0, kind: input, shape index: {}]   ;;  %s783_s1 = inlined_call_operand.vmem [shape: bf16[1,128,256], index: 1, kind: input, shape index: {}]   ;;  %s784_s2 = inlined_call_operand.vmem [shape: f32[1,256], index: 2, kind: input, shape index: {}]   ;;  %s785_s3 = inlined_call_operand.vmem [shape: f32[8,1,256], index: 3, kind: output, shape index: {}]  }
   0x1   :  { %s664_s14 = smov 0   ;;  %s666_s15 = smov 0  }
   0x2   :  { %s668_s16 = smov 0  }
   0x3 LB: > { %s28_s17 = sadd.s32 1, %s627_s14  ;;  %s32_s18 = sadd.s32 1, %s631_s15  ;;  %s635_s16 = sphi %s668_s16, %s13_s16   ;;  %s631_s15 = sphi %s666_s15, %s791_s15   ;;  %s627_s14 = sphi %s664_s14, %s790_s14   ;;  %s623_s13 = sphi %s662_s13, %s789_s13   ;;  %s619_s12 = sphi %s660_s12, %s788_s12  }
   0x4   : > { %p30_p0 = scmp.ge.s32.totalorder %s28_s17, 4  ;;  %p508_p1 = scmp.ge.s32.totalorder %s635_s16, 1 }
   0x5   : > { %p180_p2 = scmp.lt.s32.totalorder %s635_s16, 9 }
   0x6   : > { %s793_s17 = smov (%p30_p0, %s28_s17), 0  ;;  %s795_s18 = smov (!%p30_p0, %s32_s18), %s631_s15 }
   0x7   : > { %p181_p3 = pnand %p508_p1, %p180_p2  ;;  %p34_p4 = scmp.ge.s32.totalorder %s795_s18, 2 }
   0x8   : > { %v573_v0 = vld [vmem:[%s783_s1 + $0x4] ss:$8 sps:$4 sm:$0xff] (!%p181_p3)   ;;  %v575_v1 = vld [vmem:[%s783_s1] ss:$8 sps:$4 sm:$0xff] (!%p181_p3)   ;;  %v637_v2 = vmov (!%p181_p3), 0   ;;  %s509_s10 = sshll.u32 (!%p181_p3), %s623_s13, 2  ;;  %v238_v18 = vlaneseq (!%p181_p3) }
   0x9   : > { %s797_s18 = smov (%p34_p4, %s795_s18), 0  ;;  %184 = sbr.rel (%p181_p3) target bundleno = 274 (0x112), region = 32 }
   0xa   : > { %373 = vmatprep.mubr.bf16.mxu0 (!%p181_p3), %v637_v2  ;;  %341 = vmatprep.subr.bf16.mxu0 (!%p181_p3), %v573_v0  ;;  %v576_v3 = vld [vmem:[%s783_s1 + $0x14] ss:$8 sps:$4 sm:$0xff] (!%p181_p3)   ;;  %v578_v4 = vld [vmem:[%s783_s1 + $0x10] ss:$8 sps:$4 sm:$0xff] (!%p181_p3)   ;;  %v579_v5 = vld [vmem:[%s783_s1 + $0x24] ss:$8 sps:$4 sm:$0xff] (!%p181_p3)   ;;  %s212_s22 = sadd.s32 (!%p181_p3), %s619_s12, %s509_s10 }
   0xb   : > { %342 = vmatpush1.bf16.msra.mxu0 (!%p181_p3), %v575_v1  ;;  %v581_v6 = vld [vmem:[%s783_s1 + $0x20] ss:$8 sps:$4 sm:$0xff] (!%p181_p3)   ;;  %v582_v7 = vld [vmem:[%s783_s1 + $0x34] ss:$8 sps:$4 sm:$0xff] (!%p181_p3)   ;;  %v584_v8 = vld [vmem:[%s783_s1 + $0x30] ss:$8 sps:$4 sm:$0xff] (!%p181_p3)  }
   0xc   : > { %343 = vmatprep.subr.bf16.mxu0 (!%p181_p3), %v576_v3  ;;  %v585_v9 = vld [vmem:[%s783_s1 + $0x44] ss:$8 sps:$4 sm:$0xff] (!%p181_p3)   ;;  %v587_v10 = vld [vmem:[%s783_s1 + $0x40] ss:$8 sps:$4 sm:$0xff] (!%p181_p3)   ;;  %v588_v11 = vld [vmem:[%s783_s1 + $0x54] ss:$8 sps:$4 sm:$0xff] (!%p181_p3)  }
   0xd   : > { %v590_v12 = vld [vmem:[%s783_s1 + $0x50] ss:$8 sps:$4 sm:$0xff] (!%p181_p3)   ;;  %v591_v13 = vld [vmem:[%s783_s1 + $0x64] ss:$8 sps:$4 sm:$0xff] (!%p181_p3)   ;;  %p214_p5 = scmp.lt.s32.totalorder (!%p181_p3), %s212_s22, 7  ;;  %vm750_vm0 = vcmp.lt.s32.totalorder (!%p181_p3), %v238_v18, 256 }
   0xe   : > { %v593_v14 = vld [vmem:[%s783_s1 + $0x60] ss:$8 sps:$4 sm:$0xff] (!%p181_p3)   ;;  %v594_v15 = vld [vmem:[%s783_s1 + $0x74] ss:$8 sps:$4 sm:$0xff] (!%p181_p3)   ;;  %v596_v16 = vld [vmem:[%s783_s1 + $0x70] ss:$8 sps:$4 sm:$0xff] (!%p181_p3)  }
   0xf   : > { %344 = vmatpush1.bf16.msra.mxu0 (!%p181_p3), %v578_v4  ;;  %v638_v20 = vmov (!%p181_p3), 0.0   ;;  %v639_v21 = vmov (!%p181_p3), 1966171168   ;;  %v389_v24 = vshrl.u32 (!%p181_p3), %v238_v18, 7  ;;  %v410_v35 = vld [vmem:[%s784_s2] sm:$0x3] (!%p181_p3) }
  0x10   : > { %345 = vmatprep.subr.bf16.mxu0 %v579_v5  ;;  %s799_s22 = smov (!%p214_p5, %s212_s22), 7  ;;  %242 = vst.msk [vmem:[#allocation2] sm:$0x3] %vm750_vm0, %v638_v20  ;;  %v386_v22 = vunpack.c.l.s4 %v639_v21 }
  0x11   : > { %s216_s6 = scalar_lea.vmem %s782_s0, %s799_s22  ;;  %s511_s7 = sshll.u32 %s799_s22, 1 }
  0x12   : > { %v244_v17 = vld [vmem:[%s216_s6] sm:$0x1]  ;;  %v387_v23 = vunpack.c.0.s8 %v386_v22  ;;  %s230_s19 = scalar_lea.vmem %s785_s3, %s511_s7 }
  0x13   : > { %346 = vmatpush1.bf16.msra.mxu0 %v581_v6 }
  0x14   : > { %347 = vmatprep.subr.bf16.mxu0 %v582_v7  ;;  %v390_v26 = vsub.s32 %v387_v23, %v389_v24 }
  0x17   : > { %348 = vmatpush1.bf16.msra.mxu0 %v584_v8  ;;  %v243_v32 = vld [vmem:[#allocation2] sm:$0x3] }
  0x18   : > { %349 = vmatprep.subr.bf16.mxu0 %v585_v9 }
  0x1b   : > { %350 = vmatpush1.bf16.msra.mxu0 %v587_v10 }
  0x1c   : > { %351 = vmatprep.subr.bf16.mxu0 %v588_v11 }
  0x1f   : > { %352 = vmatpush1.bf16.msra.mxu0 %v590_v12 }
  0x20   : > { %353 = vmatprep.subr.bf16.mxu0 %v591_v13 }
  0x23   : > { %354 = vmatpush1.bf16.msra.mxu0 %v593_v14 }
  0x24   : > { %355 = vmatprep.subr.bf16.mxu0 %v594_v15 }
  0x27   : > { %356 = vmatpush1.bf16.msra.mxu0 %v596_v16 }
  0x2a   : > { %374 = vmatmul.mubr.bf16.vlgmr.msra.gmra.mrb[0].mxu0 %v244_v17 }
  0xfd   : > { %v375_v25 = vpop.f32.mrb[0].mxu0 }
  0xfe   : > { %v377_v27 = vpop.f32.mrb[1].mxu0 }
  0xff   : > { %v384_v28 = vcombine.low %v375_v25, %v377_v27  ;;  %v379_v29 = vpop.f32.mrb[2].mxu0 }
 0x100   : > { %v380_v30 = vpop.f32.mrb[3].mxu0 }
 0x101   : > { %v391_v31 = vrot.slane %v384_v28, %v390_v26 }
 0x103   : > { %v398_v33 = vrot.slane %v391_v31, %v390_v26 }
 0x105   : > { %v400_v34 = vadd.f32 %v398_v33, %v243_v32 }
 0x107   : > { %405 = vst.msk [vmem:[#allocation2] sm:$0x3] %vm750_vm0, %v400_v34 }
 0x10e   : > { %v409_v36 = vld [vmem:[#allocation2] sm:$0x3] }
 0x10f   : > { %v411_v37 = vadd.f32 %v410_v35, %v409_v36 }
 0x111   : > { %412 = vst.msk [vmem:[%s230_s19] sm:$0x3] %vm750_vm0, %v411_v37 }
 0x112 PF: > { %s13_s16 = sadd.s32 1, %s635_s16   ;;  %s788_s12 = smov %s627_s14 }
 0x113   : > { %p10_p6 = scmp.ge.s32.totalorder %s13_s16, 10   ;;  %s789_s13 = smov %s631_s15 }
 0x114   : > { %s790_s14 = smov %s793_s17  ;;  %s791_s15 = smov %s797_s18 }
 0x115   :  { %12 = sbr.rel (!%p10_p6) target bundleno = 3 (0x3), region = 73 }

</bundles_post_ra>
